<compile_context>
chip_gen: v7x
topology: tpu7x:2x2x1
jax: 0.10.0
libtpu: 0.0.40
codegen_flags: <defaults>
</compile_context>

<pallas_src>
import functools
import math

import jax
import jax.numpy as jnp
import numpy as np
from jax.experimental import pallas as pl
from jax.experimental.pallas import tpu as pltpu

EPS = 1e-5  # PyTorch nn.LayerNorm default


# ---------------------------------------------------------------------------
# In-kernel helpers (operate on VMEM-resident values, not refs)
# ---------------------------------------------------------------------------
def _layernorm_fused(y, gamma, beta, eps):
    """Single-pass LayerNorm: sum and sum-of-squares reductions are independent."""
    inv_n = 1.0 / y.shape[-1]
    s1 = jnp.sum(y, axis=-1, keepdims=True)
    s2 = jnp.sum(y * y, axis=-1, keepdims=True)
    mean = s1 * inv_n
    var = jnp.maximum(s2 * inv_n - mean * mean, 0.0)   # biased, like torch
    return (y - mean) * jax.lax.rsqrt(var + eps) * gamma + beta


def _mha_block(xq, xkv, mask, wq, bq, wk, bk, wv, bv, wfc, bfc, gamma, beta,
               *, n_b, s_q, s_kv, num_heads, head_dim, eps, approx_recip):
    """Multi-head attention + residual + LayerNorm over a block of n_b batches.

    xq: [n_b*s_q, D] f32, xkv: [n_b*s_kv, D] f32,
    mask: [n_b, s_q, s_kv] f32 (>0 masked) or None (static).
    The weight dtype (f32 or bf16) selects the MXU operand dtype; accumulation,
    softmax and LayerNorm stay f32.
    """
    cd = wq.dtype
    hd = num_heads * head_dim

    # Row-folded, lane-dense QKV projections for all batch elements at once.
    q = jnp.dot(xq.astype(cd), wq, preferred_element_type=jnp.float32) + bq
    k = jnp.dot(xkv.astype(cd), wk, preferred_element_type=jnp.float32) + bk
    v = jnp.dot(xkv.astype(cd), wv, preferred_element_type=jnp.float32) + bv

    scale = 1.0 / math.sqrt(head_dim)
    neg = jnp.float32(-1.0e9)

    def split_heads(x, s):   # [s, H*dh] -> [H, s, dh]  (one relayout)
        return jnp.transpose(x.reshape(s, num_heads, head_dim), (1, 0, 2))

    ctx_rows = []
    for b in range(n_b):     # static unroll: attention is per batch element
        qh = split_heads(q[b * s_q:(b + 1) * s_q], s_q)
        kh = split_heads(k[b * s_kv:(b + 1) * s_kv], s_kv)
        vh = split_heads(v[b * s_kv:(b + 1) * s_kv], s_kv)

        # One H-batched score matmul.
        s = jnp.einsum("hqd,hkd->hqk", qh.astype(cd), kh.astype(cd),
                       preferred_element_type=jnp.float32) * scale
        if mask is not None:             # static branch: cross-attn omits it
            masked = mask[b] > 0.0       # one compare per (q, k), hoisted
            s = jnp.where(masked[None, :, :], neg, s)
        m = jnp.max(s, axis=-1, keepdims=True)
        e = jnp.exp(s - m)
        denom = jnp.sum(e, axis=-1, keepdims=True)
        p = e * pl.reciprocal(denom, approx=approx_recip)      # EUP divide
        ctx = jnp.einsum("hqk,hkd->hqd", p.astype(cd), vh.astype(cd),
                         preferred_element_type=jnp.float32)   # [H, s_q, dh]
        # Re-pack heads lane-dense with one relayout: [H, s_q, dh] -> [s_q, H*dh]
        ctx_rows.append(jnp.transpose(ctx, (1, 0, 2)).reshape(s_q, hd))

    ctx_all = jnp.concatenate(ctx_rows, axis=0) if n_b > 1 else ctx_rows[0]
    # Single output projection over all rows; contraction = H*dh (lane-dense).
    y = jnp.dot(ctx_all.astype(cd), wfc, preferred_element_type=jnp.float32)
    y = y + bfc + xq                     # bias + residual
    return _layernorm_fused(y, gamma, beta, eps)


# ---------------------------------------------------------------------------
# Fused DecoderLayer kernel (Bt batch elements per grid step)
# ---------------------------------------------------------------------------
def decoder_layer_kernel(
        dec_ref, enc_ref, mask_ref,
        sa_wq, sa_bq, sa_wk, sa_bk, sa_wv, sa_bv, sa_wfc, sa_bfc, sa_g, sa_b,
        ca_wq, ca_bq, ca_wk, ca_bk, ca_wv, ca_bv, ca_wfc, ca_bfc, ca_g, ca_b,
        ff_w1, ff_w2, ff_g, ff_b,
        out_ref, *, num_heads, head_dim, eps, approx_recip):
    n_b, s_d, d = dec_ref.shape
    s_e = enc_ref.shape[1]

    dec = dec_ref[...].reshape(n_b * s_d, d).astype(jnp.float32)
    enc = enc_ref[...].reshape(n_b * s_e, d).astype(jnp.float32)
    mask = mask_ref[...]                 # [n_b, s_d, s_d] f32, >0 means masked

    # 1) masked self-attention + residual + LayerNorm
    x = _mha_block(dec, dec, mask,
                   sa_wq[...], sa_bq[...], sa_wk[...], sa_bk[...], sa_wv[...],
                   sa_bv[...], sa_wfc[...], sa_bfc[...], sa_g[...], sa_b[...],
                   n_b=n_b, s_q=s_d, s_kv=s_d, num_heads=num_heads,
                   head_dim=head_dim, eps=eps, approx_recip=approx_recip)
    # 2) cross-attention (mask-free variant) + residual + LayerNorm
    x = _mha_block(x, enc, None,
                   ca_wq[...], ca_bq[...], ca_wk[...], ca_bk[...], ca_wv[...],
                   ca_bv[...], ca_wfc[...], ca_bfc[...], ca_g[...], ca_b[...],
                   n_b=n_b, s_q=s_d, s_kv=s_e, num_heads=num_heads,
                   head_dim=head_dim, eps=eps, approx_recip=approx_recip)
    # 3) position-wise FFN + residual + LayerNorm (row-folded matmuls)
    w1 = ff_w1[...]
    w2 = ff_w2[...]
    cd = w1.dtype
    h = jnp.maximum(
        jnp.dot(x.astype(cd), w1, preferred_element_type=jnp.float32), 0.0)
    y = jnp.dot(h.astype(cd), w2, preferred_element_type=jnp.float32) + x
    y = _layernorm_fused(y, ff_g[...], ff_b[...], eps)
    out_ref[...] = y.reshape(n_b, s_d, d).astype(out_ref.dtype)


def decoder_layer(dec_inputs, enc_outputs, dec_self_attn_mask, params,
                  num_heads, d_model, *, compute_dtype=jnp.bfloat16,
                  batch_block=None):
    """Single fused pallas_call: self-MHA -> cross-MHA -> FFN, grid over batch blocks."""
    B, Sd, D = dec_inputs.shape
    Se = enc_outputs.shape[1]
    HD = num_heads * d_model
    Dh = params["ffn"][0].shape[1]

    # --- batch blocking: fold Bt batch elements into each grid step ---------
    if batch_block is None:
        divisors = [d for d in range(1, B + 1) if B % d == 0]
        preferred = [d for d in divisors if 256 <= d * Sd <= 1024]
        if preferred:
            batch_block = preferred[0]
        else:
            fit = [d for d in divisors if d * Sd <= 1024]
            batch_block = max(fit) if fit else 1
    Bt = batch_block
    assert B % Bt == 0, "batch_block must divide the batch size"
    grid = (B // Bt,)

    # --- bf16 MXU operands (matmul weights only); biases / LN params stay f32
    compute_dtype = jnp.dtype(compute_dtype)
    cast = lambda w: w.astype(compute_dtype)
    sa = params["self_attn"]
    ca = params["cross_attn"]
    ff = params["ffn"]
    sa = (cast(sa[0]), sa[1], cast(sa[2]), sa[3], cast(sa[4]), sa[5],
          cast(sa[6]), sa[7], sa[8], sa[9])
    ca = (cast(ca[0]), ca[1], cast(ca[2]), ca[3], cast(ca[4]), ca[5],
          cast(ca[6]), ca[7], ca[8], ca[9])
    ff = (cast(ff[0]), cast(ff[1]), ff[2], ff[3])

    kernel = functools.partial(
        decoder_layer_kernel, num_heads=num_heads, head_dim=d_model, eps=EPS,
        approx_recip=bool(compute_dtype == jnp.dtype(jnp.bfloat16)))

    def full(shape):
        return pl.BlockSpec(shape, lambda g: (0,) * len(shape))

    def attn_w_specs():
        return [full((D, HD)), full((1, HD)),
                full((D, HD)), full((1, HD)),
                full((D, HD)), full((1, HD)),
                full((HD, D)), full((1, D)),
                full((1, D)), full((1, D))]

    ffn_w_specs = [full((D, Dh)), full((Dh, D)), full((1, D)), full((1, D))]

    # --- explicit VMEM budget (v5e default scoped limit is only 16 MiB) -----
    def nbytes(a):
        return int(np.prod(a.shape)) * jnp.dtype(a.dtype).itemsize
    weight_bytes = sum(nbytes(a) for a in (*sa, *ca, *ff))
    act_bytes = (2 * Bt * Sd * D + Bt * Se * D + Bt * Sd * Sd) * \
        jnp.dtype(dec_inputs.dtype).itemsize
    vmem_limit = int(min(64 * 2 ** 20,
                         max(32 * 2 ** 20,
                             2 * (2 * weight_bytes + 2 * act_bytes))))

    return pl.pallas_call(
        kernel,
        out_shape=jax.ShapeDtypeStruct((B, Sd, D), dec_inputs.dtype),
        grid=grid,
        in_specs=[
            pl.BlockSpec((Bt, Sd, D), lambda g: (g, 0, 0)),
            pl.BlockSpec((Bt, Se, D), lambda g: (g, 0, 0)),
            pl.BlockSpec((Bt, Sd, Sd), lambda g: (g, 0, 0)),
            *attn_w_specs(), *attn_w_specs(), *ffn_w_specs,
        ],
        out_specs=pl.BlockSpec((Bt, Sd, D), lambda g: (g, 0, 0)),
        compiler_params=pltpu.CompilerParams(
            # Independent batch blocks: parallel lets v7x's two TensorCores
            # split the grid; harmless on single-TC v5e/v6e.
            dimension_semantics=("parallel",),
            vmem_limit_bytes=vmem_limit,
        ),
    )(dec_inputs, enc_outputs, dec_self_attn_mask, *sa, *ca, *ff)


# ---------------------------------------------------------------------------
# Pure-JAX reference (mirrors the PyTorch module) for verification
# ---------------------------------------------------------------------------
def _layernorm_ref(y, gamma, beta, eps):
    mean = jnp.mean(y, axis=-1, keepdims=True)
    var = jnp.mean((y - mean) ** 2, axis=-1, keepdims=True)   # biased, like torch
    return (y - mean) * jax.lax.rsqrt(var + eps) * gamma + beta


def mha_ref(xq, xkv, mask, params, H, D):
    wq, bq, wk, bk, wv, bv, wfc, bfc, gamma, beta = params
    B, Sq, _ = xq.shape
    Skv = xkv.shape[1]
    Q = (xq @ wq + bq).reshape(B, Sq, H, D).transpose(0, 2, 1, 3)
    K = (xkv @ wk + bk).reshape(B, Skv, H, D).transpose(0, 2, 1, 3)
    V = (xkv @ wv + bv).reshape(B, Skv, H, D).transpose(0, 2, 1, 3)
    scores = jnp.einsum("bhqd,bhkd->bhqk", Q, K) / math.sqrt(D)
    if mask is not None:
        scores = jnp.where(mask[:, None, :, :] > 0, -1.0e9, scores)
    attn = jax.nn.softmax(scores, axis=-1)
    ctx = jnp.einsum("bhqk,bhkd->bhqd", attn, V)
    ctx = ctx.transpose(0, 2, 1, 3).reshape(B, Sq, H * D)
    out = ctx @ wfc + bfc + xq
    return _layernorm_ref(out, gamma, beta, EPS)


def ffn_ref(x, params):
    w1, w2, gamma, beta = params
    y = jnp.maximum(x @ w1, 0.0) @ w2 + x
    return _layernorm_ref(y, gamma, beta, EPS)


def decoder_layer_ref(dec, enc, mask, params, H, D):
    x = mha_ref(dec, dec, mask, params["self_attn"], H, D)
    x = mha_ref(x, enc, None, params["cross_attn"], H, D)
    return ffn_ref(x, params["ffn"])


# ---------------------------------------------------------------------------
# Deterministic parameter construction
# ---------------------------------------------------------------------------
def make_mha_params(key, d_model, num_heads):
    HD = d_model * num_heads
    ks = jax.random.split(key, 8)
    s = 1.0 / math.sqrt(d_model)
    return (
        jax.random.normal(ks[0], (d_model, HD), jnp.float32) * s,   # wq
        jax.random.normal(ks[1], (1, HD), jnp.float32) * 0.01,      # bq
        jax.random.normal(ks[2], (d_model, HD), jnp.float32) * s,   # wk
        jax.random.normal(ks[3], (1, HD), jnp.float32) * 0.01,      # bk
        jax.random.normal(ks[4], (d_model, HD), jnp.float32) * s,   # wv
        jax.random.normal(ks[5], (1, HD), jnp.float32) * 0.01,      # bv
        jax.random.normal(ks[6], (HD, d_model), jnp.float32) / math.sqrt(HD),  # wfc
        jax.random.normal(ks[7], (1, d_model), jnp.float32) * 0.01, # bfc
        jnp.ones((1, d_model), jnp.float32),                        # LN gamma
        jnp.zeros((1, d_model), jnp.float32),                       # LN beta
    )


def make_ffn_params(key, d_model, mlp_ratio):
    Dh = d_model * mlp_ratio
    k1, k2 = jax.random.split(key)
    return (
        jax.random.normal(k1, (d_model, Dh), jnp.float32) / math.sqrt(d_model),
        jax.random.normal(k2, (Dh, d_model), jnp.float32) / math.sqrt(Dh),
        jnp.ones((1, d_model), jnp.float32),
        jnp.zeros((1, d_model), jnp.float32),
    )


if __name__ == "__main__":
    d_model, num_heads, mlp_ratio = 32, 4, 4
    B, S_dec, S_enc = 2, 8, 16

    root = jax.random.PRNGKey(0)
    k_in, k_enc, k_sa, k_ca, k_ff = jax.random.split(root, 5)

    dec_inputs = jax.random.normal(k_in, (B, S_dec, d_model), jnp.float32)
    enc_outputs = jax.random.normal(k_enc, (B, S_enc, d_model), jnp.float32)
    # causal self-attention mask (1.0 = masked)
    dec_self_attn_mask = jnp.broadcast_to(
        jnp.triu(jnp.ones((S_dec, S_dec), jnp.float32), k=1), (B, S_dec, S_dec))

    params = {
        "self_attn": make_mha_params(k_sa, d_model, num_heads),
        "cross_attn": make_mha_params(k_ca, d_model, num_heads),
        "ffn": make_ffn_params(k_ff, d_model, mlp_ratio),
    }

    ref = decoder_layer_ref(dec_inputs, enc_outputs, dec_self_attn_mask,
                            params, num_heads, d_model)

    # Strict check on the f32 path (exact-precision variant).
    out_f32 = decoder_layer(dec_inputs, enc_outputs, dec_self_attn_mask,
                            params, num_heads, d_model,
                            compute_dtype=jnp.float32)
    out_f32 = jax.block_until_ready(out_f32)
    np.testing.assert_allclose(np.asarray(out_f32), np.asarray(ref),
                               rtol=1e-4, atol=1e-4)

    # Default (performance) path: bf16 MXU operands, f32 accumulation.
    out_bf16 = decoder_layer(dec_inputs, enc_outputs, dec_self_attn_mask,
                             params, num_heads, d_model)
    out_bf16 = jax.block_until_ready(out_bf16)
    np.testing.assert_allclose(np.asarray(out_bf16), np.asarray(ref),
                               rtol=5e-2, atol=5e-2)

    print("KERNEL_OK")
</pallas_src>

<mosaic_0001>
module attributes {stable_mosaic.version = 11 : i64} {
  func.func @decoder_layer_kernel(%arg0: i32, %arg1: memref<2x8x32xf32, #tpu.memory_space<vmem>>, %arg2: memref<2x16x32xf32, #tpu.memory_space<vmem>>, %arg3: memref<2x8x8xf32, #tpu.memory_space<vmem>>, %arg4: memref<32x128xf32, #tpu.memory_space<vmem>>, %arg5: memref<1x128xf32, #tpu.memory_space<vmem>>, %arg6: memref<32x128xf32, #tpu.memory_space<vmem>>, %arg7: memref<1x128xf32, #tpu.memory_space<vmem>>, %arg8: memref<32x128xf32, #tpu.memory_space<vmem>>, %arg9: memref<1x128xf32, #tpu.memory_space<vmem>>, %arg10: memref<128x32xf32, #tpu.memory_space<vmem>>, %arg11: memref<1x32xf32, #tpu.memory_space<vmem>>, %arg12: memref<1x32xf32, #tpu.memory_space<vmem>>, %arg13: memref<1x32xf32, #tpu.memory_space<vmem>>, %arg14: memref<32x128xf32, #tpu.memory_space<vmem>>, %arg15: memref<1x128xf32, #tpu.memory_space<vmem>>, %arg16: memref<32x128xf32, #tpu.memory_space<vmem>>, %arg17: memref<1x128xf32, #tpu.memory_space<vmem>>, %arg18: memref<32x128xf32, #tpu.memory_space<vmem>>, %arg19: memref<1x128xf32, #tpu.memory_space<vmem>>, %arg20: memref<128x32xf32, #tpu.memory_space<vmem>>, %arg21: memref<1x32xf32, #tpu.memory_space<vmem>>, %arg22: memref<1x32xf32, #tpu.memory_space<vmem>>, %arg23: memref<1x32xf32, #tpu.memory_space<vmem>>, %arg24: memref<32x128xf32, #tpu.memory_space<vmem>>, %arg25: memref<128x32xf32, #tpu.memory_space<vmem>>, %arg26: memref<1x32xf32, #tpu.memory_space<vmem>>, %arg27: memref<1x32xf32, #tpu.memory_space<vmem>>, %arg28: memref<2x8x32xf32, #tpu.memory_space<vmem>>) attributes {dimension_semantics = [#tpu.dimension_semantics<parallel>], iteration_bounds = array<i64: 1>, scalar_prefetch = 0 : i64, scratch_operands = 0 : i64, tpu.core_type = #tpu.core_type<tc>, window_params = [{transform_indices = @transform_0, window_bounds = array<i64: 2, 8, 32>}, {transform_indices = @transform_1, window_bounds = array<i64: 2, 16, 32>}, {transform_indices = @transform_2, window_bounds = array<i64: 2, 8, 8>}, {pipeline_mode = #tpu.pipeline_mode<synchronous>, transform_indices = @transform_3, window_bounds = array<i64: 32, 128>}, {pipeline_mode = #tpu.pipeline_mode<synchronous>, transform_indices = @transform_4, window_bounds = array<i64: 1, 128>}, {pipeline_mode = #tpu.pipeline_mode<synchronous>, transform_indices = @transform_5, window_bounds = array<i64: 32, 128>}, {pipeline_mode = #tpu.pipeline_mode<synchronous>, transform_indices = @transform_6, window_bounds = array<i64: 1, 128>}, {pipeline_mode = #tpu.pipeline_mode<synchronous>, transform_indices = @transform_7, window_bounds = array<i64: 32, 128>}, {pipeline_mode = #tpu.pipeline_mode<synchronous>, transform_indices = @transform_8, window_bounds = array<i64: 1, 128>}, {pipeline_mode = #tpu.pipeline_mode<synchronous>, transform_indices = @transform_9, window_bounds = array<i64: 128, 32>}, {pipeline_mode = #tpu.pipeline_mode<synchronous>, transform_indices = @transform_10, window_bounds = array<i64: 1, 32>}, {pipeline_mode = #tpu.pipeline_mode<synchronous>, transform_indices = @transform_11, window_bounds = array<i64: 1, 32>}, {pipeline_mode = #tpu.pipeline_mode<synchronous>, transform_indices = @transform_12, window_bounds = array<i64: 1, 32>}, {pipeline_mode = #tpu.pipeline_mode<synchronous>, transform_indices = @transform_13, window_bounds = array<i64: 32, 128>}, {pipeline_mode = #tpu.pipeline_mode<synchronous>, transform_indices = @transform_14, window_bounds = array<i64: 1, 128>}, {pipeline_mode = #tpu.pipeline_mode<synchronous>, transform_indices = @transform_15, window_bounds = array<i64: 32, 128>}, {pipeline_mode = #tpu.pipeline_mode<synchronous>, transform_indices = @transform_16, window_bounds = array<i64: 1, 128>}, {pipeline_mode = #tpu.pipeline_mode<synchronous>, transform_indices = @transform_17, window_bounds = array<i64: 32, 128>}, {pipeline_mode = #tpu.pipeline_mode<synchronous>, transform_indices = @transform_18, window_bounds = array<i64: 1, 128>}, {pipeline_mode = #tpu.pipeline_mode<synchronous>, transform_indices = @transform_19, window_bounds = array<i64: 128, 32>}, {pipeline_mode = #tpu.pipeline_mode<synchronous>, transform_indices = @transform_20, window_bounds = array<i64: 1, 32>}, {pipeline_mode = #tpu.pipeline_mode<synchronous>, transform_indices = @transform_21, window_bounds = array<i64: 1, 32>}, {pipeline_mode = #tpu.pipeline_mode<synchronous>, transform_indices = @transform_22, window_bounds = array<i64: 1, 32>}, {pipeline_mode = #tpu.pipeline_mode<synchronous>, transform_indices = @transform_23, window_bounds = array<i64: 32, 128>}, {pipeline_mode = #tpu.pipeline_mode<synchronous>, transform_indices = @transform_24, window_bounds = array<i64: 128, 32>}, {pipeline_mode = #tpu.pipeline_mode<synchronous>, transform_indices = @transform_25, window_bounds = array<i64: 1, 32>}, {pipeline_mode = #tpu.pipeline_mode<synchronous>, transform_indices = @transform_26, window_bounds = array<i64: 1, 32>}, {transform_indices = @transform_27, window_bounds = array<i64: 2, 8, 32>}]} {
    %c0 = arith.constant 0 : index
    %c0_0 = arith.constant 0 : index
    %c0_1 = arith.constant 0 : index
    %0 = vector.load %arg1[%c0, %c0_0, %c0_1] : memref<2x8x32xf32, #tpu.memory_space<vmem>>, vector<2x8x32xf32>
    %1 = vector.shape_cast %0 : vector<2x8x32xf32> to vector<16x32xf32>
    %c0_2 = arith.constant 0 : index
    %c0_3 = arith.constant 0 : index
    %c0_4 = arith.constant 0 : index
    %2 = vector.load %arg2[%c0_2, %c0_3, %c0_4] : memref<2x16x32xf32, #tpu.memory_space<vmem>>, vector<2x16x32xf32>
    %3 = vector.shape_cast %2 : vector<2x16x32xf32> to vector<32x32xf32>
    %c0_5 = arith.constant 0 : index
    %c0_6 = arith.constant 0 : index
    %c0_7 = arith.constant 0 : index
    %4 = vector.load %arg3[%c0_5, %c0_6, %c0_7] : memref<2x8x8xf32, #tpu.memory_space<vmem>>, vector<2x8x8xf32>
    %c0_8 = arith.constant 0 : index
    %c0_9 = arith.constant 0 : index
    %5 = vector.load %arg4[%c0_8, %c0_9] : memref<32x128xf32, #tpu.memory_space<vmem>>, vector<32x128xf32>
    %c0_10 = arith.constant 0 : index
    %c0_11 = arith.constant 0 : index
    %6 = vector.load %arg5[%c0_10, %c0_11] : memref<1x128xf32, #tpu.memory_space<vmem>>, vector<1x128xf32>
    %c0_12 = arith.constant 0 : index
    %c0_13 = arith.constant 0 : index
    %7 = vector.load %arg6[%c0_12, %c0_13] : memref<32x128xf32, #tpu.memory_space<vmem>>, vector<32x128xf32>
    %c0_14 = arith.constant 0 : index
    %c0_15 = arith.constant 0 : index
    %8 = vector.load %arg7[%c0_14, %c0_15] : memref<1x128xf32, #tpu.memory_space<vmem>>, vector<1x128xf32>
    %c0_16 = arith.constant 0 : index
    %c0_17 = arith.constant 0 : index
    %9 = vector.load %arg8[%c0_16, %c0_17] : memref<32x128xf32, #tpu.memory_space<vmem>>, vector<32x128xf32>
    %c0_18 = arith.constant 0 : index
    %c0_19 = arith.constant 0 : index
    %10 = vector.load %arg9[%c0_18, %c0_19] : memref<1x128xf32, #tpu.memory_space<vmem>>, vector<1x128xf32>
    %c0_20 = arith.constant 0 : index
    %c0_21 = arith.constant 0 : index
    %11 = vector.load %arg10[%c0_20, %c0_21] : memref<128x32xf32, #tpu.memory_space<vmem>>, vector<128x32xf32>
    %c0_22 = arith.constant 0 : index
    %c0_23 = arith.constant 0 : index
    %12 = vector.load %arg11[%c0_22, %c0_23] : memref<1x32xf32, #tpu.memory_space<vmem>>, vector<1x32xf32>
    %c0_24 = arith.constant 0 : index
    %c0_25 = arith.constant 0 : index
    %13 = vector.load %arg12[%c0_24, %c0_25] : memref<1x32xf32, #tpu.memory_space<vmem>>, vector<1x32xf32>
    %c0_26 = arith.constant 0 : index
    %c0_27 = arith.constant 0 : index
    %14 = vector.load %arg13[%c0_26, %c0_27] : memref<1x32xf32, #tpu.memory_space<vmem>>, vector<1x32xf32>
    %cst = arith.constant dense<0.000000e+00> : vector<16x128xf32>
    %15 = tpu.matmul %1, %5, %cst {dimension_numbers = #tpu.dot_dimension_numbers<[1], [0], [0], [1], [0, 0, 1, 1], [], []>} : vector<16x32xf32>, vector<32x128xf32>, vector<16x128xf32> -> vector<16x128xf32>
    %16 = vector.broadcast %6 : vector<1x128xf32> to vector<16x128xf32>
    %17 = arith.addf %15, %16 : vector<16x128xf32>
    %cst_28 = arith.constant dense<0.000000e+00> : vector<16x128xf32>
    %18 = tpu.matmul %1, %7, %cst_28 {dimension_numbers = #tpu.dot_dimension_numbers<[1], [0], [0], [1], [0, 0, 1, 1], [], []>} : vector<16x32xf32>, vector<32x128xf32>, vector<16x128xf32> -> vector<16x128xf32>
    %19 = vector.broadcast %8 : vector<1x128xf32> to vector<16x128xf32>
    %20 = arith.addf %18, %19 : vector<16x128xf32>
    %cst_29 = arith.constant dense<0.000000e+00> : vector<16x128xf32>
    %21 = tpu.matmul %1, %9, %cst_29 {dimension_numbers = #tpu.dot_dimension_numbers<[1], [0], [0], [1], [0, 0, 1, 1], [], []>} : vector<16x32xf32>, vector<32x128xf32>, vector<16x128xf32> -> vector<16x128xf32>
    %22 = vector.broadcast %10 : vector<1x128xf32> to vector<16x128xf32>
    %23 = arith.addf %21, %22 : vector<16x128xf32>
    %24 = vector.extract_strided_slice %17 {offsets = [0, 0], sizes = [8, 128], strides = [1, 1]} : vector<16x128xf32> to vector<8x128xf32>
    %25 = vector.shape_cast %24 : vector<8x128xf32> to vector<8x4x32xf32>
    %26 = tpu.transpose %25, [1, 0, 2] : vector<8x4x32xf32> -> vector<4x8x32xf32>
    %27 = vector.extract_strided_slice %20 {offsets = [0, 0], sizes = [8, 128], strides = [1, 1]} : vector<16x128xf32> to vector<8x128xf32>
    %28 = vector.shape_cast %27 : vector<8x128xf32> to vector<8x4x32xf32>
    %29 = tpu.transpose %28, [1, 0, 2] : vector<8x4x32xf32> -> vector<4x8x32xf32>
    %30 = vector.extract_strided_slice %23 {offsets = [0, 0], sizes = [8, 128], strides = [1, 1]} : vector<16x128xf32> to vector<8x128xf32>
    %31 = vector.shape_cast %30 : vector<8x128xf32> to vector<8x4x32xf32>
    %32 = tpu.transpose %31, [1, 0, 2] : vector<8x4x32xf32> -> vector<4x8x32xf32>
    "tpu.trace_start"() <{level = 10 : i32, message = "hqd,hkd->hqk"}> : () -> ()
    %cst_30 = arith.constant dense<0.000000e+00> : vector<4x8x8xf32>
    %33 = tpu.matmul %26, %29, %cst_30 {dimension_numbers = #tpu.dot_dimension_numbers<[2], [2], [1], [1], [0, 0, 0, 1, 1, 1], [0], [0]>} : vector<4x8x32xf32>, vector<4x8x32xf32>, vector<4x8x8xf32> -> vector<4x8x8xf32>
    "tpu.trace_stop"() : () -> ()
    %cst_31 = arith.constant 0.176776692 : f32
    %34 = vector.broadcast %cst_31 : f32 to vector<4x8x8xf32>
    %35 = arith.mulf %33, %34 : vector<4x8x8xf32>
    %36 = vector.extract_strided_slice %4 {offsets = [0, 0, 0], sizes = [1, 8, 8], strides = [1, 1, 1]} : vector<2x8x8xf32> to vector<1x8x8xf32>
    %37 = vector.shape_cast %36 : vector<1x8x8xf32> to vector<8x8xf32>
    %cst_32 = arith.constant 0.000000e+00 : f32
    %38 = vector.broadcast %cst_32 : f32 to vector<8x8xf32>
    %39 = arith.cmpf ogt, %37, %38 : vector<8x8xf32>
    %40 = vector.shape_cast %39 : vector<8x8xi1> to vector<1x8x8xi1>
    %cst_33 = arith.constant -1.000000e+09 : f32
    %41 = vector.shape_cast %40 : vector<1x8x8xi1> to vector<1x8x8xi1>
    %42 = vector.broadcast %41 : vector<1x8x8xi1> to vector<4x8x8xi1>
    %43 = vector.broadcast %cst_33 : f32 to vector<4x8x8xf32>
    %44 = arith.select %42, %43, %35 : vector<4x8x8xi1>, vector<4x8x8xf32>
    %cst_34 = arith.constant dense<0xFF800000> : vector<4x8xf32>
    %45 = vector.multi_reduction <maximumf>, %44, %cst_34 [2] : vector<4x8x8xf32> to vector<4x8xf32>
    %46 = vector.shape_cast %45 : vector<4x8xf32> to vector<4x8x1xf32>
    %47 = vector.broadcast %46 : vector<4x8x1xf32> to vector<4x8x8xf32>
    %48 = arith.subf %44, %47 : vector<4x8x8xf32>
    %49 = math.exp %48 : vector<4x8x8xf32>
    %cst_35 = arith.constant dense<0.000000e+00> : vector<4x8xf32>
    %50 = vector.multi_reduction <add>, %49, %cst_35 [2] : vector<4x8x8xf32> to vector<4x8xf32>
    %51 = vector.shape_cast %50 : vector<4x8xf32> to vector<4x8x1xf32>
    %52 = tpu.reciprocal %51 : vector<4x8x1xf32> -> vector<4x8x1xf32>
    %53 = vector.broadcast %52 : vector<4x8x1xf32> to vector<4x8x8xf32>
    %54 = arith.mulf %49, %53 : vector<4x8x8xf32>
    "tpu.trace_start"() <{level = 10 : i32, message = "hqk,hkd->hqd"}> : () -> ()
    %cst_36 = arith.constant dense<0.000000e+00> : vector<4x8x32xf32>
    %55 = tpu.matmul %54, %32, %cst_36 {dimension_numbers = #tpu.dot_dimension_numbers<[2], [1], [1], [2], [0, 0, 0, 1, 1, 2], [0], [0]>} : vector<4x8x8xf32>, vector<4x8x32xf32>, vector<4x8x32xf32> -> vector<4x8x32xf32>
    "tpu.trace_stop"() : () -> ()
    %56 = tpu.transpose %55, [1, 0, 2] : vector<4x8x32xf32> -> vector<8x4x32xf32>
    %57 = vector.shape_cast %56 : vector<8x4x32xf32> to vector<8x128xf32>
    %58 = vector.extract_strided_slice %17 {offsets = [8, 0], sizes = [8, 128], strides = [1, 1]} : vector<16x128xf32> to vector<8x128xf32>
    %59 = vector.shape_cast %58 : vector<8x128xf32> to vector<8x4x32xf32>
    %60 = tpu.transpose %59, [1, 0, 2] : vector<8x4x32xf32> -> vector<4x8x32xf32>
    %61 = vector.extract_strided_slice %20 {offsets = [8, 0], sizes = [8, 128], strides = [1, 1]} : vector<16x128xf32> to vector<8x128xf32>
    %62 = vector.shape_cast %61 : vector<8x128xf32> to vector<8x4x32xf32>
    %63 = tpu.transpose %62, [1, 0, 2] : vector<8x4x32xf32> -> vector<4x8x32xf32>
    %64 = vector.extract_strided_slice %23 {offsets = [8, 0], sizes = [8, 128], strides = [1, 1]} : vector<16x128xf32> to vector<8x128xf32>
    %65 = vector.shape_cast %64 : vector<8x128xf32> to vector<8x4x32xf32>
    %66 = tpu.transpose %65, [1, 0, 2] : vector<8x4x32xf32> -> vector<4x8x32xf32>
    "tpu.trace_start"() <{level = 10 : i32, message = "hqd,hkd->hqk"}> : () -> ()
    %cst_37 = arith.constant dense<0.000000e+00> : vector<4x8x8xf32>
    %67 = tpu.matmul %60, %63, %cst_37 {dimension_numbers = #tpu.dot_dimension_numbers<[2], [2], [1], [1], [0, 0, 0, 1, 1, 1], [0], [0]>} : vector<4x8x32xf32>, vector<4x8x32xf32>, vector<4x8x8xf32> -> vector<4x8x8xf32>
    "tpu.trace_stop"() : () -> ()
    %cst_38 = arith.constant 0.176776692 : f32
    %68 = vector.broadcast %cst_38 : f32 to vector<4x8x8xf32>
    %69 = arith.mulf %67, %68 : vector<4x8x8xf32>
    %70 = vector.extract_strided_slice %4 {offsets = [1, 0, 0], sizes = [1, 8, 8], strides = [1, 1, 1]} : vector<2x8x8xf32> to vector<1x8x8xf32>
    %71 = vector.shape_cast %70 : vector<1x8x8xf32> to vector<8x8xf32>
    %cst_39 = arith.constant 0.000000e+00 : f32
    %72 = vector.broadcast %cst_39 : f32 to vector<8x8xf32>
    %73 = arith.cmpf ogt, %71, %72 : vector<8x8xf32>
    %74 = vector.shape_cast %73 : vector<8x8xi1> to vector<1x8x8xi1>
    %cst_40 = arith.constant -1.000000e+09 : f32
    %75 = vector.shape_cast %74 : vector<1x8x8xi1> to vector<1x8x8xi1>
    %76 = vector.broadcast %75 : vector<1x8x8xi1> to vector<4x8x8xi1>
    %77 = vector.broadcast %cst_40 : f32 to vector<4x8x8xf32>
    %78 = arith.select %76, %77, %69 : vector<4x8x8xi1>, vector<4x8x8xf32>
    %cst_41 = arith.constant dense<0xFF800000> : vector<4x8xf32>
    %79 = vector.multi_reduction <maximumf>, %78, %cst_41 [2] : vector<4x8x8xf32> to vector<4x8xf32>
    %80 = vector.shape_cast %79 : vector<4x8xf32> to vector<4x8x1xf32>
    %81 = vector.broadcast %80 : vector<4x8x1xf32> to vector<4x8x8xf32>
    %82 = arith.subf %78, %81 : vector<4x8x8xf32>
    %83 = math.exp %82 : vector<4x8x8xf32>
    %cst_42 = arith.constant dense<0.000000e+00> : vector<4x8xf32>
    %84 = vector.multi_reduction <add>, %83, %cst_42 [2] : vector<4x8x8xf32> to vector<4x8xf32>
    %85 = vector.shape_cast %84 : vector<4x8xf32> to vector<4x8x1xf32>
    %86 = tpu.reciprocal %85 : vector<4x8x1xf32> -> vector<4x8x1xf32>
    %87 = vector.broadcast %86 : vector<4x8x1xf32> to vector<4x8x8xf32>
    %88 = arith.mulf %83, %87 : vector<4x8x8xf32>
    "tpu.trace_start"() <{level = 10 : i32, message = "hqk,hkd->hqd"}> : () -> ()
    %cst_43 = arith.constant dense<0.000000e+00> : vector<4x8x32xf32>
    %89 = tpu.matmul %88, %66, %cst_43 {dimension_numbers = #tpu.dot_dimension_numbers<[2], [1], [1], [2], [0, 0, 0, 1, 1, 2], [0], [0]>} : vector<4x8x8xf32>, vector<4x8x32xf32>, vector<4x8x32xf32> -> vector<4x8x32xf32>
    "tpu.trace_stop"() : () -> ()
    %90 = tpu.transpose %89, [1, 0, 2] : vector<4x8x32xf32> -> vector<8x4x32xf32>
    %91 = vector.shape_cast %90 : vector<8x4x32xf32> to vector<8x128xf32>
    %92 = tpu.concatenate %57, %91 in 0 : vector<8x128xf32>, vector<8x128xf32> -> vector<16x128xf32>
    %cst_44 = arith.constant dense<0.000000e+00> : vector<16x32xf32>
    %93 = tpu.matmul %92, %11, %cst_44 {dimension_numbers = #tpu.dot_dimension_numbers<[1], [0], [0], [1], [0, 0, 1, 1], [], []>} : vector<16x128xf32>, vector<128x32xf32>, vector<16x32xf32> -> vector<16x32xf32>
    %94 = vector.broadcast %12 : vector<1x32xf32> to vector<16x32xf32>
    %95 = arith.addf %93, %94 : vector<16x32xf32>
    %96 = arith.addf %95, %1 : vector<16x32xf32>
    %cst_45 = arith.constant dense<0.000000e+00> : vector<16xf32>
    %97 = vector.multi_reduction <add>, %96, %cst_45 [1] : vector<16x32xf32> to vector<16xf32>
    %98 = vector.shape_cast %97 : vector<16xf32> to vector<16x1xf32>
    %99 = arith.mulf %96, %96 : vector<16x32xf32>
    %cst_46 = arith.constant dense<0.000000e+00> : vector<16xf32>
    %100 = vector.multi_reduction <add>, %99, %cst_46 [1] : vector<16x32xf32> to vector<16xf32>
    %101 = vector.shape_cast %100 : vector<16xf32> to vector<16x1xf32>
    %cst_47 = arith.constant 3.125000e-02 : f32
    %102 = vector.broadcast %cst_47 : f32 to vector<16x1xf32>
    %103 = arith.mulf %98, %102 : vector<16x1xf32>
    %cst_48 = arith.constant 3.125000e-02 : f32
    %104 = vector.broadcast %cst_48 : f32 to vector<16x1xf32>
    %105 = arith.mulf %101, %104 : vector<16x1xf32>
    %106 = arith.mulf %103, %103 : vector<16x1xf32>
    %107 = arith.subf %105, %106 : vector<16x1xf32>
    %cst_49 = arith.constant 0.000000e+00 : f32
    %108 = vector.broadcast %cst_49 : f32 to vector<16x1xf32>
    %109 = arith.maximumf %107, %108 : vector<16x1xf32>
    %110 = vector.broadcast %103 : vector<16x1xf32> to vector<16x32xf32>
    %111 = arith.subf %96, %110 : vector<16x32xf32>
    %cst_50 = arith.constant 9.99999974E-6 : f32
    %112 = vector.broadcast %cst_50 : f32 to vector<16x1xf32>
    %113 = arith.addf %109, %112 : vector<16x1xf32>
    %114 = math.rsqrt %113 : vector<16x1xf32>
    %115 = vector.broadcast %114 : vector<16x1xf32> to vector<16x32xf32>
    %116 = arith.mulf %111, %115 : vector<16x32xf32>
    %117 = vector.broadcast %13 : vector<1x32xf32> to vector<16x32xf32>
    %118 = arith.mulf %116, %117 : vector<16x32xf32>
    %119 = vector.broadcast %14 : vector<1x32xf32> to vector<16x32xf32>
    %120 = arith.addf %118, %119 : vector<16x32xf32>
    %c0_51 = arith.constant 0 : index
    %c0_52 = arith.constant 0 : index
    %121 = vector.load %arg14[%c0_51, %c0_52] : memref<32x128xf32, #tpu.memory_space<vmem>>, vector<32x128xf32>
    %c0_53 = arith.constant 0 : index
    %c0_54 = arith.constant 0 : index
    %122 = vector.load %arg15[%c0_53, %c0_54] : memref<1x128xf32, #tpu.memory_space<vmem>>, vector<1x128xf32>
    %c0_55 = arith.constant 0 : index
    %c0_56 = arith.constant 0 : index
    %123 = vector.load %arg16[%c0_55, %c0_56] : memref<32x128xf32, #tpu.memory_space<vmem>>, vector<32x128xf32>
    %c0_57 = arith.constant 0 : index
    %c0_58 = arith.constant 0 : index
    %124 = vector.load %arg17[%c0_57, %c0_58] : memref<1x128xf32, #tpu.memory_space<vmem>>, vector<1x128xf32>
    %c0_59 = arith.constant 0 : index
    %c0_60 = arith.constant 0 : index
    %125 = vector.load %arg18[%c0_59, %c0_60] : memref<32x128xf32, #tpu.memory_space<vmem>>, vector<32x128xf32>
    %c0_61 = arith.constant 0 : index
    %c0_62 = arith.constant 0 : index
    %126 = vector.load %arg19[%c0_61, %c0_62] : memref<1x128xf32, #tpu.memory_space<vmem>>, vector<1x128xf32>
    %c0_63 = arith.constant 0 : index
    %c0_64 = arith.constant 0 : index
    %127 = vector.load %arg20[%c0_63, %c0_64] : memref<128x32xf32, #tpu.memory_space<vmem>>, vector<128x32xf32>
    %c0_65 = arith.constant 0 : index
    %c0_66 = arith.constant 0 : index
    %128 = vector.load %arg21[%c0_65, %c0_66] : memref<1x32xf32, #tpu.memory_space<vmem>>, vector<1x32xf32>
    %c0_67 = arith.constant 0 : index
    %c0_68 = arith.constant 0 : index
    %129 = vector.load %arg22[%c0_67, %c0_68] : memref<1x32xf32, #tpu.memory_space<vmem>>, vector<1x32xf32>
    %c0_69 = arith.constant 0 : index
    %c0_70 = arith.constant 0 : index
    %130 = vector.load %arg23[%c0_69, %c0_70] : memref<1x32xf32, #tpu.memory_space<vmem>>, vector<1x32xf32>
    %cst_71 = arith.constant dense<0.000000e+00> : vector<16x128xf32>
    %131 = tpu.matmul %120, %121, %cst_71 {dimension_numbers = #tpu.dot_dimension_numbers<[1], [0], [0], [1], [0, 0, 1, 1], [], []>} : vector<16x32xf32>, vector<32x128xf32>, vector<16x128xf32> -> vector<16x128xf32>
    %132 = vector.broadcast %122 : vector<1x128xf32> to vector<16x128xf32>
    %133 = arith.addf %131, %132 : vector<16x128xf32>
    %cst_72 = arith.constant dense<0.000000e+00> : vector<32x128xf32>
    %134 = tpu.matmul %3, %123, %cst_72 {dimension_numbers = #tpu.dot_dimension_numbers<[1], [0], [0], [1], [0, 0, 1, 1], [], []>} : vector<32x32xf32>, vector<32x128xf32>, vector<32x128xf32> -> vector<32x128xf32>
    %135 = vector.broadcast %124 : vector<1x128xf32> to vector<32x128xf32>
    %136 = arith.addf %134, %135 : vector<32x128xf32>
    %cst_73 = arith.constant dense<0.000000e+00> : vector<32x128xf32>
    %137 = tpu.matmul %3, %125, %cst_73 {dimension_numbers = #tpu.dot_dimension_numbers<[1], [0], [0], [1], [0, 0, 1, 1], [], []>} : vector<32x32xf32>, vector<32x128xf32>, vector<32x128xf32> -> vector<32x128xf32>
    %138 = vector.broadcast %126 : vector<1x128xf32> to vector<32x128xf32>
    %139 = arith.addf %137, %138 : vector<32x128xf32>
    %140 = vector.extract_strided_slice %133 {offsets = [0, 0], sizes = [8, 128], strides = [1, 1]} : vector<16x128xf32> to vector<8x128xf32>
    %141 = vector.shape_cast %140 : vector<8x128xf32> to vector<8x4x32xf32>
    %142 = tpu.transpose %141, [1, 0, 2] : vector<8x4x32xf32> -> vector<4x8x32xf32>
    %143 = vector.extract_strided_slice %136 {offsets = [0, 0], sizes = [16, 128], strides = [1, 1]} : vector<32x128xf32> to vector<16x128xf32>
    %144 = vector.shape_cast %143 : vector<16x128xf32> to vector<16x4x32xf32>
    %145 = tpu.transpose %144, [1, 0, 2] : vector<16x4x32xf32> -> vector<4x16x32xf32>
    %146 = vector.extract_strided_slice %139 {offsets = [0, 0], sizes = [16, 128], strides = [1, 1]} : vector<32x128xf32> to vector<16x128xf32>
    %147 = vector.shape_cast %146 : vector<16x128xf32> to vector<16x4x32xf32>
    %148 = tpu.transpose %147, [1, 0, 2] : vector<16x4x32xf32> -> vector<4x16x32xf32>
    "tpu.trace_start"() <{level = 10 : i32, message = "hqd,hkd->hqk"}> : () -> ()
    %cst_74 = arith.constant dense<0.000000e+00> : vector<4x8x16xf32>
    %149 = tpu.matmul %142, %145, %cst_74 {dimension_numbers = #tpu.dot_dimension_numbers<[2], [2], [1], [1], [0, 0, 0, 1, 1, 1], [0], [0]>} : vector<4x8x32xf32>, vector<4x16x32xf32>, vector<4x8x16xf32> -> vector<4x8x16xf32>
    "tpu.trace_stop"() : () -> ()
    %cst_75 = arith.constant 0.176776692 : f32
    %150 = vector.broadcast %cst_75 : f32 to vector<4x8x16xf32>
    %151 = arith.mulf %149, %150 : vector<4x8x16xf32>
    %cst_76 = arith.constant dense<0xFF800000> : vector<4x8xf32>
    %152 = vector.multi_reduction <maximumf>, %151, %cst_76 [2] : vector<4x8x16xf32> to vector<4x8xf32>
    %153 = vector.shape_cast %152 : vector<4x8xf32> to vector<4x8x1xf32>
    %154 = vector.broadcast %153 : vector<4x8x1xf32> to vector<4x8x16xf32>
    %155 = arith.subf %151, %154 : vector<4x8x16xf32>
    %156 = math.exp %155 : vector<4x8x16xf32>
    %cst_77 = arith.constant dense<0.000000e+00> : vector<4x8xf32>
    %157 = vector.multi_reduction <add>, %156, %cst_77 [2] : vector<4x8x16xf32> to vector<4x8xf32>
    %158 = vector.shape_cast %157 : vector<4x8xf32> to vector<4x8x1xf32>
    %159 = tpu.reciprocal %158 : vector<4x8x1xf32> -> vector<4x8x1xf32>
    %160 = vector.broadcast %159 : vector<4x8x1xf32> to vector<4x8x16xf32>
    %161 = arith.mulf %156, %160 : vector<4x8x16xf32>
    "tpu.trace_start"() <{level = 10 : i32, message = "hqk,hkd->hqd"}> : () -> ()
    %cst_78 = arith.constant dense<0.000000e+00> : vector<4x8x32xf32>
    %162 = tpu.matmul %161, %148, %cst_78 {dimension_numbers = #tpu.dot_dimension_numbers<[2], [1], [1], [2], [0, 0, 0, 1, 1, 2], [0], [0]>} : vector<4x8x16xf32>, vector<4x16x32xf32>, vector<4x8x32xf32> -> vector<4x8x32xf32>
    "tpu.trace_stop"() : () -> ()
    %163 = tpu.transpose %162, [1, 0, 2] : vector<4x8x32xf32> -> vector<8x4x32xf32>
    %164 = vector.shape_cast %163 : vector<8x4x32xf32> to vector<8x128xf32>
    %165 = vector.extract_strided_slice %133 {offsets = [8, 0], sizes = [8, 128], strides = [1, 1]} : vector<16x128xf32> to vector<8x128xf32>
    %166 = vector.shape_cast %165 : vector<8x128xf32> to vector<8x4x32xf32>
    %167 = tpu.transpose %166, [1, 0, 2] : vector<8x4x32xf32> -> vector<4x8x32xf32>
    %168 = vector.extract_strided_slice %136 {offsets = [16, 0], sizes = [16, 128], strides = [1, 1]} : vector<32x128xf32> to vector<16x128xf32>
    %169 = vector.shape_cast %168 : vector<16x128xf32> to vector<16x4x32xf32>
    %170 = tpu.transpose %169, [1, 0, 2] : vector<16x4x32xf32> -> vector<4x16x32xf32>
    %171 = vector.extract_strided_slice %139 {offsets = [16, 0], sizes = [16, 128], strides = [1, 1]} : vector<32x128xf32> to vector<16x128xf32>
    %172 = vector.shape_cast %171 : vector<16x128xf32> to vector<16x4x32xf32>
    %173 = tpu.transpose %172, [1, 0, 2] : vector<16x4x32xf32> -> vector<4x16x32xf32>
    "tpu.trace_start"() <{level = 10 : i32, message = "hqd,hkd->hqk"}> : () -> ()
    %cst_79 = arith.constant dense<0.000000e+00> : vector<4x8x16xf32>
    %174 = tpu.matmul %167, %170, %cst_79 {dimension_numbers = #tpu.dot_dimension_numbers<[2], [2], [1], [1], [0, 0, 0, 1, 1, 1], [0], [0]>} : vector<4x8x32xf32>, vector<4x16x32xf32>, vector<4x8x16xf32> -> vector<4x8x16xf32>
    "tpu.trace_stop"() : () -> ()
    %cst_80 = arith.constant 0.176776692 : f32
    %175 = vector.broadcast %cst_80 : f32 to vector<4x8x16xf32>
    %176 = arith.mulf %174, %175 : vector<4x8x16xf32>
    %cst_81 = arith.constant dense<0xFF800000> : vector<4x8xf32>
    %177 = vector.multi_reduction <maximumf>, %176, %cst_81 [2] : vector<4x8x16xf32> to vector<4x8xf32>
    %178 = vector.shape_cast %177 : vector<4x8xf32> to vector<4x8x1xf32>
    %179 = vector.broadcast %178 : vector<4x8x1xf32> to vector<4x8x16xf32>
    %180 = arith.subf %176, %179 : vector<4x8x16xf32>
    %181 = math.exp %180 : vector<4x8x16xf32>
    %cst_82 = arith.constant dense<0.000000e+00> : vector<4x8xf32>
    %182 = vector.multi_reduction <add>, %181, %cst_82 [2] : vector<4x8x16xf32> to vector<4x8xf32>
    %183 = vector.shape_cast %182 : vector<4x8xf32> to vector<4x8x1xf32>
    %184 = tpu.reciprocal %183 : vector<4x8x1xf32> -> vector<4x8x1xf32>
    %185 = vector.broadcast %184 : vector<4x8x1xf32> to vector<4x8x16xf32>
    %186 = arith.mulf %181, %185 : vector<4x8x16xf32>
    "tpu.trace_start"() <{level = 10 : i32, message = "hqk,hkd->hqd"}> : () -> ()
    %cst_83 = arith.constant dense<0.000000e+00> : vector<4x8x32xf32>
    %187 = tpu.matmul %186, %173, %cst_83 {dimension_numbers = #tpu.dot_dimension_numbers<[2], [1], [1], [2], [0, 0, 0, 1, 1, 2], [0], [0]>} : vector<4x8x16xf32>, vector<4x16x32xf32>, vector<4x8x32xf32> -> vector<4x8x32xf32>
    "tpu.trace_stop"() : () -> ()
    %188 = tpu.transpose %187, [1, 0, 2] : vector<4x8x32xf32> -> vector<8x4x32xf32>
    %189 = vector.shape_cast %188 : vector<8x4x32xf32> to vector<8x128xf32>
    %190 = tpu.concatenate %164, %189 in 0 : vector<8x128xf32>, vector<8x128xf32> -> vector<16x128xf32>
    %cst_84 = arith.constant dense<0.000000e+00> : vector<16x32xf32>
    %191 = tpu.matmul %190, %127, %cst_84 {dimension_numbers = #tpu.dot_dimension_numbers<[1], [0], [0], [1], [0, 0, 1, 1], [], []>} : vector<16x128xf32>, vector<128x32xf32>, vector<16x32xf32> -> vector<16x32xf32>
    %192 = vector.broadcast %128 : vector<1x32xf32> to vector<16x32xf32>
    %193 = arith.addf %191, %192 : vector<16x32xf32>
    %194 = arith.addf %193, %120 : vector<16x32xf32>
    %cst_85 = arith.constant dense<0.000000e+00> : vector<16xf32>
    %195 = vector.multi_reduction <add>, %194, %cst_85 [1] : vector<16x32xf32> to vector<16xf32>
    %196 = vector.shape_cast %195 : vector<16xf32> to vector<16x1xf32>
    %197 = arith.mulf %194, %194 : vector<16x32xf32>
    %cst_86 = arith.constant dense<0.000000e+00> : vector<16xf32>
    %198 = vector.multi_reduction <add>, %197, %cst_86 [1] : vector<16x32xf32> to vector<16xf32>
    %199 = vector.shape_cast %198 : vector<16xf32> to vector<16x1xf32>
    %cst_87 = arith.constant 3.125000e-02 : f32
    %200 = vector.broadcast %cst_87 : f32 to vector<16x1xf32>
    %201 = arith.mulf %196, %200 : vector<16x1xf32>
    %cst_88 = arith.constant 3.125000e-02 : f32
    %202 = vector.broadcast %cst_88 : f32 to vector<16x1xf32>
    %203 = arith.mulf %199, %202 : vector<16x1xf32>
    %204 = arith.mulf %201, %201 : vector<16x1xf32>
    %205 = arith.subf %203, %204 : vector<16x1xf32>
    %cst_89 = arith.constant 0.000000e+00 : f32
    %206 = vector.broadcast %cst_89 : f32 to vector<16x1xf32>
    %207 = arith.maximumf %205, %206 : vector<16x1xf32>
    %208 = vector.broadcast %201 : vector<16x1xf32> to vector<16x32xf32>
    %209 = arith.subf %194, %208 : vector<16x32xf32>
    %cst_90 = arith.constant 9.99999974E-6 : f32
    %210 = vector.broadcast %cst_90 : f32 to vector<16x1xf32>
    %211 = arith.addf %207, %210 : vector<16x1xf32>
    %212 = math.rsqrt %211 : vector<16x1xf32>
    %213 = vector.broadcast %212 : vector<16x1xf32> to vector<16x32xf32>
    %214 = arith.mulf %209, %213 : vector<16x32xf32>
    %215 = vector.broadcast %129 : vector<1x32xf32> to vector<16x32xf32>
    %216 = arith.mulf %214, %215 : vector<16x32xf32>
    %217 = vector.broadcast %130 : vector<1x32xf32> to vector<16x32xf32>
    %218 = arith.addf %216, %217 : vector<16x32xf32>
    %c0_91 = arith.constant 0 : index
    %c0_92 = arith.constant 0 : index
    %219 = vector.load %arg24[%c0_91, %c0_92] : memref<32x128xf32, #tpu.memory_space<vmem>>, vector<32x128xf32>
    %c0_93 = arith.constant 0 : index
    %c0_94 = arith.constant 0 : index
    %220 = vector.load %arg25[%c0_93, %c0_94] : memref<128x32xf32, #tpu.memory_space<vmem>>, vector<128x32xf32>
    %cst_95 = arith.constant dense<0.000000e+00> : vector<16x128xf32>
    %221 = tpu.matmul %218, %219, %cst_95 {dimension_numbers = #tpu.dot_dimension_numbers<[1], [0], [0], [1], [0, 0, 1, 1], [], []>} : vector<16x32xf32>, vector<32x128xf32>, vector<16x128xf32> -> vector<16x128xf32>
    %cst_96 = arith.constant 0.000000e+00 : f32
    %222 = vector.broadcast %cst_96 : f32 to vector<16x128xf32>
    %223 = arith.maximumf %221, %222 : vector<16x128xf32>
    %cst_97 = arith.constant dense<0.000000e+00> : vector<16x32xf32>
    %224 = tpu.matmul %223, %220, %cst_97 {dimension_numbers = #tpu.dot_dimension_numbers<[1], [0], [0], [1], [0, 0, 1, 1], [], []>} : vector<16x128xf32>, vector<128x32xf32>, vector<16x32xf32> -> vector<16x32xf32>
    %225 = arith.addf %224, %218 : vector<16x32xf32>
    %c0_98 = arith.constant 0 : index
    %c0_99 = arith.constant 0 : index
    %226 = vector.load %arg26[%c0_98, %c0_99] : memref<1x32xf32, #tpu.memory_space<vmem>>, vector<1x32xf32>
    %c0_100 = arith.constant 0 : index
    %c0_101 = arith.constant 0 : index
    %227 = vector.load %arg27[%c0_100, %c0_101] : memref<1x32xf32, #tpu.memory_space<vmem>>, vector<1x32xf32>
    %cst_102 = arith.constant dense<0.000000e+00> : vector<16xf32>
    %228 = vector.multi_reduction <add>, %225, %cst_102 [1] : vector<16x32xf32> to vector<16xf32>
    %229 = vector.shape_cast %228 : vector<16xf32> to vector<16x1xf32>
    %230 = arith.mulf %225, %225 : vector<16x32xf32>
    %cst_103 = arith.constant dense<0.000000e+00> : vector<16xf32>
    %231 = vector.multi_reduction <add>, %230, %cst_103 [1] : vector<16x32xf32> to vector<16xf32>
    %232 = vector.shape_cast %231 : vector<16xf32> to vector<16x1xf32>
    %cst_104 = arith.constant 3.125000e-02 : f32
    %233 = vector.broadcast %cst_104 : f32 to vector<16x1xf32>
    %234 = arith.mulf %229, %233 : vector<16x1xf32>
    %cst_105 = arith.constant 3.125000e-02 : f32
    %235 = vector.broadcast %cst_105 : f32 to vector<16x1xf32>
    %236 = arith.mulf %232, %235 : vector<16x1xf32>
    %237 = arith.mulf %234, %234 : vector<16x1xf32>
    %238 = arith.subf %236, %237 : vector<16x1xf32>
    %cst_106 = arith.constant 0.000000e+00 : f32
    %239 = vector.broadcast %cst_106 : f32 to vector<16x1xf32>
    %240 = arith.maximumf %238, %239 : vector<16x1xf32>
    %241 = vector.broadcast %234 : vector<16x1xf32> to vector<16x32xf32>
    %242 = arith.subf %225, %241 : vector<16x32xf32>
    %cst_107 = arith.constant 9.99999974E-6 : f32
    %243 = vector.broadcast %cst_107 : f32 to vector<16x1xf32>
    %244 = arith.addf %240, %243 : vector<16x1xf32>
    %245 = math.rsqrt %244 : vector<16x1xf32>
    %246 = vector.broadcast %245 : vector<16x1xf32> to vector<16x32xf32>
    %247 = arith.mulf %242, %246 : vector<16x32xf32>
    %248 = vector.broadcast %226 : vector<1x32xf32> to vector<16x32xf32>
    %249 = arith.mulf %247, %248 : vector<16x32xf32>
    %250 = vector.broadcast %227 : vector<1x32xf32> to vector<16x32xf32>
    %251 = arith.addf %249, %250 : vector<16x32xf32>
    %252 = vector.shape_cast %251 : vector<16x32xf32> to vector<2x8x32xf32>
    %c0_108 = arith.constant 0 : index
    %c0_109 = arith.constant 0 : index
    %c0_110 = arith.constant 0 : index
    %253 = vector.load %arg28[%c0_108, %c0_109, %c0_110] : memref<2x8x32xf32, #tpu.memory_space<vmem>>, vector<2x8x32xf32>
    tpu.vector_store %arg28[%c0_108, %c0_109, %c0_110], %252 {strides = array<i32>} : memref<2x8x32xf32, #tpu.memory_space<vmem>>, vector<2x8x32xf32>,
    return
  }
  func.func @transform_0(%arg0: i32) -> (i32, i32, i32) {
    %c0_i32 = arith.constant 0 : i32
    %c0_i32_0 = arith.constant 0 : i32
    %c0_i32_1 = arith.constant 0 : i32
    return %arg0, %c0_i32, %c0_i32_0 : i32, i32, i32
  }
  func.func @transform_1(%arg0: i32) -> (i32, i32, i32) {
    %c0_i32 = arith.constant 0 : i32
    %c0_i32_0 = arith.constant 0 : i32
    %c0_i32_1 = arith.constant 0 : i32
    return %arg0, %c0_i32, %c0_i32_0 : i32, i32, i32
  }
  func.func @transform_2(%arg0: i32) -> (i32, i32, i32) {
    %c0_i32 = arith.constant 0 : i32
    %c0_i32_0 = arith.constant 0 : i32
    %c0_i32_1 = arith.constant 0 : i32
    return %arg0, %c0_i32, %c0_i32_0 : i32, i32, i32
  }
  func.func @transform_3(%arg0: i32) -> (i32, i32) {
    %c0_i32 = arith.constant 0 : i32
    %c0_i32_0 = arith.constant 0 : i32
    %c0_i32_1 = arith.constant 0 : i32
    return %c0_i32, %c0_i32_0 : i32, i32
  }
  func.func @transform_4(%arg0: i32) -> (i32, i32) {
    %c0_i32 = arith.constant 0 : i32
    %c0_i32_0 = arith.constant 0 : i32
    %c0_i32_1 = arith.constant 0 : i32
    return %c0_i32, %c0_i32_0 : i32, i32
  }
  func.func @transform_5(%arg0: i32) -> (i32, i32) {
    %c0_i32 = arith.constant 0 : i32
    %c0_i32_0 = arith.constant 0 : i32
    %c0_i32_1 = arith.constant 0 : i32
    return %c0_i32, %c0_i32_0 : i32, i32
  }
  func.func @transform_6(%arg0: i32) -> (i32, i32) {
    %c0_i32 = arith.constant 0 : i32
    %c0_i32_0 = arith.constant 0 : i32
    %c0_i32_1 = arith.constant 0 : i32
    return %c0_i32, %c0_i32_0 : i32, i32
  }
  func.func @transform_7(%arg0: i32) -> (i32, i32) {
    %c0_i32 = arith.constant 0 : i32
    %c0_i32_0 = arith.constant 0 : i32
    %c0_i32_1 = arith.constant 0 : i32
    return %c0_i32, %c0_i32_0 : i32, i32
  }
  func.func @transform_8(%arg0: i32) -> (i32, i32) {
    %c0_i32 = arith.constant 0 : i32
    %c0_i32_0 = arith.constant 0 : i32
    %c0_i32_1 = arith.constant 0 : i32
    return %c0_i32, %c0_i32_0 : i32, i32
  }
  func.func @transform_9(%arg0: i32) -> (i32, i32) {
    %c0_i32 = arith.constant 0 : i32
    %c0_i32_0 = arith.constant 0 : i32
    %c0_i32_1 = arith.constant 0 : i32
    return %c0_i32, %c0_i32_0 : i32, i32
  }
  func.func @transform_10(%arg0: i32) -> (i32, i32) {
    %c0_i32 = arith.constant 0 : i32
    %c0_i32_0 = arith.constant 0 : i32
    %c0_i32_1 = arith.constant 0 : i32
    return %c0_i32, %c0_i32_0 : i32, i32
  }
  func.func @transform_11(%arg0: i32) -> (i32, i32) {
    %c0_i32 = arith.constant 0 : i32
    %c0_i32_0 = arith.constant 0 : i32
    %c0_i32_1 = arith.constant 0 : i32
    return %c0_i32, %c0_i32_0 : i32, i32
  }
  func.func @transform_12(%arg0: i32) -> (i32, i32) {
    %c0_i32 = arith.constant 0 : i32
    %c0_i32_0 = arith.constant 0 : i32
    %c0_i32_1 = arith.constant 0 : i32
    return %c0_i32, %c0_i32_0 : i32, i32
  }
  func.func @transform_13(%arg0: i32) -> (i32, i32) {
    %c0_i32 = arith.constant 0 : i32
    %c0_i32_0 = arith.constant 0 : i32
    %c0_i32_1 = arith.constant 0 : i32
    return %c0_i32, %c0_i32_0 : i32, i32
  }
  func.func @transform_14(%arg0: i32) -> (i32, i32) {
    %c0_i32 = arith.constant 0 : i32
    %c0_i32_0 = arith.constant 0 : i32
    %c0_i32_1 = arith.constant 0 : i32
    return %c0_i32, %c0_i32_0 : i32, i32
  }
  func.func @transform_15(%arg0: i32) -> (i32, i32) {
    %c0_i32 = arith.constant 0 : i32
    %c0_i32_0 = arith.constant 0 : i32
    %c0_i32_1 = arith.constant 0 : i32
    return %c0_i32, %c0_i32_0 : i32, i32
  }
  func.func @transform_16(%arg0: i32) -> (i32, i32) {
    %c0_i32 = arith.constant 0 : i32
    %c0_i32_0 = arith.constant 0 : i32
    %c0_i32_1 = arith.constant 0 : i32
    return %c0_i32, %c0_i32_0 : i32, i32
  }
  func.func @transform_17(%arg0: i32) -> (i32, i32) {
    %c0_i32 = arith.constant 0 : i32
    %c0_i32_0 = arith.constant 0 : i32
    %c0_i32_1 = arith.constant 0 : i32
    return %c0_i32, %c0_i32_0 : i32, i32
  }
  func.func @transform_18(%arg0: i32) -> (i32, i32) {
    %c0_i32 = arith.constant 0 : i32
    %c0_i32_0 = arith.constant 0 : i32
    %c0_i32_1 = arith.constant 0 : i32
    return %c0_i32, %c0_i32_0 : i32, i32
  }
  func.func @transform_19(%arg0: i32) -> (i32, i32) {
    %c0_i32 = arith.constant 0 : i32
    %c0_i32_0 = arith.constant 0 : i32
    %c0_i32_1 = arith.constant 0 : i32
    return %c0_i32, %c0_i32_0 : i32, i32
  }
  func.func @transform_20(%arg0: i32) -> (i32, i32) {
    %c0_i32 = arith.constant 0 : i32
    %c0_i32_0 = arith.constant 0 : i32
    %c0_i32_1 = arith.constant 0 : i32
    return %c0_i32, %c0_i32_0 : i32, i32
  }
  func.func @transform_21(%arg0: i32) -> (i32, i32) {
    %c0_i32 = arith.constant 0 : i32
    %c0_i32_0 = arith.constant 0 : i32
    %c0_i32_1 = arith.constant 0 : i32
    return %c0_i32, %c0_i32_0 : i32, i32
  }
  func.func @transform_22(%arg0: i32) -> (i32, i32) {
    %c0_i32 = arith.constant 0 : i32
    %c0_i32_0 = arith.constant 0 : i32
    %c0_i32_1 = arith.constant 0 : i32
    return %c0_i32, %c0_i32_0 : i32, i32
  }
  func.func @transform_23(%arg0: i32) -> (i32, i32) {
    %c0_i32 = arith.constant 0 : i32
    %c0_i32_0 = arith.constant 0 : i32
    %c0_i32_1 = arith.constant 0 : i32
    return %c0_i32, %c0_i32_0 : i32, i32
  }
  func.func @transform_24(%arg0: i32) -> (i32, i32) {
    %c0_i32 = arith.constant 0 : i32
    %c0_i32_0 = arith.constant 0 : i32
    %c0_i32_1 = arith.constant 0 : i32
    return %c0_i32, %c0_i32_0 : i32, i32
  }
  func.func @transform_25(%arg0: i32) -> (i32, i32) {
    %c0_i32 = arith.constant 0 : i32
    %c0_i32_0 = arith.constant 0 : i32
    %c0_i32_1 = arith.constant 0 : i32
    return %c0_i32, %c0_i32_0 : i32, i32
  }
  func.func @transform_26(%arg0: i32) -> (i32, i32) {
    %c0_i32 = arith.constant 0 : i32
    %c0_i32_0 = arith.constant 0 : i32
    %c0_i32_1 = arith.constant 0 : i32
    return %c0_i32, %c0_i32_0 : i32, i32
  }
  func.func @transform_27(%arg0: i32) -> (i32, i32, i32) {
    %c0_i32 = arith.constant 0 : i32
    %c0_i32_0 = arith.constant 0 : i32
    %c0_i32_1 = arith.constant 0 : i32
    return %arg0, %c0_i32, %c0_i32_0 : i32, i32, i32
  }
}

</mosaic_0001>

<bundles_post_ra>
// kernel: tpu_custom_call.1
= control target key start
LH: loop header
LB: loop body
LE: loop exit
PB: predicated region body
PF: predicated region fallthrough
CT: control target
= control target key end

     0   :  { %s9151_s0 = inlined_call_operand.vmem [shape: f32[2,8,32], index: 0, kind: input, shape index: {}]   ;;  %s9152_s1 = inlined_call_operand.vmem [shape: f32[2,16,32], index: 1, kind: input, shape index: {}]   ;;  %s9153_s2 = inlined_call_operand.vmem [shape: f32[2,8,8], index: 2, kind: input, shape index: {}]   ;;  %s9154_s3 = inlined_call_operand.vmem [shape: f32[32,128], index: 3, kind: input, shape index: {}]   ;;  %s9155_s4 = inlined_call_operand.vmem [shape: f32[1,128], index: 4, kind: input, shape index: {}]   ;;  %s9156_s5 = inlined_call_operand.vmem [shape: f32[32,128], index: 5, kind: input, shape index: {}]   ;;  %s9157_s6 = inlined_call_operand.vmem [shape: f32[1,128], index: 6, kind: input, shape index: {}]   ;;  %s9158_s7 = inlined_call_operand.vmem [shape: f32[32,128], index: 7, kind: input, shape index: {}]   ;;  %s9159_s8 = inlined_call_operand.vmem [shape: f32[1,128], index: 8, kind: input, shape index: {}]   ;;  %s9160_s9 = inlined_call_operand.vmem [shape: f32[128,32], index: 9, kind: input, shape index: {}]   ;;  %s9161_s10 = inlined_call_operand.vmem [shape: f32[1,32], index: 10, kind: input, shape index: {}]   ;;  %s9162_s11 = inlined_call_operand.vmem [shape: f32[1,32], index: 11, kind: input, shape index: {}]   ;;  %s9163_s12 = inlined_call_operand.vmem [shape: f32[1,32], index: 12, kind: input, shape index: {}]   ;;  %s9164_s13 = inlined_call_operand.vmem [shape: f32[32,128], index: 13, kind: input, shape index: {}]   ;;  %s9165_s14 = inlined_call_operand.vmem [shape: f32[1,128], index: 14, kind: input, shape index: {}]   ;;  %s9166_s15 = inlined_call_operand.vmem [shape: f32[32,128], index: 15, kind: input, shape index: {}]   ;;  %s9167_s16 = inlined_call_operand.vmem [shape: f32[1,128], index: 16, kind: input, shape index: {}]   ;;  %s9168_s17 = inlined_call_operand.vmem [shape: f32[32,128], index: 17, kind: input, shape index: {}]   ;;  %s9169_s18 = inlined_call_operand.vmem [shape: f32[1,128], index: 18, kind: input, shape index: {}]   ;;  %s9170_s19 = inlined_call_operand.vmem [shape: f32[128,32], index: 19, kind: input, shape index: {}]   ;;  %s9171_s20 = inlined_call_operand.vmem [shape: f32[1,32], index: 20, kind: input, shape index: {}]   ;;  %s9172_s21 = inlined_call_operand.vmem [shape: f32[1,32], index: 21, kind: input, shape index: {}]   ;;  %s9173_s22 = inlined_call_operand.vmem [shape: f32[1,32], index: 22, kind: input, shape index: {}]   ;;  %s9174_s23 = inlined_call_operand.vmem [shape: f32[32,128], index: 23, kind: input, shape index: {}]   ;;  %s9175_s24 = inlined_call_operand.vmem [shape: f32[128,32], index: 24, kind: input, shape index: {}]   ;;  %s9176_s25 = inlined_call_operand.vmem [shape: f32[1,32], index: 25, kind: input, shape index: {}]   ;;  %s9177_s26 = inlined_call_operand.vmem [shape: f32[1,32], index: 26, kind: input, shape index: {}]   ;;  %s9178_s27 = inlined_call_operand.hbm [shape: f32[2,8,32], index: 27, kind: output, shape index: {}]  }
   0x1   :  { %9186 = sst [smem:[#allocation5_spill]] %s9151_s0 }
   0x2   :  { %9187 = sst [smem:[#allocation6_spill]] %s9152_s1 }
   0x3   :  { %9188 = sst [smem:[#allocation7_spill]] %s9153_s2 }
   0x4   :  { %9189 = sst [smem:[#allocation8_spill]] %s9154_s3 }
   0x5   :  { %9190 = sst [smem:[#allocation9_spill]] %s9155_s4 }
   0x6   :  { %9191 = sst [smem:[#allocation10_spill]] %s9156_s5 }
   0x7   :  { %9192 = sst [smem:[#allocation11_spill]] %s9157_s6 }
   0x8   :  { %9193 = sst [smem:[#allocation12_spill]] %s9158_s7 }
   0x9   :  { %9194 = sst [smem:[#allocation13_spill]] %s9159_s8 }
   0xa   :  { %9195 = sst [smem:[#allocation14_spill]] %s9160_s9 }
   0xb   :  { %9196 = sst [smem:[#allocation15_spill]] %s9161_s10 }
   0xc   :  { %9197 = sst [smem:[#allocation16_spill]] %s9162_s11 }
   0xd   :  { %s9198_s8 = sld [smem:[#allocation10_spill]]  ;;  %s9199_s0 = sld [smem:[#allocation8_spill]]  ;;  %vm135_vm0 = vcmask 261120  }
   0xe   :  { %s9200_s28 = sld [smem:[#allocation5_spill]] }
  0x13   :  { %v100_v0 = vld [vmem:[%s9198_s8] sm:$0xff]  ;;  %v101_v1 = vld [vmem:[%s9198_s8 + $0x8] sm:$0xff]  ;;  %v102_v5 = vld [vmem:[%s9198_s8 + $0x10] sm:$0xff] }
  0x14   :  { %v95_v2 = vld [vmem:[%s9199_s0] sm:$0xff]  ;;  %v7456_v3 = vpack.c.bf16 %v101_v1, %v100_v0  ;;  %v96_v4 = vld [vmem:[%s9199_s0 + $0x8] sm:$0xff]  ;;  %v103_v6 = vld [vmem:[%s9198_s8 + $0x18] sm:$0xff] }
  0x15   :  { %v7448_v7 = vpack.c.bf16 %v96_v4, %v95_v2  ;;  %v7460_v8 = vpack.c.bf16 %v103_v6, %v102_v5  ;;  %v97_v9 = vld [vmem:[%s9199_s0 + $0x10] sm:$0xff]  ;;  %v98_v10 = vld [vmem:[%s9199_s0 + $0x18] sm:$0xff]  ;;  %v87_v11 = vld [vmem:[%s9200_s28] sm:$0xff] }
  0x16   :  { %7457 = vmatprep.subr.bf16.mxu1 %v7456_v3  ;;  %v7452_v12 = vpack.c.bf16 %v98_v10, %v97_v9  ;;  %7087 = vmatprep.mubr.msk.f32.mxu1 %vm135_vm0, %v87_v11 }
  0x17   :  { %32 = vsyncpa [#allocation3], 0  ;;  %7459 = vmatpush3.bf16.msra.mxu1 %v7456_v3  ;;  %7449 = vmatprep.subr.bf16.mxu0 %v7448_v7  ;;  %v88_v13 = vld [vmem:[%s9200_s28 + $0x8] sm:$0xff]  ;;  %s9201_s1 = sld [smem:[#allocation12_spill]]  ;;  %s9202_s7 = sld [smem:[#allocation11_spill]]  ;;  %v7802_v30 = vmov 0.0   ;;  %v394_v33 = vlaneseq }
  0x18   :  { %7451 = vmatpush3.bf16.msra.mxu0 %v7448_v7  ;;  %7461 = vmatprep.subr.bf16.mxu1 %v7460_v8  ;;  %s9203_s9 = sld [smem:[#allocation9_spill]]  ;;  %s7799_s29 = smov 32   ;;  %vm7803_vm1 = vmmov 0   ;;  %v7804_v31 = vmov 1983009808   ;;  %vm1132_vm3 = vcmask 64512   ;;  %vm8575_vm7 = vmpackc.low %vm135_vm0, %vm135_vm0 }
  0x19   :  { %7453 = vmatprep.subr.bf16.mxu0 %v7452_v12  ;;  %7076 = vmatprep.mubr.msk.f32.mxu0 %vm135_vm0, %v87_v11  ;;  %s7800_s6 = smov 96   ;;  %s7801_s11 = smov 64   ;;  %v392_v32 = vunpack.c.l.s4 %v7804_v31  ;;  %v7805_v34 = vmov 1934713408   ;;  %v395_v37 = vshrl.u32 %v394_v33, 7  ;;  %vm1618_vm5 = vcmask 523264  }
  0x1a   :  { %v424_v35 = vunpack.c.l.s4 %v7805_v34  ;;  %s9204_s3 = sld [smem:[#allocation13_spill]]  ;;  %s9205_s30 = sld [smem:[#allocation7_spill]]  ;;  %vm1620_vm6 = vcmask 785408   ;;  %vm4358_vm8 = vcmask 130048  }
  0x1b   :  { %7463 = vmatpush3.bf16.msra.mxu1 %v7460_v8  ;;  %v393_v36 = vunpack.c.0.s8 %v392_v32  ;;  %s9206_s0 = sld [smem:[#allocation14_spill]]  ;;  %s9207_s2 = sld [smem:[#allocation15_spill]] }
  0x1c   :  { %7455 = vmatpush3.bf16.msra.mxu0 %v7452_v12  ;;  %7106 = vmatprep.subr.mxu1 %v7802_v30  ;;  %v425_v40 = vunpack.c.0.s8 %v424_v35  ;;  %s9208_s5 = sld [smem:[#allocation16_spill]]  ;;  %s9209_s4 = sld [smem:[#allocation6_spill]] }
  0x1d   :  { %v105_v14 = vld [vmem:[%s9201_s1] sm:$0xff]  ;;  %v106_v15 = vld [vmem:[%s9201_s1 + $0x8] sm:$0xff]  ;;  %v107_v23 = vld [vmem:[%s9201_s1 + $0x10] sm:$0xff]  ;;  %v8020_v41 = vsub.s32 %v393_v36, %v395_v37 }
  0x1e   :  { %7088 = vmatmul.mubr.msk.f32.vlgmr.msra.gmra.mrb[0].mxu1 %vm135_vm0, %v88_v13  ;;  %v6763_v16 = vld [vmem:[%s9202_s7] ss:$0 sm:$0xff]  ;;  %v7464_v17 = vpack.c.bf16 %v106_v15, %v105_v14  ;;  %v108_v24 = vld [vmem:[%s9201_s1 + $0x18] sm:$0xff]  ;;  %v8022_v48 = vsub.s32 %v425_v40, %v395_v37 }
  0x1f   :  { %7077 = vmatmul.mubr.msk.f32.vlgmr.msra.gmra.mrb[0].mxu0 %vm135_vm0, %v88_v13  ;;  %v6760_v18 = vld [vmem:[%s9203_s9] ss:$0 sm:$0xff]  ;;  %v7468_v28 = vpack.c.bf16 %v108_v24, %v107_v23  ;;  %7108 = vmatprep.mubr.msk.f32.mxu1 %vm7803_vm1, %v7802_v30 }
  0x20   :  { %7098 = vmatprep.mubr.msk.f32.mxu0 %vm135_vm0, %v87_v11  ;;  %7465 = vmatprep.subr.bf16.mxu0 %v7464_v17 }
  0x21   :  { %7467 = vmatpush3.bf16.msra.mxu0 %v7464_v17 }
  0x22   :  { %7469 = vmatprep.subr.bf16.mxu0 %v7468_v28 }
  0x25   :  { %7471 = vmatpush3.bf16.msra.mxu0 %v7468_v28 }
  0x26   :  { %7101 = vmatprep.subr.mxu0 %v7802_v30 }
  0x28   :  { %7099 = vmatmul.mubr.msk.f32.vlgmr.msra.gmra.mrb[2].mxu0 %vm135_vm0, %v88_v13 }
  0x29   :  { %7103 = vmatprep.mubr.msk.f32.mxu0 %vm7803_vm1, %v7802_v30 }
  0xf1   :  { %v7089_v19 = vpop.f32.mrb[0].mxu1 }
  0xf2   :  { %v7997_v20 = vadd.f32 %v7089_v19, %v6763_v16  ;;  %v289_v21 = vpop.f32.mrb[1].mxu1  ;;  %v7078_v22 = vpop.f32.mrb[0].mxu0 }
  0xf3   :  { %v290_v25 = vadd.f32 %v6763_v16, %v289_v21  ;;  %v8005_v26 = vadd.f32 %v7078_v22, %v6760_v18  ;;  %v208_v27 = vpop.f32.mrb[1].mxu0 }
  0xf4   :  { %v209_v29 = vadd.f32 %v6760_v18, %v208_v27 }
  0xf5   :  { %532 = vrot.lane.b32.xlu1 %v290_v25, %s7799_s29  ;;  %526 = vrot.lane.b32.xlu0 %v290_v25, %s7800_s6 }
  0xf9   :  { %529 = vrot.lane.b32.xlu0 %v290_v25, %s7801_s11  ;;  %380 = vrot.lane.b32.xlu1 %v209_v29, %s7800_s6 }
  0xfd   :  { %383 = vrot.lane.b32.xlu0 %v209_v29, %s7801_s11  ;;  %386 = vrot.lane.b32.xlu1 %v209_v29, %s7799_s29 }
 0x167   :  { %v533_v38 = vpop.permute.xlu1 %532  ;;  %v527_v39 = vpop.permute.xlu0 %526 }
 0x168   :  { %v551_v42 = vcombine.low %v527_v39, %v533_v38  ;;  %v552_v43 = vcombine.high %v527_v39, %v533_v38 }
 0x16a   :  { %v559_v49 = vrot.slane %v551_v42, %v8020_v41  ;;  %v566_v50 = vrot.slane %v552_v43, %v8020_v41 }
 0x16b   :  { %v530_v44 = vpop.permute.xlu0 %529  ;;  %v381_v45 = vpop.permute.xlu1 %380 }
 0x16c   :  { %v535_v46 = vcombine.low %v290_v25, %v530_v44  ;;  %v536_v47 = vcombine.high %v290_v25, %v530_v44 }
 0x16e   :  { %v543_v51 = vrot.slane %v535_v46, %v8020_v41  ;;  %v550_v52 = vrot.slane %v536_v47, %v8020_v41 }
 0x16f   :  { %v384_v53 = vpop.permute.xlu0 %383  ;;  %v387_v54 = vpop.permute.xlu1 %386 }
 0x170   :  { %v567_v55 = vcombine.low %v543_v51, %v559_v49  ;;  %v568_v56 = vcombine.high %v543_v51, %v559_v49  ;;  %v583_v57 = vcombine.low %v550_v52, %v566_v50  ;;  %v584_v58 = vcombine.high %v550_v52, %v566_v50 }
 0x171   :  { %v389_v59 = vcombine.low %v209_v29, %v384_v53  ;;  %v390_v60 = vcombine.high %v209_v29, %v384_v53  ;;  %v405_v61 = vcombine.low %v381_v45, %v387_v54  ;;  %v406_v62 = vcombine.high %v381_v45, %v387_v54 }
 0x172   :  { %v575_v63 = vrot.slane %v567_v55, %v8022_v48  ;;  %v582_v0 = vrot.slane %v568_v56, %v8022_v48  ;;  %v591_v1 = vrot.slane %v583_v57, %v8022_v48  ;;  %v598_v2 = vrot.slane %v584_v58, %v8022_v48 }
 0x173   :  { %v397_v3 = vrot.slane %v389_v59, %v8020_v41  ;;  %v404_v4 = vrot.slane %v390_v60, %v8020_v41  ;;  %v413_v5 = vrot.slane %v405_v61, %v8020_v41  ;;  %v420_v6 = vrot.slane %v406_v62, %v8020_v41  ;;  %v6766_v60 = vld [vmem:[%s9204_s3] ss:$0 sm:$0xff]  ;;  %v7100_v61 = vpop.f32.mrb[2].mxu0 }
 0x174   :  { %v603_v7 = vcombine.low %v575_v63, %v582_v0  ;;  %v6771_v8 = vcombine.high %v575_v63, %v582_v0  ;;  %v619_v9 = vcombine.low %v591_v1, %v598_v2  ;;  %v6772_v10 = vcombine.high %v591_v1, %v598_v2  ;;  %v370_v63 = vpop.f32.mrb[3].mxu0  ;;  %v93_v0 = vld [vmem:[%s9205_s30] sm:$0xff] }
 0x175   :  { %v421_v11 = vcombine.low %v397_v3, %v413_v5  ;;  %v422_v12 = vcombine.high %v397_v3, %v413_v5  ;;  %v437_v13 = vcombine.low %v404_v4, %v420_v6  ;;  %v438_v14 = vcombine.high %v404_v4, %v420_v6 }
 0x176   :  { %v610_v15 = vrot.slane %v603_v7, %v8020_v41  ;;  %v618_v16 = vrot.slane %v6771_v8, %v8020_v41  ;;  %v626_v17 = vrot.slane %v619_v9, %v8020_v41  ;;  %v634_v18 = vrot.slane %v6772_v10, %v8020_v41 }
 0x177   :  { %v429_v19 = vrot.slane %v421_v11, %v8022_v48  ;;  %v436_v21 = vrot.slane %v422_v12, %v8022_v48  ;;  %v445_v22 = vrot.slane %v437_v13, %v8022_v48  ;;  %v452_v23 = vrot.slane %v438_v14, %v8022_v48 }
 0x178   :  { %v635_v24 = vcombine.low %v610_v15, %v618_v16  ;;  %v651_v25 = vcombine.low %v626_v17, %v634_v18  ;;  %v636_v32 = vcombine.high %v610_v15, %v618_v16  ;;  %v652_v33 = vcombine.high %v626_v17, %v634_v18 }
 0x179   :  { %v457_v27 = vcombine.low %v429_v19, %v436_v21  ;;  %v6769_v28 = vcombine.high %v429_v19, %v436_v21  ;;  %v473_v29 = vcombine.low %v445_v22, %v452_v23  ;;  %v6770_v31 = vcombine.high %v445_v22, %v452_v23 }
 0x17a   :  { %v643_v34 = vrot.slane %v635_v24, %v8022_v48  ;;  %v659_v35 = vrot.slane %v651_v25, %v8022_v48  ;;  %v650_v47 = vrot.slane %v636_v32, %v8022_v48  ;;  %v666_v49 = vrot.slane %v652_v33, %v8022_v48 }
 0x17b   :  { %v464_v36 = vrot.slane %v457_v27, %v8020_v41  ;;  %v472_v37 = vrot.slane %v6769_v28, %v8020_v41  ;;  %v480_v38 = vrot.slane %v473_v29, %v8020_v41  ;;  %v488_v39 = vrot.slane %v6770_v31, %v8020_v41 }
 0x17c   :  { %v667_v40 = vcombine.low %v643_v34, %v659_v35  ;;  %v668_v42 = vcombine.high %v643_v34, %v659_v35  ;;  %v669_v56 = vcombine.low %v650_v47, %v666_v49  ;;  %v670_v57 = vcombine.high %v650_v47, %v666_v49 }
 0x17d   :  { %v489_v43 = vcombine.low %v464_v36, %v472_v37  ;;  %v490_v44 = vcombine.high %v464_v36, %v472_v37  ;;  %v505_v45 = vcombine.low %v480_v38, %v488_v39  ;;  %v506_v46 = vcombine.high %v480_v38, %v488_v39 }
 0x17e   :  { %7102 = vmatpush3.xpose.msk.msra.mxu0 %vm135_vm0, %v667_v40  ;;  %7107 = vmatpush3.xpose.msk.msra.mxu1 %vm135_vm0, %v668_v42  ;;  %v8079_v62 = vadd.f32 %v7100_v61, %v6766_v60  ;;  %vm1125_vm2 = vcmp.gt.f32.partialorder %v93_v0, 0.0  ;;  %v371_v22 = vadd.f32 %v6766_v60, %v370_v63 }
 0x17f   :  { %7111 = vmatprep.subr.mxu0 %v7802_v30  ;;  %7116 = vmatprep.subr.mxu1 %v7802_v30  ;;  %v497_v50 = vrot.slane %v489_v43, %v8022_v48  ;;  %v513_v51 = vrot.slane %v505_v45, %v8022_v48  ;;  %v504_v54 = vrot.slane %v490_v44, %v8022_v48 }
 0x180   :  { %v520_v55 = vrot.slane %v506_v46, %v8022_v48 }
 0x181   :  { %v521_v52 = vcombine.low %v497_v50, %v513_v51  ;;  %v522_v53 = vcombine.high %v497_v50, %v513_v51 }
 0x182   :  { %v523_v58 = vcombine.low %v504_v54, %v520_v55  ;;  %v524_v59 = vcombine.high %v504_v54, %v520_v55 }
 0x183   :  { %7104 = vmatmul.mubr.msk.f32.vlgmr.msra.gmra.mrb[4].mxu0 %vm135_vm0, %v521_v52  ;;  %7109 = vmatmul.mubr.msk.f32.vlgmr.msra.gmra.mrb[2].mxu1 %vm135_vm0, %v522_v53 }
 0x184   :  { %7112 = vmatpush3.xpose.msk.msra.mxu0 %vm135_vm0, %v669_v56  ;;  %7117 = vmatpush3.xpose.msk.msra.mxu1 %vm135_vm0, %v670_v57 }
 0x185   :  { %7113 = vmatprep.mubr.msk.f32.mxu0 %vm7803_vm1, %v7802_v30  ;;  %7118 = vmatprep.mubr.msk.f32.mxu1 %vm7803_vm1, %v7802_v30 }
 0x186   :  { %7121 = vmatprep.subr.mxu0 %v7802_v30  ;;  %7126 = vmatprep.subr.mxu1 %v7802_v30 }
 0x187   :  { %7114 = vmatmul.mubr.msk.f32.vlgmr.msra.gmra.mrb[6].mxu0 %vm135_vm0, %v523_v58  ;;  %7119 = vmatmul.mubr.msk.f32.vlgmr.msra.gmra.mrb[4].mxu1 %vm135_vm0, %v524_v59 }
 0x188   :  { %7123 = vmatprep.mubr.msk.f32.mxu0 %vm7803_vm1, %v7802_v30  ;;  %7128 = vmatprep.mubr.msk.f32.mxu1 %vm7803_vm1, %v7802_v30 }
 0x256   :  { %v889_v1 = vpop.f32.mrb[4].mxu0  ;;  %v965_v2 = vpop.f32.mrb[2].mxu1 }
 0x257   :  { %v1121_v3 = vmul.f32 0.17677669, %v889_v1  ;;  %v1122_v4 = vmul.f32 0.17677669, %v965_v2  ;;  %v7105_v5 = vpop.f32.mrb[5].mxu0  ;;  %v7110_v6 = vpop.f32.mrb[3].mxu1 }
 0x259   :  { %v1129_v7 = vsel %vm1125_vm2, -1e+09, %v1122_v4  ;;  %v1128_v8 = vsel %vm1125_vm2, -1e+09, %v1121_v3 }
 0x25a   :  { %v1041_v9 = vpop.f32.mrb[6].mxu0  ;;  %v1117_v10 = vpop.f32.mrb[4].mxu1  ;;  %v1136_v11 = vsel %vm1132_vm3, %v1129_v7, -inf  ;;  %v1133_v12 = vsel %vm1132_vm3, %v1128_v8, -inf }
 0x25b   :  { %v1123_v13 = vmul.f32 0.17677669, %v1041_v9  ;;  %v1124_v14 = vmul.f32 0.17677669, %v1117_v10  ;;  %1137 = vmax.xlane.f32.xlu1 %v1136_v11  ;;  %v7120_v15 = vpop.f32.mrb[5].mxu1  ;;  %1134 = vmax.xlane.f32.xlu0 %v1133_v12  ;;  %v7115_v16 = vpop.f32.mrb[7].mxu0 }
 0x25d   :  { %v1130_v17 = vsel %vm1125_vm2, -1e+09, %v1123_v13  ;;  %v1131_v19 = vsel %vm1125_vm2, -1e+09, %v1124_v14 }
 0x25e   :  { %v1139_v18 = vsel %vm1132_vm3, %v1130_v17, -inf  ;;  %v1142_v21 = vsel %vm1132_vm3, %v1131_v19, -inf }
 0x25f   :  { %1140 = vmax.xlane.f32.xlu0 %v1139_v18 }
 0x263   :  { %1143 = vmax.xlane.f32.xlu0 %v1142_v21 }
 0x26c   :  { %672 = vrot.lane.b32.xlu1 %v371_v22, %s7800_s6 }
 0x270   :  { %678 = vrot.lane.b32.xlu1 %v371_v22, %s7799_s29 }
 0x274   :  { %1769 = vrot.lane.b32.xlu1 %v7997_v20, %s7800_s6 }
 0x278   :  { %1775 = vrot.lane.b32.xlu1 %v7997_v20, %s7799_s29 }
 0x279   :  { %675 = vrot.lane.b32.xlu0 %v371_v22, %s7801_s11 }
 0x27d   :  { %1772 = vrot.lane.b32.xlu0 %v7997_v20, %s7801_s11 }
 0x281   :  { %1623 = vrot.lane.b32.xlu0 %v8005_v26, %s7800_s6 }
 0x2e8   :  { %v1138_v23 = vpop.xlane.xlu1 %1137  ;;  %v1135_v24 = vpop.xlane.xlu0 %1134 }
 0x2e9   :  { %v1146_v25 = vsub.f32 %v1129_v7, %v1138_v23  ;;  %v1145_v28 = vsub.f32 %v1128_v8, %v1135_v24 }
 0x2eb   :  { %v1151_v27 = vmul.f32 1.442695, %v1146_v25  ;;  %v1149_v33 = vmul.f32 1.442695, %v1145_v28 }
 0x2ec   :  { %v673_v29 = vpop.permute.xlu1 %672  ;;  %v1141_v31 = vpop.xlane.xlu0 %1140 }
 0x2ed   :  { %7697 = vpow2.f32 %v1151_v27  ;;  %v1147_v32 = vsub.f32 %v1130_v17, %v1141_v31 }
 0x2ee   :  { %7699 = vpow2.f32 %v1149_v33 }
 0x2ef   :  { %v1153_v34 = vmul.f32 1.442695, %v1147_v32 }
 0x2f0   :  { %v679_v35 = vpop.permute.xlu1 %678  ;;  %v1144_v36 = vpop.xlane.xlu0 %1143 }
 0x2f1   :  { %v1148_v37 = vsub.f32 %v1131_v19, %v1144_v36  ;;  %v697_v38 = vcombine.low %v673_v29, %v679_v35  ;;  %v698_v39 = vcombine.high %v673_v29, %v679_v35  ;;  %7701 = vpow2.f32 %v1153_v34 }
 0x2f3   :  { %v1155_v40 = vmul.f32 1.442695, %v1148_v37  ;;  %v705_v46 = vrot.slane %v697_v38, %v8020_v41  ;;  %v712_v47 = vrot.slane %v698_v39, %v8020_v41 }
 0x2f4   :  { %v676_v42 = vpop.permute.xlu0 %675  ;;  %v1770_v24 = vpop.permute.xlu1 %1769 }
 0x2f5   :  { %7703 = vpow2.f32 %v1155_v40  ;;  %v681_v43 = vcombine.low %v371_v22, %v676_v42  ;;  %v682_v44 = vcombine.high %v371_v22, %v676_v42 }
 0x2f7   :  { %v8103_v45 = vpop.eup %7697  ;;  %v689_v49 = vrot.slane %v681_v43, %v8020_v41  ;;  %v696_v50 = vrot.slane %v682_v44, %v8020_v41 }
 0x2f8   :  { %v1160_v51 = vsel %vm1132_vm3, %v8103_v45, 0.0  ;;  %v8115_v60 = vpop.eup %7699  ;;  %v1776_v25 = vpop.permute.xlu1 %1775 }
 0x2f9   :  { %v713_v52 = vcombine.low %v689_v49, %v705_v46  ;;  %v714_v53 = vcombine.high %v689_v49, %v705_v46  ;;  %v729_v54 = vcombine.low %v696_v50, %v712_v47  ;;  %v730_v55 = vcombine.high %v696_v50, %v712_v47  ;;  %1161 = vadd.xlane.f32.xlu0 %v1160_v51  ;;  %v1773_v27 = vpop.permute.xlu0 %1772 }
 0x2fa   :  { %v1157_v8 = vsel %vm1132_vm3, %v8115_v60, 0.0  ;;  %v1794_v28 = vcombine.low %v1770_v24, %v1776_v25  ;;  %v1778_v29 = vcombine.low %v7997_v20, %v1773_v27  ;;  %v1795_v31 = vcombine.high %v1770_v24, %v1776_v25 }
 0x2fb   :  { %v721_v56 = vrot.slane %v713_v52, %v8022_v48  ;;  %v728_v57 = vrot.slane %v714_v53, %v8022_v48  ;;  %v737_v58 = vrot.slane %v729_v54, %v8022_v48  ;;  %v744_v59 = vrot.slane %v730_v55, %v8022_v48  ;;  %v8117_v2 = vpop.eup %7701  ;;  %1158 = vadd.xlane.f32.xlu1 %v1157_v8 }
 0x2fc   :  { %v1163_v11 = vsel %vm1132_vm3, %v8117_v2, 0.0  ;;  %v1779_v32 = vcombine.high %v7997_v20, %v1773_v27  ;;  %v1802_v33 = vrot.slane %v1794_v28, %v8020_v41  ;;  %v1786_v34 = vrot.slane %v1778_v29, %v8020_v41 }
 0x2fd   :  { %v749_v61 = vcombine.low %v721_v56, %v728_v57  ;;  %v6773_v63 = vcombine.high %v721_v56, %v728_v57  ;;  %v765_v0 = vcombine.low %v737_v58, %v744_v59  ;;  %v6774_v1 = vcombine.high %v737_v58, %v744_v59  ;;  %v1624_v37 = vpop.permute.xlu0 %1623 }
 0x2fe   :  { %v1809_v35 = vrot.slane %v1795_v31, %v8020_v41  ;;  %v1793_v36 = vrot.slane %v1779_v32, %v8020_v41  ;;  %v1810_v38 = vcombine.low %v1786_v34, %v1802_v33  ;;  %v1811_v39 = vcombine.high %v1786_v34, %v1802_v33 }
 0x2ff   :  { %v8119_v3 = vpop.eup %7703  ;;  %v756_v4 = vrot.slane %v749_v61, %v8020_v41  ;;  %v764_v5 = vrot.slane %v6773_v63, %v8020_v41  ;;  %v772_v6 = vrot.slane %v765_v0, %v8020_v41  ;;  %v780_v7 = vrot.slane %v6774_v1, %v8020_v41  ;;  %1164 = vadd.xlane.f32.xlu1 %v1163_v11 }
 0x300   :  { %v1166_v9 = vsel %vm1132_vm3, %v8119_v3, 0.0  ;;  %v1826_v40 = vcombine.low %v1793_v36, %v1809_v35  ;;  %v1827_v42 = vcombine.high %v1793_v36, %v1809_v35  ;;  %v1818_v44 = vrot.slane %v1810_v38, %v8022_v48 }
 0x301   :  { %v781_v10 = vcombine.low %v756_v4, %v764_v5  ;;  %1167 = vadd.xlane.f32.xlu0 %v1166_v9  ;;  %v797_v13 = vcombine.low %v772_v6, %v780_v7  ;;  %v782_v14 = vcombine.high %v756_v4, %v764_v5  ;;  %v798_v15 = vcombine.high %v772_v6, %v780_v7 }
 0x302   :  { %v1825_v46 = vrot.slane %v1811_v39, %v8022_v48  ;;  %v1834_v20 = vrot.slane %v1826_v40, %v8022_v48  ;;  %v1841_v47 = vrot.slane %v1827_v42, %v8022_v48 }
 0x303   :  { %v789_v12 = vrot.slane %v781_v10, %v8022_v48  ;;  %v805_v16 = vrot.slane %v797_v13, %v8022_v48  ;;  %v8134_v17 = vrot.slane %v782_v14, %v8022_v48  ;;  %v8137_v18 = vrot.slane %v798_v15, %v8022_v48 }
 0x304   :  { %v1846_v49 = vcombine.low %v1818_v44, %v1825_v46  ;;  %v6791_v50 = vcombine.high %v1818_v44, %v1825_v46  ;;  %v1862_v51 = vcombine.low %v1834_v20, %v1841_v47  ;;  %v6792_v52 = vcombine.high %v1834_v20, %v1841_v47 }
 0x305   :  { %v813_v19 = vcombine.low %v789_v12, %v805_v16  ;;  %v814_v21 = vcombine.high %v789_v12, %v805_v16  ;;  %v815_v22 = vcombine.low %v8134_v17, %v8137_v18  ;;  %v816_v23 = vcombine.high %v8134_v17, %v8137_v18 }
 0x306   :  { %v8160_v54 = vrot.slane %v1846_v49, %v8020_v41  ;;  %v8163_v55 = vrot.slane %v6791_v50, %v8020_v41  ;;  %v8166_v58 = vrot.slane %v1862_v51, %v8020_v41  ;;  %v8169_v59 = vrot.slane %v6792_v52, %v8020_v41 }
 0x307   :  { %7122 = vmatpush3.msra.mxu0 %v813_v19  ;;  %7127 = vmatpush3.msra.mxu1 %v814_v21 }
 0x308   :  { %7131 = vmatprep.subr.mxu0 %v7802_v30  ;;  %7136 = vmatprep.subr.mxu1 %v7802_v30  ;;  %v1878_v0 = vcombine.low %v8160_v54, %v8163_v55  ;;  %v1894_v4 = vcombine.low %v8166_v58, %v8169_v59 }
 0x30a   :  { %v1886_v11 = vrot.slane %v1878_v0, %v8022_v48  ;;  %v1902_v12 = vrot.slane %v1894_v4, %v8022_v48 }
 0x30c   :  { %v1911_v27 = vcombine.high %v1886_v11, %v1902_v12  ;;  %v1910_v39 = vcombine.low %v1886_v11, %v1902_v12 }
 0x310   :  { %1626 = vrot.lane.b32.xlu1 %v8005_v26, %s7801_s11 }
 0x317   :  { %1629 = vrot.lane.b32.xlu0 %v8005_v26, %s7799_s29 }
 0x386   :  { %v1162_v43 = vpop.xlane.xlu0 %1161 }
 0x387   :  { %7705 = vrcp.f32 %v1162_v43 }
 0x388   :  { %v1159_v53 = vpop.xlane.xlu1 %1158 }
 0x389   :  { %7707 = vrcp.f32 %v1159_v53 }
 0x38c   :  { %v1165_v63 = vpop.xlane.xlu1 %1164 }
 0x38e   :  { %v1168_v56 = vpop.xlane.xlu0 %1167 }
 0x38f   :  { %7709 = vrcp.f32 %v1168_v56 }
 0x390   :  { %7711 = vrcp.f32 %v1165_v63 }
 0x391   :  { %v7706_v57 = vpop.eup %7705 }
 0x392   :  { %v1174_v61 = vmul.f32 %v7706_v57, %v8103_v45  ;;  %v1630_v1 = vpop.permute.xlu0 %1629  ;;  %v1627_v45 = vpop.permute.xlu1 %1626 }
 0x393   :  { %v1648_v5 = vcombine.low %v1624_v37, %v1630_v1  ;;  %v1649_v6 = vcombine.high %v1624_v37, %v1630_v1  ;;  %v1632_v7 = vcombine.low %v8005_v26, %v1627_v45  ;;  %v1633_v8 = vcombine.high %v8005_v26, %v1627_v45  ;;  %v7708_v13 = vpop.eup %7707 }
 0x394   :  { %7129 = vmatmul.mubr.msk.f32.vlgmr.msra.gmra.mrb[6].mxu1 %vm1132_vm3, %v1174_v61  ;;  %v1173_v19 = vmul.f32 %v7708_v13, %v8115_v60 }
 0x395   :  { %7137 = vmatpush3.msra.mxu1 %v816_v23  ;;  %7138 = vmatprep.mubr.msk.f32.mxu1 %vm7803_vm1, %v7802_v30  ;;  %v1656_v9 = vrot.slane %v1648_v5, %v8020_v41  ;;  %v1663_v10 = vrot.slane %v1649_v6, %v8020_v41  ;;  %v1640_v14 = vrot.slane %v1632_v7, %v8020_v41 }
 0x396   :  { %7146 = vmatprep.subr.mxu1 %v7802_v30  ;;  %v1647_v15 = vrot.slane %v1633_v8, %v8020_v41  ;;  %7124 = vmatmul.mubr.msk.f32.vlgmr.msra.gmra.mrb[8].mxu0 %vm1132_vm3, %v1173_v19 }
 0x397   :  { %v1664_v23 = vcombine.low %v1640_v14, %v1656_v9  ;;  %v1665_v26 = vcombine.high %v1640_v14, %v1656_v9  ;;  %7132 = vmatpush3.msra.mxu0 %v815_v22  ;;  %7133 = vmatprep.mubr.msk.f32.mxu0 %vm7803_vm1, %v7802_v30  ;;  %v1895_v22 = vcombine.high %v8166_v58, %v8169_v59 }
 0x398   :  { %v1680_v24 = vcombine.low %v1647_v15, %v1663_v10  ;;  %v1681_v25 = vcombine.high %v1647_v15, %v1663_v10  ;;  %7141 = vmatprep.subr.mxu0 %v7802_v30 }
 0x399   :  { %v7710_v16 = vpop.eup %7709  ;;  %v1672_v29 = vrot.slane %v1664_v23, %v8022_v48  ;;  %v1679_v31 = vrot.slane %v1665_v26, %v8022_v48  ;;  %v1909_v47 = vrot.slane %v1895_v22, %v8022_v48 }
 0x39a   :  { %v1176_v21 = vmul.f32 %v7710_v16, %v8119_v3  ;;  %v7712_v28 = vpop.eup %7711  ;;  %v1688_v32 = vrot.slane %v1680_v24, %v8022_v48  ;;  %v1695_v3 = vrot.slane %v1681_v25, %v8022_v48  ;;  %v94_v24 = vld [vmem:[%s9205_s30 + $0x8] sm:$0xff] }
 0x39b   :  { %v1175_v60 = vmul.f32 %v7712_v28, %v8117_v2  ;;  %v1700_v33 = vcombine.low %v1672_v29, %v1679_v31  ;;  %v6789_v34 = vcombine.high %v1672_v29, %v1679_v31  ;;  %v1879_v2 = vcombine.high %v8160_v54, %v8163_v55 }
 0x39c   :  { %7139 = vmatmul.mubr.msk.f32.vlgmr.msra.gmra.mrb[8].mxu1 %vm1132_vm3, %v1176_v21  ;;  %v1716_v17 = vcombine.low %v1688_v32, %v1695_v3  ;;  %v6790_v18 = vcombine.high %v1688_v32, %v1695_v3  ;;  %vm2368_vm4 = vcmp.gt.f32.partialorder %v94_v24, 0.0 }
 0x39d   :  { %7147 = vmatpush3.xpose.msk.msra.mxu1 %vm135_vm0, %v1911_v27  ;;  %7148 = vmatprep.mubr.msk.f32.mxu1 %vm7803_vm1, %v7802_v30  ;;  %v1707_v35 = vrot.slane %v1700_v33, %v8020_v41  ;;  %v1715_v36 = vrot.slane %v6789_v34, %v8020_v41  ;;  %v1893_v20 = vrot.slane %v1879_v2, %v8022_v48 }
 0x39e   :  { %7134 = vmatmul.mubr.msk.f32.vlgmr.msra.gmra.mrb[10].mxu0 %vm1132_vm3, %v1175_v60  ;;  %7156 = vmatprep.subr.mxu1 %v7802_v30  ;;  %v1723_v37 = vrot.slane %v1716_v17, %v8020_v41  ;;  %v1731_v38 = vrot.slane %v6790_v18, %v8020_v41 }
 0x39f   :  { %7143 = vmatprep.mubr.msk.f32.mxu0 %vm7803_vm1, %v7802_v30  ;;  %v1732_v40 = vcombine.low %v1707_v35, %v1715_v36  ;;  %v1733_v42 = vcombine.high %v1707_v35, %v1715_v36  ;;  %7142 = vmatpush3.xpose.msk.msra.mxu0 %vm135_vm0, %v1910_v39  ;;  %v1912_v54 = vcombine.low %v1893_v20, %v1909_v47 }
 0x3a0   :  { %v1748_v43 = vcombine.low %v1723_v37, %v1731_v38  ;;  %v1749_v44 = vcombine.high %v1723_v37, %v1731_v38  ;;  %7151 = vmatprep.subr.mxu0 %v7802_v30  ;;  %v1913_v55 = vcombine.high %v1893_v20, %v1909_v47 }
 0x3a1   :  { %v1740_v46 = vrot.slane %v1732_v40, %v8022_v48  ;;  %v1747_v52 = vrot.slane %v1733_v42, %v8022_v48 }
 0x3a2   :  { %v1756_v49 = vrot.slane %v1748_v43, %v8022_v48  ;;  %v1763_v53 = vrot.slane %v1749_v44, %v8022_v48 }
 0x3a4   :  { %v1764_v50 = vcombine.low %v1740_v46, %v1756_v49  ;;  %v1765_v51 = vcombine.high %v1740_v46, %v1756_v49  ;;  %v1766_v56 = vcombine.low %v1747_v52, %v1763_v53  ;;  %v1767_v57 = vcombine.high %v1747_v52, %v1763_v53 }
 0x3a6   :  { %7144 = vmatmul.mubr.msk.f32.vlgmr.msra.gmra.mrb[12].mxu0 %vm135_vm0, %v1764_v50  ;;  %7149 = vmatmul.mubr.msk.f32.vlgmr.msra.gmra.mrb[10].mxu1 %vm135_vm0, %v1765_v51 }
 0x3a7   :  { %7152 = vmatpush3.xpose.msk.msra.mxu0 %vm135_vm0, %v1912_v54  ;;  %7157 = vmatpush3.xpose.msk.msra.mxu1 %vm135_vm0, %v1913_v55 }
 0x3a8   :  { %7153 = vmatprep.mubr.msk.f32.mxu0 %vm7803_vm1, %v7802_v30  ;;  %7158 = vmatprep.mubr.msk.f32.mxu1 %vm7803_vm1, %v7802_v30 }
 0x3a9   :  { %7161 = vmatprep.subr.mxu0 %v7802_v30  ;;  %7166 = vmatprep.subr.mxu1 %v7802_v30 }
 0x3aa   :  { %7154 = vmatmul.mubr.msk.f32.vlgmr.msra.gmra.mrb[14].mxu0 %vm135_vm0, %v1766_v56  ;;  %7159 = vmatmul.mubr.msk.f32.vlgmr.msra.gmra.mrb[12].mxu1 %vm135_vm0, %v1767_v57 }
 0x3ab   :  { %7163 = vmatprep.mubr.msk.f32.mxu0 %vm7803_vm1, %v7802_v30  ;;  %7168 = vmatprep.mubr.msk.f32.mxu1 %vm7803_vm1, %v7802_v30 }
 0x467   :  { %v1319_v58 = vpop.f32.mrb[6].mxu1 }
 0x468   :  { %v7130_v59 = vpop.f32.mrb[7].mxu1 }
 0x469   :  { %v1246_v61 = vpop.f32.mrb[8].mxu0 }
 0x46a   :  { %v7125_v63 = vpop.f32.mrb[9].mxu0 }
 0x46f   :  { %v1465_v0 = vpop.f32.mrb[8].mxu1 }
 0x470   :  { %v1485_v1 = vcombine.low %v1319_v58, %v1465_v0  ;;  %v1486_v4 = vcombine.high %v1319_v58, %v1465_v0  ;;  %v7140_v5 = vpop.f32.mrb[9].mxu1 }
 0x471   :  { %v1392_v6 = vpop.f32.mrb[10].mxu0 }
 0x472   :  { %v1469_v45 = vcombine.low %v1246_v61, %v1392_v6  ;;  %v1470_v7 = vcombine.high %v1246_v61, %v1392_v6  ;;  %v7135_v8 = vpop.f32.mrb[11].mxu0  ;;  %v1493_v9 = vrot.slane %v1485_v1, %v8020_v41  ;;  %v1500_v10 = vrot.slane %v1486_v4, %v8020_v41 }
 0x474   :  { %v1477_v11 = vrot.slane %v1469_v45, %v8020_v41  ;;  %v1484_v12 = vrot.slane %v1470_v7, %v8020_v41 }
 0x476   :  { %v1501_v13 = vcombine.low %v1477_v11, %v1493_v9  ;;  %v1502_v14 = vcombine.high %v1477_v11, %v1493_v9  ;;  %v1517_v15 = vcombine.low %v1484_v12, %v1500_v10  ;;  %v1518_v16 = vcombine.high %v1484_v12, %v1500_v10 }
 0x478   :  { %v1509_v19 = vrot.slane %v1501_v13, %v8022_v48  ;;  %v1516_v21 = vrot.slane %v1502_v14, %v8022_v48  ;;  %v1525_v23 = vrot.slane %v1517_v15, %v8022_v48  ;;  %v1532_v26 = vrot.slane %v1518_v16, %v8022_v48 }
 0x479   :  { %v2132_v31 = vpop.f32.mrb[12].mxu0  ;;  %v2208_v32 = vpop.f32.mrb[10].mxu1 }
 0x47a   :  { %v1537_v25 = vcombine.low %v1509_v19, %v1516_v21  ;;  %v6787_v27 = vcombine.high %v1509_v19, %v1516_v21  ;;  %v1553_v28 = vcombine.low %v1525_v23, %v1532_v26  ;;  %v6788_v29 = vcombine.high %v1525_v23, %v1532_v26  ;;  %v7145_v17 = vpop.f32.mrb[13].mxu0  ;;  %v7150_v18 = vpop.f32.mrb[11].mxu1 }
 0x47b   :  { %v2364_v2 = vmul.f32 0.17677669, %v2132_v31  ;;  %v2365_v22 = vmul.f32 0.17677669, %v2208_v32 }
 0x47c   :  { %v1544_v60 = vrot.slane %v1537_v25, %v8020_v41  ;;  %v1552_v3 = vrot.slane %v6787_v27, %v8020_v41  ;;  %v1560_v33 = vrot.slane %v1553_v28, %v8020_v41  ;;  %v1568_v34 = vrot.slane %v6788_v29, %v8020_v41 }
 0x47d   :  { %v2284_v39 = vpop.f32.mrb[14].mxu0  ;;  %v2360_v40 = vpop.f32.mrb[12].mxu1  ;;  %v2372_v42 = vsel %vm2368_vm4, -1e+09, %v2365_v22  ;;  %v2371_v43 = vsel %vm2368_vm4, -1e+09, %v2364_v2 }
 0x47e   :  { %v1570_v35 = vcombine.high %v1544_v60, %v1552_v3  ;;  %v1586_v36 = vcombine.high %v1560_v33, %v1568_v34  ;;  %v1569_v37 = vcombine.low %v1544_v60, %v1552_v3  ;;  %v1585_v38 = vcombine.low %v1560_v33, %v1568_v34  ;;  %v7160_v47 = vpop.f32.mrb[13].mxu1  ;;  %v7155_v51 = vpop.f32.mrb[15].mxu0 }
 0x47f   :  { %v2366_v44 = vmul.f32 0.17677669, %v2284_v39  ;;  %v2367_v46 = vmul.f32 0.17677669, %v2360_v40  ;;  %v2378_v20 = vsel %vm1132_vm3, %v2372_v42, -inf  ;;  %v2375_v50 = vsel %vm1132_vm3, %v2371_v43, -inf }
 0x480   :  { %v8261_v49 = vrot.slane %v1570_v35, %v8022_v48  ;;  %2379 = vmax.xlane.f32.xlu0 %v2378_v20  ;;  %v8265_v52 = vrot.slane %v1586_v36, %v8022_v48  ;;  %v8268_v53 = vrot.slane %v1569_v37, %v8022_v48  ;;  %v8271_v54 = vrot.slane %v1585_v38, %v8022_v48 }
 0x481   :  { %2376 = vmax.xlane.f32.xlu1 %v2375_v50  ;;  %v2374_v55 = vsel %vm2368_vm4, -1e+09, %v2367_v46  ;;  %v2373_v56 = vsel %vm2368_vm4, -1e+09, %v2366_v44 }
 0x482   :  { %v2384_v57 = vsel %vm1132_vm3, %v2374_v55, -inf  ;;  %v2381_v58 = vsel %vm1132_vm3, %v2373_v56, -inf  ;;  %v1603_v59 = vcombine.low %v8261_v49, %v8265_v52  ;;  %v1601_v61 = vcombine.low %v8268_v53, %v8271_v54 }
 0x483   :  { %v1602_v63 = vcombine.high %v8268_v53, %v8271_v54  ;;  %v1604_v0 = vcombine.high %v8261_v49, %v8265_v52  ;;  %v6809_v53 = vld [vmem:[%s9207_s2] ss:$0 sm:$0xff] }
 0x484   :  { %2382 = vmax.xlane.f32.xlu0 %v2381_v58 }
 0x485   :  { %2385 = vmax.xlane.f32.xlu1 %v2384_v57 }
 0x50d   :  { %v2380_v1 = vpop.xlane.xlu0 %2379 }
 0x50e   :  { %v2388_v4 = vsub.f32 %v2372_v42, %v2380_v1  ;;  %v2377_v5 = vpop.xlane.xlu1 %2376 }
 0x50f   :  { %v2387_v6 = vsub.f32 %v2371_v43, %v2377_v5 }
 0x510   :  { %v2393_v45 = vmul.f32 1.442695, %v2388_v4 }
 0x511   :  { %v2391_v7 = vmul.f32 1.442695, %v2387_v6  ;;  %v2383_v8 = vpop.xlane.xlu0 %2382 }
 0x512   :  { %7713 = vpow2.f32 %v2393_v45  ;;  %v2389_v9 = vsub.f32 %v2373_v56, %v2383_v8  ;;  %v2386_v19 = vpop.xlane.xlu1 %2385 }
 0x513   :  { %7715 = vpow2.f32 %v2391_v7  ;;  %v2390_v21 = vsub.f32 %v2374_v55, %v2386_v19 }
 0x514   :  { %v2395_v10 = vmul.f32 1.442695, %v2389_v9 }
 0x515   :  { %v2397_v23 = vmul.f32 1.442695, %v2390_v21 }
 0x516   :  { %7717 = vpow2.f32 %v2395_v10 }
 0x517   :  { %7719 = vpow2.f32 %v2397_v23 }
 0x51c   :  { %v8285_v11 = vpop.eup %7713 }
 0x51d   :  { %v8287_v12 = vpop.eup %7715  ;;  %v2402_v13 = vsel %vm1132_vm3, %v8285_v11, 0.0 }
 0x51e   :  { %2403 = vadd.xlane.f32.xlu1 %v2402_v13  ;;  %v2399_v14 = vsel %vm1132_vm3, %v8287_v12, 0.0 }
 0x51f   :  { %2400 = vadd.xlane.f32.xlu0 %v2399_v14 }
 0x520   :  { %v8293_v15 = vpop.eup %7717 }
 0x521   :  { %v2405_v16 = vsel %vm1132_vm3, %v8293_v15, 0.0  ;;  %v8301_v26 = vpop.eup %7719 }
 0x522   :  { %v2408_v24 = vsel %vm1132_vm3, %v8301_v26, 0.0 }
 0x523   :  { %2406 = vadd.xlane.f32.xlu0 %v2405_v16 }
 0x52f   :  { %1918 = vrot.lane.b32.xlu1 %v8079_v62, %s7801_s11 }
 0x539   :  { %1915 = vrot.lane.b32.xlu0 %v8079_v62, %s7800_s6 }
 0x553   :  { %2409 = vadd.xlane.f32.xlu1 %v2408_v24 }
 0x564   :  { %1921 = vrot.lane.b32.xlu1 %v8079_v62, %s7799_s29 }
 0x5ab   :  { %v2404_v25 = vpop.xlane.xlu1 %2403 }
 0x5ac   :  { %v2401_v27 = vpop.xlane.xlu0 %2400  ;;  %7721 = vrcp.f32 %v2404_v25 }
 0x5ad   :  { %7723 = vrcp.f32 %v2401_v27 }
 0x5af   :  { %v1919_v28 = vpop.permute.xlu1 %1918 }
 0x5b0   :  { %v2407_v29 = vpop.xlane.xlu0 %2406  ;;  %v1924_v32 = vcombine.low %v8079_v62, %v1919_v28  ;;  %v1925_v60 = vcombine.high %v8079_v62, %v1919_v28  ;;  %v113_v28 = vld [vmem:[%s9206_s0 + $0x18] sm:$0xff] }
 0x5b1   :  { %7725 = vrcp.f32 %v2407_v29 }
 0x5b2   :  { %v1932_v18 = vrot.slane %v1924_v32, %v8020_v41  ;;  %v1939_v2 = vrot.slane %v1925_v60, %v8020_v41  ;;  %v115_v32 = vld [vmem:[%s9206_s0 + $0x28] sm:$0xff] }
 0x5b4   :  { %v1916_v3 = vpop.permute.xlu0 %1915 }
 0x5b6   :  { %v7722_v57 = vpop.eup %7721 }
 0x5b7   :  { %v7724_v6 = vpop.eup %7723  ;;  %v2416_v19 = vmul.f32 %v7722_v57, %v8285_v11  ;;  %v110_v11 = vld [vmem:[%s9206_s0] sm:$0xff] }
 0x5b8   :  { %v2415_v21 = vmul.f32 %v7724_v6, %v8287_v12  ;;  %v111_v12 = vld [vmem:[%s9206_s0 + $0x8] sm:$0xff] }
 0x5bb   :  { %v7726_v8 = vpop.eup %7725 }
 0x5bc   :  { %v2417_v25 = vmul.f32 %v7726_v8, %v8293_v15  ;;  %v112_v15 = vld [vmem:[%s9206_s0 + $0x10] sm:$0xff] }
 0x5bd   :  { %v7476_v29 = vpack.c.bf16 %v113_v28, %v112_v15 }
 0x5e0   :  { %v2410_v31 = vpop.xlane.xlu1 %2409 }
 0x5e1   :  { %7727 = vrcp.f32 %v2410_v31  ;;  %v114_v31 = vld [vmem:[%s9206_s0 + $0x20] sm:$0xff] }
 0x5e2   :  { %v7480_v60 = vpack.c.bf16 %v115_v32, %v114_v31 }
 0x5e4   :  { %v1922_v33 = vpop.permute.xlu1 %1921 }
 0x5e5   :  { %v1940_v34 = vcombine.low %v1916_v3, %v1922_v33  ;;  %v1941_v17 = vcombine.high %v1916_v3, %v1922_v33  ;;  %v116_v3 = vld [vmem:[%s9206_s0 + $0x30] sm:$0xff]  ;;  %v117_v33 = vld [vmem:[%s9206_s0 + $0x38] sm:$0xff] }
 0x5e7   :  { %v1948_v22 = vrot.slane %v1940_v34, %v8020_v41  ;;  %v1955_v35 = vrot.slane %v1941_v17, %v8020_v41  ;;  %v7484_v34 = vpack.c.bf16 %v117_v33, %v116_v3  ;;  %v118_v17 = vld [vmem:[%s9206_s0 + $0x40] sm:$0xff] }
 0x5e9   :  { %v1956_v36 = vcombine.low %v1932_v18, %v1948_v22  ;;  %v1957_v37 = vcombine.high %v1932_v18, %v1948_v22  ;;  %v1972_v38 = vcombine.low %v1939_v2, %v1955_v35  ;;  %v1973_v39 = vcombine.high %v1939_v2, %v1955_v35  ;;  %v119_v18 = vld [vmem:[%s9206_s0 + $0x48] sm:$0xff]  ;;  %v120_v22 = vld [vmem:[%s9206_s0 + $0x50] sm:$0xff]  ;;  %v121_v35 = vld [vmem:[%s9206_s0 + $0x58] sm:$0xff] }
 0x5ea   :  { %v7488_v2 = vpack.c.bf16 %v119_v18, %v118_v17 }
 0x5eb   :  { %v1964_v62 = vrot.slane %v1956_v36, %v8022_v48  ;;  %v1971_v40 = vrot.slane %v1957_v37, %v8022_v48  ;;  %v1980_v42 = vrot.slane %v1972_v38, %v8022_v48  ;;  %v1987_v43 = vrot.slane %v1973_v39, %v8022_v48  ;;  %v7728_v16 = vpop.eup %7727 }
 0x5ec   :  { %v2418_v27 = vmul.f32 %v7728_v16, %v8301_v26  ;;  %v7472_v26 = vpack.c.bf16 %v111_v12, %v110_v11  ;;  %v7492_v36 = vpack.c.bf16 %v121_v35, %v120_v22  ;;  %v124_v11 = vld [vmem:[%s9206_s0 + $0x70] sm:$0xff]  ;;  %v125_v12 = vld [vmem:[%s9206_s0 + $0x78] sm:$0xff] }
 0x5ed   :  { %v1992_v44 = vcombine.low %v1964_v62, %v1971_v40  ;;  %v6793_v46 = vcombine.high %v1964_v62, %v1971_v40  ;;  %v2008_v20 = vcombine.low %v1980_v42, %v1987_v43  ;;  %v6794_v47 = vcombine.high %v1980_v42, %v1987_v43 }
 0x5ee   :  { %v7500_v31 = vpack.c.bf16 %v125_v12, %v124_v11 }
 0x5ef   :  { %v1999_v50 = vrot.slane %v1992_v44, %v8020_v41  ;;  %v2007_v51 = vrot.slane %v6793_v46, %v8020_v41  ;;  %v2015_v55 = vrot.slane %v2008_v20, %v8020_v41  ;;  %v2023_v56 = vrot.slane %v6794_v47, %v8020_v41 }
 0x5f1   :  { %v2024_v58 = vcombine.low %v1999_v50, %v2007_v51  ;;  %v2040_v1 = vcombine.low %v2015_v55, %v2023_v56  ;;  %v2025_v4 = vcombine.high %v1999_v50, %v2007_v51  ;;  %v2041_v5 = vcombine.high %v2015_v55, %v2023_v56 }
 0x5f3   :  { %v2032_v45 = vrot.slane %v2024_v58, %v8022_v48  ;;  %v2048_v7 = vrot.slane %v2040_v1, %v8022_v48  ;;  %v2039_v9 = vrot.slane %v2025_v4, %v8022_v48  ;;  %v2055_v10 = vrot.slane %v2041_v5, %v8022_v48 }
 0x5f5   :  { %v2056_v13 = vcombine.low %v2032_v45, %v2048_v7  ;;  %v2057_v14 = vcombine.high %v2032_v45, %v2048_v7  ;;  %v2058_v23 = vcombine.low %v2039_v9, %v2055_v10  ;;  %v2059_v24 = vcombine.high %v2039_v9, %v2055_v10  ;;  %v122_v9 = vld [vmem:[%s9206_s0 + $0x60] sm:$0xff]  ;;  %v123_v10 = vld [vmem:[%s9206_s0 + $0x68] sm:$0xff] }
 0x5f7   :  { %7162 = vmatpush3.msra.mxu0 %v2056_v13  ;;  %7167 = vmatpush3.msra.mxu1 %v2057_v14 }
 0x5f8   :  { %7164 = vmatmul.mubr.msk.f32.vlgmr.msra.gmra.mrb[16].mxu0 %vm1132_vm3, %v2415_v21  ;;  %7169 = vmatmul.mubr.msk.f32.vlgmr.msra.gmra.mrb[14].mxu1 %vm1132_vm3, %v2416_v19  ;;  %v7496_v21 = vpack.c.bf16 %v123_v10, %v122_v9  ;;  %v2995_v9 = vld [vmem:[%s9164_s13 + $0x10] sm:$0xff] }
 0x5f9   :  { %7171 = vmatprep.subr.mxu0 %v7802_v30  ;;  %7176 = vmatprep.subr.mxu1 %v7802_v30 }
 0x5fa   :  { %7172 = vmatpush3.msra.mxu0 %v2058_v23  ;;  %7177 = vmatpush3.msra.mxu1 %v2059_v24 }
 0x5fb   :  { %7173 = vmatprep.mubr.msk.f32.mxu0 %vm7803_vm1, %v7802_v30  ;;  %7178 = vmatprep.mubr.msk.f32.mxu1 %vm7803_vm1, %v7802_v30 }
 0x5fc   :  { %7174 = vmatmul.mubr.msk.f32.vlgmr.msra.gmra.mrb[18].mxu0 %vm1132_vm3, %v2417_v25  ;;  %7179 = vmatmul.mubr.msk.f32.vlgmr.msra.gmra.mrb[16].mxu1 %vm1132_vm3, %v2418_v27 }
 0x5fd   :  { %7473 = vmatprep.subr.bf16.mxu0 %v7472_v26 }
 0x5fe   :  { %7475 = vmatpush3.bf16.msra.mxu0 %v7472_v26 }
 0x5ff   :  { %7477 = vmatprep.subr.bf16.mxu0 %v7476_v29 }
 0x602   :  { %7479 = vmatpush3.bf16.msra.mxu0 %v7476_v29 }
 0x603   :  { %7481 = vmatprep.subr.bf16.mxu0 %v7480_v60 }
 0x606   :  { %7483 = vmatpush3.bf16.msra.mxu0 %v7480_v60 }
 0x607   :  { %7485 = vmatprep.subr.bf16.mxu0 %v7484_v34 }
 0x60a   :  { %7487 = vmatpush3.bf16.msra.mxu0 %v7484_v34 }
 0x60b   :  { %7489 = vmatprep.subr.bf16.mxu0 %v7488_v2 }
 0x60e   :  { %7491 = vmatpush3.bf16.msra.mxu0 %v7488_v2 }
 0x60f   :  { %7493 = vmatprep.subr.bf16.mxu0 %v7492_v36 }
 0x612   :  { %7495 = vmatpush3.bf16.msra.mxu0 %v7492_v36 }
 0x613   :  { %7497 = vmatprep.subr.bf16.mxu0 %v7496_v21 }
 0x616   :  { %7499 = vmatpush3.bf16.msra.mxu0 %v7496_v21 }
 0x617   :  { %7501 = vmatprep.subr.bf16.mxu0 %v7500_v31 }
 0x61a   :  { %7503 = vmatpush3.bf16.msra.mxu0 %v7500_v31 }
 0x6cb   :  { %v2488_v37 = vpop.f32.mrb[16].mxu0  ;;  %v2561_v38 = vpop.f32.mrb[14].mxu1 }
 0x6cc   :  { %v7165_v39 = vpop.f32.mrb[17].mxu0  ;;  %v7170_v62 = vpop.f32.mrb[15].mxu1 }
 0x6cf   :  { %v2634_v40 = vpop.f32.mrb[18].mxu0  ;;  %v2707_v42 = vpop.f32.mrb[16].mxu1 }
 0x6d0   :  { %v2711_v43 = vcombine.low %v2488_v37, %v2634_v40  ;;  %v2712_v44 = vcombine.high %v2488_v37, %v2634_v40  ;;  %v2727_v46 = vcombine.low %v2561_v38, %v2707_v42  ;;  %v2728_v20 = vcombine.high %v2561_v38, %v2707_v42  ;;  %v7175_v47 = vpop.f32.mrb[19].mxu0  ;;  %v7180_v50 = vpop.f32.mrb[17].mxu1 }
 0x6d2   :  { %v2719_v51 = vrot.slane %v2711_v43, %v8020_v41  ;;  %v2726_v55 = vrot.slane %v2712_v44, %v8020_v41  ;;  %v2735_v56 = vrot.slane %v2727_v46, %v8020_v41  ;;  %v2742_v57 = vrot.slane %v2728_v20, %v8020_v41 }
 0x6d4   :  { %v2743_v58 = vcombine.low %v2719_v51, %v2735_v56  ;;  %v2744_v1 = vcombine.high %v2719_v51, %v2735_v56  ;;  %v2759_v4 = vcombine.low %v2726_v55, %v2742_v57  ;;  %v2760_v5 = vcombine.high %v2726_v55, %v2742_v57  ;;  %v7773_v51 = vld [vmem:[%s9200_s28 + $0x8] sm:$0xff]  ;;  %v7774_v56 = vld [vmem:[%s9200_s28] sm:$0xff] }
 0x6d6   :  { %v2751_v6 = vrot.slane %v2743_v58, %v8022_v48  ;;  %v2758_v45 = vrot.slane %v2744_v1, %v8022_v48  ;;  %v2767_v7 = vrot.slane %v2759_v4, %v8022_v48  ;;  %v2774_v8 = vrot.slane %v2760_v5, %v8022_v48 }
 0x6d8   :  { %v2779_v13 = vcombine.low %v2751_v6, %v2758_v45  ;;  %v6807_v14 = vcombine.high %v2751_v6, %v2758_v45  ;;  %v2795_v16 = vcombine.low %v2767_v7, %v2774_v8  ;;  %v6808_v19 = vcombine.high %v2767_v7, %v2774_v8  ;;  %v2993_v7 = vld [vmem:[%s9164_s13] sm:$0xff]  ;;  %v2994_v8 = vld [vmem:[%s9164_s13 + $0x8] sm:$0xff] }
 0x6d9   :  { %v7504_v10 = vpack.c.bf16 %v2994_v8, %v2993_v7 }
 0x6da   :  { %v2786_v23 = vrot.slane %v2779_v13, %v8020_v41  ;;  %v2794_v24 = vrot.slane %v6807_v14, %v8020_v41  ;;  %v2802_v25 = vrot.slane %v2795_v16, %v8020_v41  ;;  %v2810_v27 = vrot.slane %v6808_v19, %v8020_v41  ;;  %v2996_v13 = vld [vmem:[%s9164_s13 + $0x18] sm:$0xff]  ;;  %v2998_v16 = vld [vmem:[%s9166_s15] sm:$0xff]  ;;  %v2999_v19 = vld [vmem:[%s9166_s15 + $0x8] sm:$0xff] }
 0x6db   :  { %v7508_v14 = vpack.c.bf16 %v2996_v13, %v2995_v9  ;;  %7505 = vmatprep.subr.bf16.mxu1 %v7504_v10  ;;  %v7512_v21 = vpack.c.bf16 %v2999_v19, %v2998_v16 }
 0x6dc   :  { %v2812_v15 = vcombine.high %v2786_v23, %v2794_v24  ;;  %v2828_v26 = vcombine.high %v2802_v25, %v2810_v27  ;;  %v2811_v28 = vcombine.low %v2786_v23, %v2794_v24  ;;  %v2827_v29 = vcombine.low %v2802_v25, %v2810_v27  ;;  %7507 = vmatpush3.bf16.msra.mxu1 %v7504_v10 }
 0x6dd   :  { %7509 = vmatprep.subr.bf16.mxu1 %v7508_v14 }
 0x6de   :  { %v2826_v32 = vrot.slane %v2812_v15, %v8022_v48  ;;  %v2842_v60 = vrot.slane %v2828_v26, %v8022_v48  ;;  %v2819_v3 = vrot.slane %v2811_v28, %v8022_v48  ;;  %v2835_v33 = vrot.slane %v2827_v29, %v8022_v48 }
 0x6e0   :  { %v2845_v34 = vcombine.low %v2826_v32, %v2842_v60  ;;  %v2844_v17 = vcombine.high %v2819_v3, %v2835_v33  ;;  %v2843_v18 = vcombine.low %v2819_v3, %v2835_v33  ;;  %v2846_v2 = vcombine.high %v2826_v32, %v2842_v60  ;;  %7511 = vmatpush3.bf16.msra.mxu1 %v7508_v14 }
 0x6e1   :  { %7513 = vmatprep.subr.bf16.mxu1 %v7512_v21 }
 0x6e2   :  { %v7672_v22 = vpack.i.bf16 %v2845_v34, %v1603_v59  ;;  %v7667_v35 = vpack.i.bf16 %v2844_v17, %v1602_v63  ;;  %v7677_v36 = vpack.i.bf16 %v2846_v2, %v1604_v0 }
 0x6e4   :  { %7673 = vrot.lane.b32.xlu1 %v7672_v22, %s7801_s11  ;;  %7668 = vrot.lane.b32.xlu0 %v7667_v35, %s7799_s29  ;;  %v6810_v22 = vld [vmem:[%s9208_s5] ss:$0 sm:$0xff] }
 0x6e8   :  { %7678 = vrot.lane.b32.xlu0 %v7677_v36, %s7800_s6 }
 0x756   :  { %v7674_v37 = vpop.permute.xlu1 %7673  ;;  %v7669_v38 = vpop.permute.xlu0 %7668 }
 0x757   :  { %v7671_v39 = vunpack.i.h.bf16 %v7669_v38  ;;  %v7670_v62 = vunpack.i.l.bf16 %v7669_v38  ;;  %v7676_v40 = vunpack.i.h.bf16 %v7674_v37  ;;  %v7675_v59 = vunpack.i.l.bf16 %v7674_v37  ;;  %v6811_v37 = vld [vmem:[%s9163_s12] ss:$0 sm:$0xff] }
 0x759   :  { %v2859_v42 = vsel %vm135_vm0, %v2843_v18, %v7671_v39  ;;  %v1617_v49 = vsel %vm135_vm0, %v1601_v61, %v7670_v62  ;;  %v3000_v62 = vld [vmem:[%s9166_s15 + $0x10] sm:$0xff] }
 0x75a   :  { %v7679_v52 = vpop.permute.xlu0 %7678  ;;  %v1619_v43 = vsel %vm1618_vm5, %v1617_v49, %v7675_v59  ;;  %v2860_v44 = vsel %vm1618_vm5, %v2859_v42, %v7676_v40  ;;  %v3001_v40 = vld [vmem:[%s9166_s15 + $0x18] sm:$0xff] }
 0x75b   :  { %v7681_v63 = vunpack.i.h.bf16 %v7679_v52  ;;  %v7680_v0 = vunpack.i.l.bf16 %v7679_v52  ;;  %v7516_v52 = vpack.c.bf16 %v3001_v40, %v3000_v62 }
 0x75d   :  { %v1621_v46 = vsel %vm1620_vm6, %v1619_v43, %v7680_v0  ;;  %v2861_v20 = vsel %vm1620_vm6, %v2860_v44, %v7681_v63  ;;  %v89_v63 = vld [vmem:[%s9209_s4] sm:$0xff]  ;;  %v90_v0 = vld [vmem:[%s9209_s4 + $0x8] sm:$0xff] }
 0x75e   :  { %7213 = vmatprep.mubr.f32.mxu0 %v1621_v46  ;;  %v6812_v43 = vld [vmem:[%s9165_s14] ss:$0 sm:$0xff] }
 0x75f   :  { %7214 = vmatmul.mubr.f32.vlgmr.msra.gmra.mrb[20].mxu0 %v2861_v20 }
 0x760   :  { %7266 = vmatprep.mubr.msk.f32.mxu0 %vm7803_vm1, %v7802_v30 }
 0x832   :  { %v7215_v54 = vpop.f32.mrb[20].mxu0 }
 0x833   :  { %v2940_v61 = vadd.f32 %v7215_v54, %v6809_v53  ;;  %v2934_v47 = vpop.f32.mrb[21].mxu0 }
 0x834   :  { %v2935_v50 = vadd.f32 %v6809_v53, %v2934_v47  ;;  %v8493_v53 = vld [vmem:[%s9167_s16] ss:$0 sm:$0xff] }
 0x835   :  { %v2944_v55 = vadd.f32 %v7773_v51, %v2940_v61 }
 0x836   :  { %v2943_v57 = vadd.f32 %v7774_v56, %v2935_v50  ;;  %v3004_v56 = vld [vmem:[%s9168_s17 + $0x8] sm:$0xff] }
 0x837   :  { %v2948_v58 = vsel %vm135_vm0, %v2944_v55, 0.0  ;;  %v2952_v5 = vmul.f32 %v2944_v55, %v2944_v55 }
 0x838   :  { %2949 = vadd.xlane.f32.xlu0 %v2948_v58  ;;  %v2945_v1 = vsel %vm135_vm0, %v2943_v57, 0.0  ;;  %v2951_v4 = vmul.f32 %v2943_v57, %v2943_v57  ;;  %v3005_v58 = vld [vmem:[%s9168_s17 + $0x10] sm:$0xff] }
 0x839   :  { %2946 = vadd.xlane.f32.xlu1 %v2945_v1  ;;  %v2956_v45 = vsel %vm135_vm0, %v2952_v5, 0.0  ;;  %v3006_v1 = vld [vmem:[%s9168_s17 + $0x18] sm:$0xff]  ;;  %v91_v5 = vld [vmem:[%s9209_s4 + $0x10] sm:$0xff] }
 0x83a   :  { %v2953_v6 = vsel %vm135_vm0, %v2951_v4, 0.0  ;;  %v7524_v4 = vpack.c.bf16 %v3006_v1, %v3005_v58 }
 0x83c   :  { %2954 = vadd.xlane.f32.xlu0 %v2953_v6  ;;  %v92_v6 = vld [vmem:[%s9209_s4 + $0x18] sm:$0xff] }
 0x83d   :  { %2957 = vadd.xlane.f32.xlu1 %v2956_v45  ;;  %v7806_v45 = vmov 0.0|0.0  }
 0x83e   :  { %7532 = vmatprep.subr.bf16.mxu0 %v7806_v45 }
 0x8c5   :  { %v2950_v23 = vpop.xlane.xlu0 %2949 }
 0x8c6   :  { %v2947_v24 = vpop.xlane.xlu1 %2946  ;;  %v2960_v25 = vmul.f32 0.03125, %v2950_v23 }
 0x8c7   :  { %v2959_v27 = vmul.f32 0.03125, %v2947_v24 }
 0x8c8   :  { %v2964_v28 = vmul.f32 %v2960_v25, %v2960_v25  ;;  %v2970_v2 = vsub.f32 %v2944_v55, %v2960_v25  ;;  %v3003_v55 = vld [vmem:[%s9168_s17] sm:$0xff] }
 0x8c9   :  { %v2963_v11 = vmul.f32 %v2959_v27, %v2959_v27  ;;  %v2955_v12 = vpop.xlane.xlu0 %2954  ;;  %v2969_v17 = vsub.f32 %v2943_v57, %v2959_v27  ;;  %v7520_v57 = vpack.c.bf16 %v3004_v56, %v3003_v55 }
 0x8ca   :  { %v2961_v15 = vmul.f32 0.03125, %v2955_v12  ;;  %v2958_v26 = vpop.xlane.xlu1 %2957 }
 0x8cb   :  { %v2962_v29 = vmul.f32 0.03125, %v2958_v26 }
 0x8cc   :  { %v2965_v31 = vsub.f32 %v2961_v15, %v2963_v11 }
 0x8cd   :  { %v2966_v32 = vsub.f32 %v2962_v29, %v2964_v28 }
 0x8ce   :  { %v2967_v60 = vmax.f32 %v2965_v31, 0.0 }
 0x8cf   :  { %v2968_v3 = vmax.f32 %v2966_v32, 0.0 }
 0x8d0   :  { %v2971_v33 = vadd.f32 1e-05, %v2967_v60 }
 0x8d1   :  { %v2972_v34 = vadd.f32 1e-05, %v2968_v3 }
 0x8d2   :  { %7729 = vrsqrt.f32 %v2971_v33 }
 0x8d3   :  { %7731 = vrsqrt.f32 %v2972_v34 }
 0x8dc   :  { %v7730_v18 = vpop.eup %7729 }
 0x8dd   :  { %v7732_v35 = vpop.eup %7731  ;;  %v2975_v36 = vmul.f32 %v7730_v18, %v2969_v17 }
 0x8de   :  { %v2976_v38 = vmul.f32 %v7732_v35, %v2970_v2 }
 0x8df   :  { %v2983_v39 = vmul.f32 %v6810_v22, %v2975_v36 }
 0x8e0   :  { %v2984_v59 = vmul.f32 %v6810_v22, %v2976_v38 }
 0x8e1   :  { %v8469_v42 = vadd.f32 %v6811_v37, %v2983_v39 }
 0x8e2   :  { %v8471_v49 = vadd.f32 %v6811_v37, %v2984_v59 }
 0x8e3   :  { %7224 = vmatprep.mubr.msk.f32.mxu1 %vm135_vm0, %v8469_v42 }
 0x8e4   :  { %7225 = vmatmul.mubr.msk.f32.vlgmr.msra.gmra.mrb[18].mxu1 %vm135_vm0, %v8471_v49 }
 0x8e5   :  { %7515 = vmatpush3.bf16.msra.mxu1 %v7512_v21  ;;  %7235 = vmatprep.mubr.msk.f32.mxu1 %vm135_vm0, %v89_v63 }
 0x8e6   :  { %7517 = vmatprep.subr.bf16.mxu1 %v7516_v52 }
 0x8e9   :  { %7519 = vmatpush3.bf16.msra.mxu1 %v7516_v52 }
 0x8ea   :  { %7521 = vmatprep.subr.bf16.mxu1 %v7520_v57 }
 0x8ec   :  { %7236 = vmatmul.mubr.msk.f32.vlgmr.msra.gmra.mrb[20].mxu1 %vm135_vm0, %v90_v0 }
 0x8ed   :  { %7523 = vmatpush3.bf16.msra.mxu1 %v7520_v57  ;;  %7238 = vmatprep.mubr.msk.f32.mxu1 %vm135_vm0, %v91_v5 }
 0x8ee   :  { %7525 = vmatprep.subr.bf16.mxu1 %v7524_v4 }
 0x8f0   :  { %7239 = vmatmul.mubr.msk.f32.gmra.mrb[22].mxu1 %vm135_vm0, %v92_v6 }
 0x8f1   :  { %7527 = vmatpush3.bf16.msra.mxu1 %v7524_v4  ;;  %7249 = vmatprep.mubr.msk.f32.mxu1 %vm135_vm0, %v89_v63 }
 0x8f2   :  { %7528 = vmatprep.subr.bf16.mxu1 %v7806_v45 }
 0x8f4   :  { %7250 = vmatmul.mubr.msk.f32.vlgmr.msra.gmra.mrb[24].mxu1 %vm135_vm0, %v90_v0 }
 0x8f5   :  { %7252 = vmatprep.mubr.msk.f32.mxu1 %vm135_vm0, %v91_v5 }
 0x8f8   :  { %7253 = vmatmul.mubr.msk.f32.gmra.mrb[26].mxu1 %vm135_vm0, %v92_v6 }
 0x8f9   :  { %7259 = vmatprep.mubr.msk.f32.mxu1 %vm7803_vm1, %v7802_v30 }
 0x9b7   :  { %v7226_v44 = vpop.f32.mrb[18].mxu1 }
 0x9b8   :  { %v8488_v46 = vadd.f32 %v7226_v44, %v6812_v43  ;;  %v3105_v20 = vpop.f32.mrb[19].mxu1 }
 0x9b9   :  { %v8503_v51 = vadd.f32 %v6812_v43, %v3105_v20 }
 0x9bf   :  { %v7237_v54 = vpop.f32.mrb[20].mxu1 }
 0x9c0   :  { %v3204_v61 = vadd.f32 %v7237_v54, %v8493_v53  ;;  %v3198_v47 = vpop.f32.mrb[21].mxu1 }
 0x9c1   :  { %v3199_v50 = vadd.f32 %v8493_v53, %v3198_v47 }
 0x9c2   :  { %3464 = vrot.lane.b32.xlu0 %v3204_v61, %s7801_s11  ;;  %3458 = vrot.lane.b32.xlu1 %v3204_v61, %s7800_s6 }
 0x9c6   :  { %3462 = vrot.lane.b32.xlu1 %v3199_v50, %s7801_s11  ;;  %3456 = vrot.lane.b32.xlu0 %v3199_v50, %s7800_s6 }
 0x9ca   :  { %3468 = vrot.lane.b32.xlu1 %v3199_v50, %s7799_s29  ;;  %3470 = vrot.lane.b32.xlu0 %v3204_v61, %s7799_s29 }
 0x9ce   :  { %3312 = vrot.lane.b32.xlu0 %v8503_v51, %s7801_s11  ;;  %3309 = vrot.lane.b32.xlu1 %v8503_v51, %s7800_s6 }
 0x9d2   :  { %3315 = vrot.lane.b32.xlu1 %v8503_v51, %s7799_s29 }
 0xa34   :  { %v3465_v7 = vpop.permute.xlu0 %3464  ;;  %v3459_v8 = vpop.permute.xlu1 %3458 }
 0xa35   :  { %v3542_v16 = vcombine.low %v3204_v61, %v3465_v7  ;;  %v3543_v19 = vcombine.high %v3204_v61, %v3465_v7 }
 0xa37   :  { %v3550_v32 = vrot.slane %v3542_v16, %v8020_v41  ;;  %v3557_v60 = vrot.slane %v3543_v19, %v8020_v41 }
 0xa38   :  { %v3463_v9 = vpop.permute.xlu1 %3462  ;;  %v3457_v10 = vpop.permute.xlu0 %3456 }
 0xa39   :  { %v3474_v13 = vcombine.low %v3199_v50, %v3463_v9  ;;  %v3475_v14 = vcombine.high %v3199_v50, %v3463_v9 }
 0xa3b   :  { %v3482_v12 = vrot.slane %v3474_v13, %v8020_v41  ;;  %v3489_v15 = vrot.slane %v3475_v14, %v8020_v41 }
 0xa3c   :  { %v3469_v21 = vpop.permute.xlu1 %3468  ;;  %v3471_v23 = vpop.permute.xlu0 %3470 }
 0xa3d   :  { %v3490_v24 = vcombine.low %v3457_v10, %v3469_v21  ;;  %v3491_v25 = vcombine.high %v3457_v10, %v3469_v21  ;;  %v3558_v27 = vcombine.low %v3459_v8, %v3471_v23  ;;  %v3559_v11 = vcombine.high %v3459_v8, %v3471_v23 }
 0xa3f   :  { %v3498_v26 = vrot.slane %v3490_v24, %v8020_v41  ;;  %v3505_v28 = vrot.slane %v3491_v25, %v8020_v41  ;;  %v3566_v29 = vrot.slane %v3558_v27, %v8020_v41  ;;  %v3573_v31 = vrot.slane %v3559_v11, %v8020_v41 }
 0xa40   :  { %v3310_v63 = vpop.permute.xlu1 %3309  ;;  %v3313_v13 = vpop.permute.xlu0 %3312 }
 0xa41   :  { %v3506_v3 = vcombine.low %v3482_v12, %v3498_v26  ;;  %v3507_v33 = vcombine.high %v3482_v12, %v3498_v26  ;;  %v3522_v34 = vcombine.low %v3489_v15, %v3505_v28  ;;  %v3523_v17 = vcombine.high %v3489_v15, %v3505_v28 }
 0xa42   :  { %v3574_v18 = vcombine.low %v3550_v32, %v3566_v29  ;;  %v3575_v2 = vcombine.high %v3550_v32, %v3566_v29  ;;  %v3590_v22 = vcombine.low %v3557_v60, %v3573_v31  ;;  %v3591_v35 = vcombine.high %v3557_v60, %v3573_v31 }
 0xa43   :  { %v3514_v36 = vrot.slane %v3506_v3, %v8022_v48  ;;  %v3521_v37 = vrot.slane %v3507_v33, %v8022_v48  ;;  %v3530_v38 = vrot.slane %v3522_v34, %v8022_v48  ;;  %v3537_v39 = vrot.slane %v3523_v17, %v8022_v48 }
 0xa44   :  { %v3582_v62 = vrot.slane %v3574_v18, %v8022_v48  ;;  %v3589_v40 = vrot.slane %v3575_v2, %v8022_v48  ;;  %v3598_v59 = vrot.slane %v3590_v22, %v8022_v48  ;;  %v3605_v52 = vrot.slane %v3591_v35, %v8022_v48  ;;  %v3316_v14 = vpop.permute.xlu1 %3315 }
 0xa45   :  { %v3610_v0 = vcombine.low %v3514_v36, %v3521_v37  ;;  %v6827_v43 = vcombine.high %v3514_v36, %v3521_v37  ;;  %v3626_v44 = vcombine.low %v3530_v38, %v3537_v39  ;;  %v6828_v20 = vcombine.high %v3530_v38, %v3537_v39 }
 0xa46   :  { %v3678_v54 = vcombine.low %v3582_v62, %v3589_v40  ;;  %v6829_v61 = vcombine.high %v3582_v62, %v3589_v40  ;;  %v3694_v47 = vcombine.low %v3598_v59, %v3605_v52  ;;  %v6830_v50 = vcombine.high %v3598_v59, %v3605_v52 }
 0xa47   :  { %v3617_v55 = vrot.slane %v3610_v0, %v8020_v41  ;;  %v3625_v56 = vrot.slane %v6827_v43, %v8020_v41  ;;  %v3633_v57 = vrot.slane %v3626_v44, %v8020_v41  ;;  %v3641_v58 = vrot.slane %v6828_v20, %v8020_v41 }
 0xa48   :  { %v3685_v1 = vrot.slane %v3678_v54, %v8020_v41  ;;  %v3693_v4 = vrot.slane %v6829_v61, %v8020_v41  ;;  %v3701_v5 = vrot.slane %v3694_v47, %v8020_v41  ;;  %v3709_v6 = vrot.slane %v6830_v50, %v8020_v41 }
 0xa49   :  { %v3642_v7 = vcombine.low %v3617_v55, %v3625_v56  ;;  %v3658_v8 = vcombine.low %v3633_v57, %v3641_v58  ;;  %v3318_v24 = vcombine.low %v8503_v51, %v3313_v13  ;;  %v3319_v25 = vcombine.high %v8503_v51, %v3313_v13 }
 0xa4a   :  { %v3710_v9 = vcombine.low %v3685_v1, %v3693_v4  ;;  %v3726_v10 = vcombine.low %v3701_v5, %v3709_v6  ;;  %v3334_v27 = vcombine.low %v3310_v63, %v3316_v14  ;;  %v3335_v11 = vcombine.high %v3310_v63, %v3316_v14 }
 0xa4b   :  { %v3650_v16 = vrot.slane %v3642_v7, %v8022_v48  ;;  %v3666_v19 = vrot.slane %v3658_v8, %v8022_v48  ;;  %v3326_v29 = vrot.slane %v3318_v24, %v8020_v41  ;;  %v3333_v31 = vrot.slane %v3319_v25, %v8020_v41  ;;  %v7240_v25 = vpop.f32.mrb[22].mxu1 }
 0xa4c   :  { %v3718_v21 = vrot.slane %v3710_v9, %v8022_v48  ;;  %v3734_v23 = vrot.slane %v3726_v10, %v8022_v48  ;;  %v3342_v32 = vrot.slane %v3334_v27, %v8020_v41  ;;  %v3349_v60 = vrot.slane %v3335_v11, %v8020_v41  ;;  %v3208_v27 = vpop.f32.mrb[23].mxu1 }
 0xa4d   :  { %v3674_v12 = vcombine.low %v3650_v16, %v3666_v19  ;;  %v3675_v26 = vcombine.high %v3650_v16, %v3666_v19  ;;  %v3643_v51 = vcombine.high %v3617_v55, %v3625_v56  ;;  %v3659_v35 = vcombine.high %v3633_v57, %v3641_v58  ;;  %v7251_v11 = vpop.f32.mrb[24].mxu1 }
 0xa4e   :  { %v3742_v15 = vcombine.low %v3718_v21, %v3734_v23  ;;  %v3743_v28 = vcombine.high %v3718_v21, %v3734_v23  ;;  %v3350_v17 = vcombine.low %v3326_v29, %v3342_v32  ;;  %v3351_v18 = vcombine.high %v3326_v29, %v3342_v32 }
 0xa4f   :  { %v3366_v2 = vcombine.low %v3333_v31, %v3349_v60  ;;  %v3367_v22 = vcombine.high %v3333_v31, %v3349_v60  ;;  %v3711_v36 = vcombine.high %v3685_v1, %v3693_v4  ;;  %v3727_v37 = vcombine.high %v3701_v5, %v3709_v6 }
 0xa50   :  { %v7529_v33 = vpack.c.bf16 %v3742_v15, %v3674_v12  ;;  %v7533_v34 = vpack.c.bf16 %v3743_v28, %v3675_v26  ;;  %v3358_v38 = vrot.slane %v3350_v17, %v8022_v48  ;;  %v3365_v39 = vrot.slane %v3351_v18, %v8022_v48  ;;  %v3289_v12 = vpop.f32.mrb[25].mxu1  ;;  %v6820_v15 = vld [vmem:[%s9169_s18] ss:$0 sm:$0xff] }
 0xa51   :  { %v3374_v62 = vrot.slane %v3366_v2, %v8022_v48  ;;  %v3381_v40 = vrot.slane %v3367_v22, %v8022_v48  ;;  %v3657_v43 = vrot.slane %v3643_v51, %v8022_v48  ;;  %v3673_v44 = vrot.slane %v3659_v35, %v8022_v48  ;;  %v7254_v26 = vpop.f32.mrb[26].mxu1 }
 0xa52   :  { %7531 = vmatpush3.bf16.xpose.msk.msra.mxu1 %vm8575_vm7, %v7529_v33  ;;  %7535 = vmatpush3.bf16.xpose.msk.msra.mxu0 %vm8575_vm7, %v7533_v34  ;;  %v3386_v59 = vcombine.low %v3358_v38, %v3365_v39  ;;  %v6825_v52 = vcombine.high %v3358_v38, %v3365_v39  ;;  %v3725_v20 = vrot.slane %v3711_v36, %v8022_v48  ;;  %v3299_v29 = vpop.f32.mrb[27].mxu1 }
 0xa53   :  { %7536 = vmatprep.subr.bf16.mxu1 %v7806_v45  ;;  %7540 = vmatprep.subr.bf16.mxu0 %v7806_v45  ;;  %v3402_v63 = vcombine.low %v3374_v62, %v3381_v40  ;;  %v6826_v0 = vcombine.high %v3374_v62, %v3381_v40  ;;  %v3741_v54 = vrot.slane %v3727_v37, %v8022_v48 }
 0xa54   :  { %v3393_v61 = vrot.slane %v3386_v59, %v8020_v41  ;;  %v3401_v47 = vrot.slane %v6825_v52, %v8020_v41  ;;  %v3676_v58 = vcombine.low %v3657_v43, %v3673_v44  ;;  %v3677_v4 = vcombine.high %v3657_v43, %v3673_v44 }
 0xa55   :  { %v3409_v50 = vrot.slane %v3402_v63, %v8020_v41  ;;  %v3417_v55 = vrot.slane %v6826_v0, %v8020_v41  ;;  %v3744_v1 = vcombine.low %v3725_v20, %v3741_v54  ;;  %v3745_v5 = vcombine.high %v3725_v20, %v3741_v54 }
 0xa56   :  { %v3418_v56 = vcombine.low %v3393_v61, %v3401_v47  ;;  %v3419_v8 = vcombine.high %v3393_v61, %v3401_v47  ;;  %v8622_v28 = vadd.f32 %v7254_v26, %v6820_v15  ;;  %v8624_v31 = vadd.f32 %v6820_v15, %v3299_v29 }
 0xa57   :  { %v3434_v57 = vcombine.low %v3409_v50, %v3417_v55  ;;  %v3435_v9 = vcombine.high %v3409_v50, %v3417_v55  ;;  %v7537_v14 = vpack.c.bf16 %v3744_v1, %v3676_v58  ;;  %v7541_v16 = vpack.c.bf16 %v3745_v5, %v3677_v4 }
 0xa58   :  { %v3426_v6 = vrot.slane %v3418_v56, %v8022_v48  ;;  %v3433_v19 = vrot.slane %v3419_v8, %v8022_v48  ;;  %v8630_v59 = vadd.f32 %v7251_v11, %v6820_v15  ;;  %v3290_v52 = vadd.f32 %v6820_v15, %v3289_v12 }
 0xa59   :  { %v3442_v7 = vrot.slane %v3434_v57, %v8022_v48  ;;  %v3449_v21 = vrot.slane %v3435_v9, %v8022_v48  ;;  %v8637_v63 = vadd.f32 %v8493_v53, %v3208_v27  ;;  %v8645_v0 = vadd.f32 %v7240_v25, %v8493_v53 }
 0xa5b   :  { %v3450_v10 = vcombine.low %v3426_v6, %v3442_v7  ;;  %v3451_v13 = vcombine.high %v3426_v6, %v3442_v7  ;;  %v3452_v23 = vcombine.low %v3433_v19, %v3449_v21  ;;  %v3453_v24 = vcombine.high %v3433_v19, %v3449_v21 }
 0xa5d   :  { %7260 = vmatmul.mubr.msk.f32.vlgmr.msra.gmra.mrb[28].mxu1 %vm135_vm0, %v3450_v10  ;;  %7267 = vmatmul.mubr.msk.f32.vlgmr.msra.gmra.mrb[22].mxu0 %vm135_vm0, %v3451_v13 }
 0xa5e   :  { %7539 = vmatpush3.bf16.xpose.msk.msra.mxu1 %vm8575_vm7, %v7537_v14  ;;  %7543 = vmatpush3.bf16.xpose.msk.msra.mxu0 %vm8575_vm7, %v7541_v16 }
 0xa5f   :  { %7273 = vmatprep.mubr.msk.f32.mxu1 %vm7803_vm1, %v7802_v30  ;;  %7280 = vmatprep.mubr.msk.f32.mxu0 %vm7803_vm1, %v7802_v30 }
 0xa60   :  { %7544 = vmatprep.subr.bf16.mxu1 %v7806_v45  ;;  %7550 = vmatprep.subr.bf16.mxu0 %v7806_v45 }
 0xa65   :  { %7274 = vmatmul.mubr.msk.f32.vlgmr.msra.gmra.mrb[30].mxu1 %vm135_vm0, %v3452_v23  ;;  %7281 = vmatmul.mubr.msk.f32.vlgmr.msra.gmra.mrb[24].mxu0 %vm135_vm0, %v3453_v24 }
 0xa66   :  { %7287 = vmatprep.mubr.msk.f32.mxu1 %vm7803_vm1, %v7802_v30  ;;  %7301 = vmatprep.mubr.msk.f32.mxu0 %vm7803_vm1, %v7802_v30 }
 0xb30   :  { %v4113_v32 = vpop.f32.mrb[28].mxu1  ;;  %v4192_v60 = vpop.f32.mrb[22].mxu0 }
 0xb31   :  { %v4354_v51 = vmul.f32 0.17677669, %v4113_v32  ;;  %v4355_v33 = vmul.f32 0.17677669, %v4192_v60  ;;  %v7261_v34 = vpop.f32.mrb[29].mxu1  ;;  %v7268_v17 = vpop.f32.mrb[23].mxu0 }
 0xb33   :  { %v4362_v18 = vsel %vm4358_vm8, %v4355_v33, -inf  ;;  %v4359_v2 = vsel %vm4358_vm8, %v4354_v51, -inf }
 0xb34   :  { %4363 = vmax.xlane.f32.xlu1 %v4362_v18  ;;  %4360 = vmax.xlane.f32.xlu0 %v4359_v2 }
 0xb38   :  { %v4271_v22 = vpop.f32.mrb[30].mxu1  ;;  %v4350_v35 = vpop.f32.mrb[24].mxu0 }
 0xb39   :  { %v4356_v36 = vmul.f32 0.17677669, %v4271_v22  ;;  %v7275_v37 = vpop.f32.mrb[31].mxu1  ;;  %v7282_v38 = vpop.f32.mrb[25].mxu0  ;;  %v4357_v39 = vmul.f32 0.17677669, %v4350_v35 }
 0xb3b   :  { %v4365_v62 = vsel %vm4358_vm8, %v4356_v36, -inf  ;;  %v4368_v40 = vsel %vm4358_vm8, %v4357_v39, -inf }
 0xb3c   :  { %4366 = vmax.xlane.f32.xlu0 %v4365_v62 }
 0xb40   :  { %4369 = vmax.xlane.f32.xlu0 %v4368_v40 }
 0xb45   :  { %3750 = vrot.lane.b32.xlu1 %v8630_v59, %s7800_s6 }
 0xb49   :  { %3754 = vrot.lane.b32.xlu1 %v3290_v52, %s7801_s11 }
 0xb4d   :  { %3760 = vrot.lane.b32.xlu1 %v3290_v52, %s7799_s29 }
 0xb51   :  { %4994 = vrot.lane.b32.xlu1 %v8637_v63, %s7800_s6 }
 0xb55   :  { %5000 = vrot.lane.b32.xlu1 %v8637_v63, %s7801_s11 }
 0xb56   :  { %3748 = vrot.lane.b32.xlu0 %v3290_v52, %s7800_s6 }
 0xb59   :  { %5002 = vrot.lane.b32.xlu1 %v8645_v0, %s7801_s11 }
 0xb5a   :  { %3756 = vrot.lane.b32.xlu0 %v8630_v59, %s7801_s11 }
 0xb5d   :  { %5008 = vrot.lane.b32.xlu1 %v8645_v0, %s7799_s29 }
 0xb5e   :  { %3762 = vrot.lane.b32.xlu0 %v8630_v59, %s7799_s29 }
 0xb62   :  { %4996 = vrot.lane.b32.xlu0 %v8645_v0, %s7800_s6 }
 0xb66   :  { %5006 = vrot.lane.b32.xlu0 %v8637_v63, %s7799_s29 }
 0xb6a   :  { %4847 = vrot.lane.b32.xlu0 %v8488_v46, %s7800_s6 }
 0xbc1   :  { %v4364_v53 = vpop.xlane.xlu1 %4363  ;;  %v4361_v43 = vpop.xlane.xlu0 %4360 }
 0xbc2   :  { %v4372_v44 = vsub.f32 %v4355_v33, %v4364_v53  ;;  %v4371_v20 = vsub.f32 %v4354_v51, %v4361_v43 }
 0xbc4   :  { %v4375_v54 = vmul.f32 1.442695, %v4371_v20  ;;  %v4377_v61 = vmul.f32 1.442695, %v4372_v44 }
 0xbc5   :  { %v3751_v47 = vpop.permute.xlu1 %3750 }
 0xbc6   :  { %7733 = vpow2.f32 %v4375_v54 }
 0xbc7   :  { %7735 = vpow2.f32 %v4377_v61 }
 0xbc9   :  { %v4367_v50 = vpop.xlane.xlu0 %4366  ;;  %v3755_v56 = vpop.permute.xlu1 %3754 }
 0xbca   :  { %v4373_v55 = vsub.f32 %v4356_v36, %v4367_v50  ;;  %v3766_v6 = vcombine.low %v3290_v52, %v3755_v56  ;;  %v3767_v9 = vcombine.high %v3290_v52, %v3755_v56 }
 0xbcc   :  { %v4379_v57 = vmul.f32 1.442695, %v4373_v55  ;;  %v3774_v24 = vrot.slane %v3766_v6, %v8020_v41  ;;  %v3781_v25 = vrot.slane %v3767_v9, %v8020_v41 }
 0xbcd   :  { %v4370_v58 = vpop.xlane.xlu0 %4369  ;;  %v3761_v7 = vpop.permute.xlu1 %3760 }
 0xbce   :  { %v4374_v1 = vsub.f32 %v4357_v39, %v4370_v58  ;;  %7737 = vpow2.f32 %v4379_v57 }
 0xbd0   :  { %v4381_v4 = vmul.f32 1.442695, %v4374_v1  ;;  %v8661_v5 = vpop.eup %7733 }
 0xbd1   :  { %v3749_v8 = vpop.permute.xlu0 %3748  ;;  %v4383_v14 = vsel %vm4358_vm8, %v8661_v5, 0.0  ;;  %v8665_v16 = vpop.eup %7735 }
 0xbd2   :  { %v3782_v10 = vcombine.low %v3749_v8, %v3761_v7  ;;  %v3783_v13 = vcombine.high %v3749_v8, %v3761_v7  ;;  %7739 = vpow2.f32 %v4381_v4  ;;  %4384 = vadd.xlane.f32.xlu1 %v4383_v14  ;;  %v4386_v27 = vsel %vm4358_vm8, %v8665_v16, 0.0 }
 0xbd4   :  { %v3790_v19 = vrot.slane %v3782_v10, %v8020_v41  ;;  %v3797_v21 = vrot.slane %v3783_v13, %v8020_v41 }
 0xbd5   :  { %v3757_v23 = vpop.permute.xlu0 %3756 }
 0xbd6   :  { %4387 = vadd.xlane.f32.xlu1 %v4386_v27  ;;  %v3798_v11 = vcombine.low %v3774_v24, %v3790_v19  ;;  %v3799_v12 = vcombine.high %v3774_v24, %v3790_v19  ;;  %v3814_v15 = vcombine.low %v3781_v25, %v3797_v21  ;;  %v3815_v26 = vcombine.high %v3781_v25, %v3797_v21 }
 0xbd7   :  { %v3834_v29 = vcombine.low %v8630_v59, %v3757_v23  ;;  %v3835_v32 = vcombine.high %v8630_v59, %v3757_v23 }
 0xbd8   :  { %v8675_v51 = vpop.eup %7737  ;;  %v3806_v17 = vrot.slane %v3798_v11, %v8022_v48  ;;  %v3813_v18 = vrot.slane %v3799_v12, %v8022_v48  ;;  %v3822_v2 = vrot.slane %v3814_v15, %v8022_v48  ;;  %v3829_v22 = vrot.slane %v3815_v26, %v8022_v48 }
 0xbd9   :  { %v3763_v60 = vpop.permute.xlu0 %3762  ;;  %v3842_v36 = vrot.slane %v3834_v29, %v8020_v41  ;;  %v3849_v37 = vrot.slane %v3835_v32, %v8020_v41  ;;  %v4389_v62 = vsel %vm4358_vm8, %v8675_v51, 0.0 }
 0xbda   :  { %v3850_v33 = vcombine.low %v3751_v47, %v3763_v60  ;;  %v3851_v34 = vcombine.high %v3751_v47, %v3763_v60  ;;  %4390 = vadd.xlane.f32.xlu0 %v4389_v62  ;;  %v3902_v43 = vcombine.low %v3806_v17, %v3813_v18  ;;  %v6831_v44 = vcombine.high %v3806_v17, %v3813_v18 }
 0xbdb   :  { %v3918_v54 = vcombine.low %v3822_v2, %v3829_v22  ;;  %v6832_v61 = vcombine.high %v3822_v2, %v3829_v22 }
 0xbdc   :  { %v8681_v35 = vpop.eup %7739  ;;  %v3858_v38 = vrot.slane %v3850_v33, %v8020_v41  ;;  %v3865_v39 = vrot.slane %v3851_v34, %v8020_v41  ;;  %v3909_v1 = vrot.slane %v3902_v43, %v8020_v41  ;;  %v3917_v4 = vrot.slane %v6831_v44, %v8020_v41  ;;  %v4995_v44 = vpop.permute.xlu1 %4994 }
 0xbdd   :  { %v4392_v20 = vsel %vm4358_vm8, %v8681_v35, 0.0  ;;  %v3925_v6 = vrot.slane %v3918_v54, %v8020_v41  ;;  %v3933_v7 = vrot.slane %v6832_v61, %v8020_v41  ;;  %v4997_v54 = vpop.permute.xlu0 %4996 }
 0xbde   :  { %v3866_v40 = vcombine.low %v3842_v36, %v3858_v38  ;;  %v3867_v59 = vcombine.high %v3842_v36, %v3858_v38  ;;  %v3882_v52 = vcombine.low %v3849_v37, %v3865_v39  ;;  %v3883_v53 = vcombine.high %v3849_v37, %v3865_v39  ;;  %4393 = vadd.xlane.f32.xlu0 %v4392_v20 }
 0xbdf   :  { %v3934_v14 = vcombine.low %v3909_v1, %v3917_v4  ;;  %v3950_v19 = vcombine.low %v3925_v6, %v3933_v7  ;;  %v3935_v15 = vcombine.high %v3909_v1, %v3917_v4  ;;  %v3951_v26 = vcombine.high %v3925_v6, %v3933_v7 }
 0xbe0   :  { %v3874_v47 = vrot.slane %v3866_v40, %v8022_v48  ;;  %v3881_v50 = vrot.slane %v3867_v59, %v8022_v48  ;;  %v3890_v55 = vrot.slane %v3882_v52, %v8022_v48  ;;  %v3897_v56 = vrot.slane %v3883_v53, %v8022_v48  ;;  %v5001_v20 = vpop.permute.xlu1 %5000 }
 0xbe1   :  { %v3942_v25 = vrot.slane %v3934_v14, %v8022_v48  ;;  %v3958_v27 = vrot.slane %v3950_v19, %v8022_v48  ;;  %v3949_v60 = vrot.slane %v3935_v15, %v8022_v48  ;;  %v3965_v33 = vrot.slane %v3951_v26, %v8022_v48 }
 0xbe2   :  { %v3970_v57 = vcombine.low %v3874_v47, %v3881_v50  ;;  %v6833_v58 = vcombine.high %v3874_v47, %v3881_v50  ;;  %v3986_v10 = vcombine.low %v3890_v55, %v3897_v56  ;;  %v6834_v13 = vcombine.high %v3890_v55, %v3897_v56  ;;  %v5007_v47 = vpop.permute.xlu0 %5006 }
 0xbe3   :  { %v3966_v34 = vcombine.low %v3942_v25, %v3958_v27  ;;  %v3967_v37 = vcombine.high %v3942_v25, %v3958_v27  ;;  %v3968_v39 = vcombine.low %v3949_v60, %v3965_v33  ;;  %v3969_v59 = vcombine.high %v3949_v60, %v3965_v33 }
 0xbe4   :  { %v3977_v8 = vrot.slane %v3970_v57, %v8020_v41  ;;  %v3985_v9 = vrot.slane %v6833_v58, %v8020_v41  ;;  %v3993_v21 = vrot.slane %v3986_v10, %v8020_v41  ;;  %v4001_v23 = vrot.slane %v6834_v13, %v8020_v41  ;;  %v5003_v61 = vpop.permute.xlu1 %5002 }
 0xbe5   :  { %v5028_v55 = vcombine.low %v4995_v44, %v5007_v47  ;;  %v5029_v56 = vcombine.high %v4995_v44, %v5007_v47  ;;  %v5012_v57 = vcombine.low %v8637_v63, %v5001_v20  ;;  %v5013_v58 = vcombine.high %v8637_v63, %v5001_v20 }
 0xbe6   :  { %v4002_v24 = vcombine.low %v3977_v8, %v3985_v9  ;;  %v4018_v12 = vcombine.low %v3993_v21, %v4001_v23  ;;  %v4003_v32 = vcombine.high %v3977_v8, %v3985_v9  ;;  %v4019_v2 = vcombine.high %v3993_v21, %v4001_v23  ;;  %v4848_v47 = vpop.permute.xlu0 %4847 }
 0xbe7   :  { %4850 = vrot.lane.b32.xlu1 %v8488_v46, %s7801_s11  ;;  %v5080_v6 = vcombine.low %v8645_v0, %v5003_v61  ;;  %v5081_v7 = vcombine.high %v8645_v0, %v5003_v61  ;;  %v5036_v8 = vrot.slane %v5028_v55, %v8020_v41  ;;  %v5043_v9 = vrot.slane %v5029_v56, %v8020_v41 }
 0xbe8   :  { %v4010_v11 = vrot.slane %v4002_v24, %v8022_v48  ;;  %v4026_v29 = vrot.slane %v4018_v12, %v8022_v48  ;;  %v4017_v18 = vrot.slane %v4003_v32, %v8022_v48  ;;  %v4033_v36 = vrot.slane %v4019_v2, %v8022_v48  ;;  %v5009_v50 = vpop.permute.xlu1 %5008 }
 0xbe9   :  { %v5096_v1 = vcombine.low %v4997_v54, %v5009_v50  ;;  %v5097_v4 = vcombine.high %v4997_v54, %v5009_v50  ;;  %v5020_v10 = vrot.slane %v5012_v57, %v8020_v41  ;;  %v5027_v13 = vrot.slane %v5013_v58, %v8020_v41 }
 0xbea   :  { %v4034_v17 = vcombine.low %v4010_v11, %v4026_v29  ;;  %v4035_v38 = vcombine.high %v4010_v11, %v4026_v29  ;;  %v4036_v62 = vcombine.low %v4017_v18, %v4033_v36  ;;  %v4037_v52 = vcombine.high %v4017_v18, %v4033_v36 }
 0xbeb   :  { %v5104_v14 = vrot.slane %v5096_v1, %v8020_v41  ;;  %v5111_v19 = vrot.slane %v5097_v4, %v8020_v41  ;;  %v5088_v63 = vrot.slane %v5080_v6, %v8020_v41  ;;  %v5095_v21 = vrot.slane %v5081_v7, %v8020_v41 }
 0xbec   :  { %v7545_v22 = vpack.c.bf16 %v4034_v17, %v3966_v34  ;;  %v8713_v40 = vpack.c.bf16 %v4035_v38, %v3967_v37  ;;  %v7551_v53 = vpack.c.bf16 %v4036_v62, %v3968_v39  ;;  %v8716_v43 = vpack.c.bf16 %v4037_v52, %v3969_v59 }
 0xbed   :  { %v5044_v23 = vcombine.low %v5020_v10, %v5036_v8  ;;  %v5045_v24 = vcombine.high %v5020_v10, %v5036_v8  ;;  %v5060_v25 = vcombine.low %v5027_v13, %v5043_v9  ;;  %v5061_v0 = vcombine.high %v5027_v13, %v5043_v9 }
 0xbee   :  { %7546 = vmatpush3.bf16.msra.mxu1 %v7545_v22  ;;  %7552 = vmatpush3.bf16.msra.mxu0 %v7551_v53  ;;  %v5112_v27 = vcombine.low %v5088_v63, %v5104_v14  ;;  %v5113_v11 = vcombine.high %v5088_v63, %v5104_v14  ;;  %v5128_v12 = vcombine.low %v5095_v21, %v5111_v19 }
 0xbef   :  { %7547 = vmatprep.subr.bf16.mxu1 %v7806_v45  ;;  %7556 = vmatprep.subr.bf16.mxu0 %v7806_v45  ;;  %v5129_v15 = vcombine.high %v5095_v21, %v5111_v19  ;;  %v5052_v26 = vrot.slane %v5044_v23, %v8022_v48  ;;  %v5059_v29 = vrot.slane %v5045_v24, %v8022_v48 }
 0xbf0   :  { %v5068_v32 = vrot.slane %v5060_v25, %v8022_v48  ;;  %v5075_v60 = vrot.slane %v5061_v0, %v8022_v48  ;;  %v5120_v34 = vrot.slane %v5112_v27, %v8022_v48  ;;  %v5127_v17 = vrot.slane %v5113_v11, %v8022_v48 }
 0xbf1   :  { %v5136_v18 = vrot.slane %v5128_v12, %v8022_v48  ;;  %v5143_v2 = vrot.slane %v5129_v15, %v8022_v48  ;;  %v5148_v22 = vcombine.low %v5052_v26, %v5059_v29  ;;  %v6855_v36 = vcombine.high %v5052_v26, %v5059_v29 }
 0xbf2   :  { %v5164_v37 = vcombine.low %v5068_v32, %v5075_v60  ;;  %v6856_v38 = vcombine.high %v5068_v32, %v5075_v60  ;;  %v5216_v62 = vcombine.low %v5120_v34, %v5127_v17  ;;  %v6857_v59 = vcombine.high %v5120_v34, %v5127_v17 }
 0xbf3   :  { %v5232_v52 = vcombine.low %v5136_v18, %v5143_v2  ;;  %v6858_v53 = vcombine.high %v5136_v18, %v5143_v2  ;;  %v8742_v44 = vrot.slane %v5148_v22, %v8020_v41  ;;  %v8745_v20 = vrot.slane %v6855_v36, %v8020_v41 }
 0xbf4   :  { %4853 = vrot.lane.b32.xlu0 %v8488_v46, %s7799_s29  ;;  %v8748_v54 = vrot.slane %v5164_v37, %v8020_v41  ;;  %v8751_v61 = vrot.slane %v6856_v38, %v8020_v41  ;;  %v8754_v50 = vrot.slane %v5216_v62, %v8020_v41  ;;  %v8757_v55 = vrot.slane %v6857_v59, %v8020_v41 }
 0xbf5   :  { %v8760_v56 = vrot.slane %v5232_v52, %v8020_v41  ;;  %v8763_v57 = vrot.slane %v6858_v53, %v8020_v41  ;;  %v5180_v1 = vcombine.low %v8742_v44, %v8745_v20  ;;  %v5181_v22 = vcombine.high %v8742_v44, %v8745_v20 }
 0xbf6   :  { %v5196_v4 = vcombine.low %v8748_v54, %v8751_v61  ;;  %v5248_v8 = vcombine.low %v8754_v50, %v8757_v55  ;;  %v5249_v2 = vcombine.high %v8754_v50, %v8757_v55  ;;  %v5197_v36 = vcombine.high %v8748_v54, %v8751_v61 }
 0xbf7   :  { %v5264_v9 = vcombine.low %v8760_v56, %v8763_v57  ;;  %v5188_v13 = vrot.slane %v5180_v1, %v8022_v48  ;;  %v5265_v52 = vcombine.high %v8760_v56, %v8763_v57  ;;  %v5195_v50 = vrot.slane %v5181_v22, %v8022_v48 }
 0xbf8   :  { %v5256_v21 = vrot.slane %v5248_v8, %v8022_v48  ;;  %v5211_v55 = vrot.slane %v5197_v36, %v8022_v48  ;;  %v5263_v1 = vrot.slane %v5249_v2, %v8022_v48 }
 0xbf9   :  { %v5272_v23 = vrot.slane %v5264_v9, %v8022_v48 }
 0xbfa   :  { %v5214_v8 = vcombine.low %v5195_v50, %v5211_v55  ;;  %v5215_v9 = vcombine.high %v5195_v50, %v5211_v55 }
 0xbfb   :  { %v5280_v11 = vcombine.low %v5256_v21, %v5272_v23  ;;  %v5281_v37 = vcombine.high %v5256_v21, %v5272_v23 }
 0xc5f   :  { %v4385_v33 = vpop.xlane.xlu1 %4384 }
 0xc60   :  { %7741 = vrcp.f32 %v4385_v33 }
 0xc63   :  { %v4388_v39 = vpop.xlane.xlu1 %4387 }
 0xc64   :  { %7743 = vrcp.f32 %v4388_v39 }
 0xc67   :  { %v4391_v7 = vpop.xlane.xlu0 %4390  ;;  %v4851_v19 = vpop.permute.xlu1 %4850 }
 0xc68   :  { %7745 = vrcp.f32 %v4391_v7  ;;  %v4857_v24 = vcombine.high %v8488_v46, %v4851_v19 }
 0xc6a   :  { %v7742_v58 = vpop.eup %7741  ;;  %v4871_v26 = vrot.slane %v4857_v24, %v8020_v41 }
 0xc6b   :  { %v4399_v6 = vmul.f32 %v7742_v58, %v8661_v5  ;;  %v5204_v5 = vrot.slane %v5196_v4, %v8022_v48  ;;  %v4394_v63 = vpop.xlane.xlu0 %4393  ;;  %v5279_v4 = vrot.slane %v5265_v52, %v8022_v48 }
 0xc6c   :  { %7747 = vrcp.f32 %v4394_v63 }
 0xc6d   :  { %7288 = vmatmul.mubr.msk.f32.vlgmr.msra.gmra.mrb[32].mxu1 %vm4358_vm8, %v4399_v6  ;;  %v5212_v25 = vcombine.low %v5188_v13, %v5204_v5  ;;  %v5213_v60 = vcombine.high %v5188_v13, %v5204_v5  ;;  %v5282_v5 = vcombine.low %v5263_v1, %v5279_v4 }
 0xc6e   :  { %v7744_v10 = vpop.eup %7743  ;;  %7549 = vmatpush3.bf16.msra.mxu1 %v8713_v40  ;;  %7294 = vmatprep.mubr.msk.f32.mxu1 %vm7803_vm1, %v7802_v30  ;;  %v4856_v40 = vcombine.low %v8488_v46, %v4851_v19 }
 0xc6f   :  { %v4400_v14 = vmul.f32 %v7744_v10, %v8665_v16  ;;  %7553 = vmatprep.subr.bf16.mxu1 %v7806_v45  ;;  %v4854_v16 = vpop.permute.xlu0 %4853  ;;  %v7557_v32 = vpack.c.bf16 %v5280_v11, %v5212_v25  ;;  %v7561_v44 = vpack.c.bf16 %v5281_v37, %v5213_v60 }
 0xc70   :  { %v4872_v0 = vcombine.low %v4848_v47, %v4854_v16  ;;  %v4873_v27 = vcombine.high %v4848_v47, %v4854_v16  ;;  %v4864_v15 = vrot.slane %v4856_v40, %v8020_v41  ;;  %v7565_v40 = vpack.c.bf16 %v5282_v5, %v5214_v8 }
 0xc71   :  { %7295 = vmatmul.mubr.msk.f32.vlgmr.msra.gmra.mrb[34].mxu1 %vm4358_vm8, %v4400_v14  ;;  %v5283_v14 = vcombine.high %v5263_v1, %v5279_v4 }
 0xc72   :  { %7555 = vmatpush3.bf16.msra.mxu1 %v8716_v43  ;;  %7308 = vmatprep.mubr.msk.f32.mxu1 %vm7803_vm1, %v7802_v30  ;;  %v7746_v12 = vpop.eup %7745  ;;  %v4880_v29 = vrot.slane %v4872_v0, %v8020_v41  ;;  %v4887_v46 = vrot.slane %v4873_v27, %v8020_v41 }
 0xc73   :  { %7560 = vmatprep.subr.bf16.mxu1 %v7806_v45  ;;  %v4401_v43 = vmul.f32 %v7746_v12, %v8675_v51  ;;  %v7569_v24 = vpack.c.bf16 %v5283_v14, %v5215_v9 }
 0xc74   :  { %v4888_v33 = vcombine.low %v4864_v15, %v4880_v29  ;;  %v4889_v34 = vcombine.high %v4864_v15, %v4880_v29  ;;  %v4904_v17 = vcombine.low %v4871_v26, %v4887_v46  ;;  %v4905_v18 = vcombine.high %v4871_v26, %v4887_v46 }
 0xc75   :  { %7302 = vmatmul.mubr.msk.f32.vlgmr.msra.gmra.mrb[26].mxu0 %vm4358_vm8, %v4401_v43 }
 0xc76   :  { %v7748_v38 = vpop.eup %7747  ;;  %v4896_v51 = vrot.slane %v4888_v33, %v8022_v48  ;;  %v4903_v39 = vrot.slane %v4889_v34, %v8022_v48  ;;  %v4912_v62 = vrot.slane %v4904_v17, %v8022_v48  ;;  %v4919_v59 = vrot.slane %v4905_v18, %v8022_v48  ;;  %7559 = vmatpush3.bf16.xpose.msk.msra.mxu0 %vm8575_vm7, %v7557_v32 }
 0xc77   :  { %v4402_v53 = vmul.f32 %v7748_v38, %v8681_v35  ;;  %7315 = vmatprep.mubr.msk.f32.mxu0 %vm7803_vm1, %v7802_v30  ;;  %7564 = vmatprep.subr.bf16.mxu0 %v7806_v45 }
 0xc78   :  { %v4924_v20 = vcombine.low %v4896_v51, %v4903_v39  ;;  %v6853_v54 = vcombine.high %v4896_v51, %v4903_v39  ;;  %v4940_v61 = vcombine.low %v4912_v62, %v4919_v59  ;;  %v6854_v47 = vcombine.high %v4912_v62, %v4919_v59 }
 0xc79   :  { %7309 = vmatmul.mubr.msk.f32.vlgmr.msra.gmra.mrb[36].mxu1 %vm4358_vm8, %v4402_v53 }
 0xc7a   :  { %v4931_v56 = vrot.slane %v4924_v20, %v8020_v41  ;;  %v4939_v35 = vrot.slane %v6853_v54, %v8020_v41  ;;  %v4947_v57 = vrot.slane %v4940_v61, %v8020_v41  ;;  %v4955_v58 = vrot.slane %v6854_v47, %v8020_v41  ;;  %7322 = vmatprep.mubr.msk.f32.mxu1 %vm7803_vm1, %v7802_v30 }
 0xc7b   :  { %7563 = vmatpush3.bf16.xpose.msk.msra.mxu1 %vm8575_vm7, %v7561_v44 }
 0xc7c   :  { %7568 = vmatprep.subr.bf16.mxu1 %v7806_v45  ;;  %v4956_v6 = vcombine.low %v4931_v56, %v4939_v35  ;;  %v4972_v7 = vcombine.low %v4947_v57, %v4955_v58  ;;  %v4957_v19 = vcombine.high %v4931_v56, %v4939_v35  ;;  %v4973_v63 = vcombine.high %v4947_v57, %v4955_v58 }
 0xc7e   :  { %v4964_v10 = vrot.slane %v4956_v6, %v8022_v48  ;;  %v4980_v13 = vrot.slane %v4972_v7, %v8022_v48  ;;  %v4971_v16 = vrot.slane %v4957_v19, %v8022_v48  ;;  %v4987_v25 = vrot.slane %v4973_v63, %v8022_v48 }
 0xc80   :  { %v4988_v21 = vcombine.low %v4964_v10, %v4980_v13  ;;  %v4989_v23 = vcombine.high %v4964_v10, %v4980_v13  ;;  %v4990_v0 = vcombine.low %v4971_v16, %v4987_v25  ;;  %v4991_v27 = vcombine.high %v4971_v16, %v4987_v25 }
 0xc82   :  { %7316 = vmatmul.mubr.msk.f32.vlgmr.msra.gmra.mrb[28].mxu0 %vm135_vm0, %v4988_v21  ;;  %7323 = vmatmul.mubr.msk.f32.vlgmr.msra.gmra.mrb[38].mxu1 %vm135_vm0, %v4989_v23 }
 0xc83   :  { %7567 = vmatpush3.bf16.xpose.msk.msra.mxu0 %vm8575_vm7, %v7565_v40  ;;  %7571 = vmatpush3.bf16.xpose.msk.msra.mxu1 %vm8575_vm7, %v7569_v24 }
 0xc84   :  { %7329 = vmatprep.mubr.msk.f32.mxu0 %vm7803_vm1, %v7802_v30  ;;  %7336 = vmatprep.mubr.msk.f32.mxu1 %vm7803_vm1, %v7802_v30 }
 0xc85   :  { %7572 = vmatprep.subr.bf16.mxu0 %v7806_v45  ;;  %7575 = vmatprep.subr.bf16.mxu1 %v7806_v45 }
 0xc8a   :  { %7330 = vmatmul.mubr.msk.f32.vlgmr.msra.gmra.mrb[30].mxu0 %vm135_vm0, %v4990_v0  ;;  %7337 = vmatmul.mubr.msk.f32.vlgmr.msra.gmra.mrb[40].mxu1 %vm135_vm0, %v4991_v27 }
 0xc8b   :  { %7343 = vmatprep.mubr.msk.f32.mxu0 %vm7803_vm1, %v7802_v30  ;;  %7350 = vmatprep.mubr.msk.f32.mxu1 %vm7803_vm1, %v7802_v30 }
 0xd40   :  { %v4472_v3 = vpop.f32.mrb[32].mxu1 }
 0xd41   :  { %v7289_v11 = vpop.f32.mrb[33].mxu1 }
 0xd44   :  { %v4545_v12 = vpop.f32.mrb[34].mxu1 }
 0xd45   :  { %v7296_v15 = vpop.f32.mrb[35].mxu1 }
 0xd48   :  { %v4618_v26 = vpop.f32.mrb[26].mxu0 }
 0xd49   :  { %v4695_v29 = vcombine.low %v4472_v3, %v4618_v26  ;;  %v4696_v46 = vcombine.high %v4472_v3, %v4618_v26  ;;  %v7303_v43 = vpop.f32.mrb[27].mxu0 }
 0xd4b   :  { %v4703_v17 = vrot.slane %v4695_v29, %v8020_v41  ;;  %v4710_v18 = vrot.slane %v4696_v46, %v8020_v41 }
 0xd4c   :  { %v4691_v32 = vpop.f32.mrb[36].mxu1 }
 0xd4d   :  { %v4711_v60 = vcombine.low %v4545_v12, %v4691_v32  ;;  %v4712_v33 = vcombine.high %v4545_v12, %v4691_v32  ;;  %v7310_v34 = vpop.f32.mrb[37].mxu1 }
 0xd4f   :  { %v4719_v2 = vrot.slane %v4711_v60, %v8020_v41  ;;  %v4726_v22 = vrot.slane %v4712_v33, %v8020_v41 }
 0xd51   :  { %v4727_v36 = vcombine.low %v4703_v17, %v4719_v2  ;;  %v4728_v37 = vcombine.high %v4703_v17, %v4719_v2  ;;  %v4743_v38 = vcombine.low %v4710_v18, %v4726_v22  ;;  %v4744_v51 = vcombine.high %v4710_v18, %v4726_v22 }
 0xd53   :  { %v4735_v39 = vrot.slane %v4727_v36, %v8022_v48  ;;  %v4742_v62 = vrot.slane %v4728_v37, %v8022_v48  ;;  %v4751_v59 = vrot.slane %v4743_v38, %v8022_v48  ;;  %v4758_v52 = vrot.slane %v4744_v51, %v8022_v48 }
 0xd55   :  { %v4763_v53 = vcombine.low %v4735_v39, %v4742_v62  ;;  %v6851_v44 = vcombine.high %v4735_v39, %v4742_v62  ;;  %v4779_v20 = vcombine.low %v4751_v59, %v4758_v52  ;;  %v6852_v54 = vcombine.high %v4751_v59, %v4758_v52  ;;  %v5651_v61 = vpop.f32.mrb[28].mxu0  ;;  %v5730_v47 = vpop.f32.mrb[38].mxu1 }
 0xd56   :  { %v5892_v50 = vmul.f32 0.17677669, %v5651_v61  ;;  %v5893_v55 = vmul.f32 0.17677669, %v5730_v47  ;;  %v7317_v56 = vpop.f32.mrb[29].mxu0  ;;  %v7324_v35 = vpop.f32.mrb[39].mxu1 }
 0xd57   :  { %v4770_v57 = vrot.slane %v4763_v53, %v8020_v41  ;;  %v4778_v58 = vrot.slane %v6851_v44, %v8020_v41  ;;  %v4786_v1 = vrot.slane %v4779_v20, %v8020_v41  ;;  %v4794_v4 = vrot.slane %v6852_v54, %v8020_v41 }
 0xd58   :  { %v5896_v6 = vsel %vm4358_vm8, %v5892_v50, -inf  ;;  %v5899_v7 = vsel %vm4358_vm8, %v5893_v55, -inf }
 0xd59   :  { %5897 = vmax.xlane.f32.xlu1 %v5896_v6  ;;  %5900 = vmax.xlane.f32.xlu0 %v5899_v7  ;;  %v4796_v8 = vcombine.high %v4770_v57, %v4778_v58  ;;  %v4812_v9 = vcombine.high %v4786_v1, %v4794_v4  ;;  %v4795_v10 = vcombine.low %v4770_v57, %v4778_v58 }
 0xd5a   :  { %v4811_v13 = vcombine.low %v4786_v1, %v4794_v4 }
 0xd5b   :  { %v8866_v5 = vrot.slane %v4796_v8, %v8022_v48  ;;  %v8869_v14 = vrot.slane %v4812_v9, %v8022_v48  ;;  %v8872_v19 = vrot.slane %v4795_v10, %v8022_v48 }
 0xd5c   :  { %v8875_v63 = vrot.slane %v4811_v13, %v8022_v48 }
 0xd5d   :  { %v5809_v21 = vpop.f32.mrb[30].mxu0  ;;  %v5888_v23 = vpop.f32.mrb[40].mxu1  ;;  %v4829_v40 = vcombine.low %v8866_v5, %v8869_v14  ;;  %v4830_v24 = vcombine.high %v8866_v5, %v8869_v14 }
 0xd5e   :  { %v5894_v16 = vmul.f32 0.17677669, %v5809_v21  ;;  %v5895_v25 = vmul.f32 0.17677669, %v5888_v23  ;;  %v7331_v0 = vpop.f32.mrb[31].mxu0  ;;  %v7338_v27 = vpop.f32.mrb[41].mxu1  ;;  %v4827_v3 = vcombine.low %v8872_v19, %v8875_v63  ;;  %v4828_v11 = vcombine.high %v8872_v19, %v8875_v63 }
 0xd60   :  { %v5902_v12 = vsel %vm4358_vm8, %v5894_v16, -inf  ;;  %v5905_v15 = vsel %vm4358_vm8, %v5895_v25, -inf }
 0xd61   :  { %5903 = vmax.xlane.f32.xlu0 %v5902_v12  ;;  %5906 = vmax.xlane.f32.xlu1 %v5905_v15 }
 0xd72   :  { %5288 = vrot.lane.b32.xlu1 %v8622_v28, %s7800_s6 }
 0xd76   :  { %5292 = vrot.lane.b32.xlu1 %v8624_v31, %s7801_s11 }
 0xd77   :  { %5286 = vrot.lane.b32.xlu0 %v8624_v31, %s7800_s6 }
 0xd7a   :  { %5298 = vrot.lane.b32.xlu1 %v8624_v31, %s7799_s29 }
 0xd7b   :  { %5294 = vrot.lane.b32.xlu0 %v8622_v28, %s7801_s11 }
 0xd7f   :  { %5300 = vrot.lane.b32.xlu0 %v8622_v28, %s7799_s29 }
 0xde6   :  { %v5898_v26 = vpop.xlane.xlu1 %5897  ;;  %v5901_v29 = vpop.xlane.xlu0 %5900 }
 0xde7   :  { %v5908_v46 = vsub.f32 %v5892_v50, %v5898_v26  ;;  %v5909_v43 = vsub.f32 %v5893_v55, %v5901_v29 }
 0xde9   :  { %v5912_v32 = vmul.f32 1.442695, %v5908_v46  ;;  %v5914_v60 = vmul.f32 1.442695, %v5909_v43 }
 0xdeb   :  { %7749 = vpow2.f32 %v5912_v32 }
 0xdec   :  { %7751 = vpow2.f32 %v5914_v60 }
 0xdee   :  { %v5904_v33 = vpop.xlane.xlu0 %5903  ;;  %v5907_v34 = vpop.xlane.xlu1 %5906 }
 0xdef   :  { %v5910_v17 = vsub.f32 %v5894_v16, %v5904_v33  ;;  %v5911_v2 = vsub.f32 %v5895_v25, %v5907_v34 }
 0xdf1   :  { %v5916_v18 = vmul.f32 1.442695, %v5910_v17  ;;  %v5918_v51 = vmul.f32 1.442695, %v5911_v2 }
 0xdf2   :  { %v5287_v22 = vpop.permute.xlu0 %5286  ;;  %v5289_v36 = vpop.permute.xlu1 %5288 }
 0xdf3   :  { %7753 = vpow2.f32 %v5916_v18 }
 0xdf4   :  { %7755 = vpow2.f32 %v5918_v51 }
 0xdf5   :  { %v8899_v37 = vpop.eup %7749 }
 0xdf6   :  { %v8901_v38 = vpop.eup %7751  ;;  %v5295_v39 = vpop.permute.xlu0 %5294  ;;  %v5920_v59 = vsel %vm4358_vm8, %v8899_v37, 0.0 }
 0xdf7   :  { %v5293_v62 = vpop.permute.xlu1 %5292  ;;  %5921 = vadd.xlane.f32.xlu0 %v5920_v59  ;;  %v5372_v52 = vcombine.low %v8622_v28, %v5295_v39  ;;  %v5373_v53 = vcombine.high %v8622_v28, %v5295_v39  ;;  %v5923_v44 = vsel %vm4358_vm8, %v8901_v38, 0.0 }
 0xdf8   :  { %5924 = vadd.xlane.f32.xlu1 %v5923_v44  ;;  %v5304_v20 = vcombine.low %v8624_v31, %v5293_v62  ;;  %v5305_v54 = vcombine.high %v8624_v31, %v5293_v62 }
 0xdf9   :  { %v5380_v57 = vrot.slane %v5372_v52, %v8020_v41  ;;  %v5387_v58 = vrot.slane %v5373_v53, %v8020_v41 }
 0xdfa   :  { %v5301_v61 = vpop.permute.xlu0 %5300  ;;  %v5312_v7 = vrot.slane %v5304_v20, %v8020_v41  ;;  %v5319_v8 = vrot.slane %v5305_v54, %v8020_v41 }
 0xdfb   :  { %v5299_v47 = vpop.permute.xlu1 %5298  ;;  %v5388_v50 = vcombine.low %v5289_v36, %v5301_v61  ;;  %v5389_v55 = vcombine.high %v5289_v36, %v5301_v61 }
 0xdfc   :  { %v5320_v56 = vcombine.low %v5287_v22, %v5299_v47  ;;  %v5321_v35 = vcombine.high %v5287_v22, %v5299_v47 }
 0xdfd   :  { %v8913_v28 = vpop.eup %7753  ;;  %v5396_v1 = vrot.slane %v5388_v50, %v8020_v41  ;;  %v5403_v4 = vrot.slane %v5389_v55, %v8020_v41 }
 0xdfe   :  { %v5328_v6 = vrot.slane %v5320_v56, %v8020_v41  ;;  %v5335_v31 = vrot.slane %v5321_v35, %v8020_v41  ;;  %v5926_v9 = vsel %vm4358_vm8, %v8913_v28, 0.0  ;;  %v8931_v2 = vpop.eup %7755 }
 0xdff   :  { %v5404_v10 = vcombine.low %v5380_v57, %v5396_v1  ;;  %v5405_v13 = vcombine.high %v5380_v57, %v5396_v1  ;;  %v5420_v21 = vcombine.low %v5387_v58, %v5403_v4  ;;  %v5421_v23 = vcombine.high %v5387_v58, %v5403_v4  ;;  %5927 = vadd.xlane.f32.xlu1 %v5926_v9 }
 0xe00   :  { %v5336_v16 = vcombine.low %v5312_v7, %v5328_v6  ;;  %v5337_v25 = vcombine.high %v5312_v7, %v5328_v6  ;;  %v5352_v0 = vcombine.low %v5319_v8, %v5335_v31  ;;  %v5353_v27 = vcombine.high %v5319_v8, %v5335_v31 }
 0xe01   :  { %v5412_v12 = vrot.slane %v5404_v10, %v8022_v48  ;;  %v5419_v15 = vrot.slane %v5405_v13, %v8022_v48  ;;  %v5428_v26 = vrot.slane %v5420_v21, %v8022_v48  ;;  %v5435_v29 = vrot.slane %v5421_v23, %v8022_v48 }
 0xe02   :  { %v5344_v46 = vrot.slane %v5336_v16, %v8022_v48  ;;  %v5351_v43 = vrot.slane %v5337_v25, %v8022_v48  ;;  %v5360_v32 = vrot.slane %v5352_v0, %v8022_v48  ;;  %v5367_v60 = vrot.slane %v5353_v27, %v8022_v48 }
 0xe03   :  { %v5508_v33 = vcombine.low %v5412_v12, %v5419_v15  ;;  %v6861_v34 = vcombine.high %v5412_v12, %v5419_v15  ;;  %v5524_v17 = vcombine.low %v5428_v26, %v5435_v29  ;;  %v6862_v18 = vcombine.high %v5428_v26, %v5435_v29 }
 0xe04   :  { %v5440_v22 = vcombine.low %v5344_v46, %v5351_v43  ;;  %v6859_v36 = vcombine.high %v5344_v46, %v5351_v43  ;;  %v5456_v51 = vcombine.low %v5360_v32, %v5367_v60  ;;  %v6860_v39 = vcombine.high %v5360_v32, %v5367_v60 }
 0xe05   :  { %v5515_v62 = vrot.slane %v5508_v33, %v8020_v41  ;;  %v5523_v59 = vrot.slane %v6861_v34, %v8020_v41  ;;  %v5531_v52 = vrot.slane %v5524_v17, %v8020_v41  ;;  %v5539_v53 = vrot.slane %v6862_v18, %v8020_v41 }
 0xe06   :  { %v5447_v44 = vrot.slane %v5440_v22, %v8020_v41  ;;  %v5455_v20 = vrot.slane %v6859_v36, %v8020_v41  ;;  %v5463_v54 = vrot.slane %v5456_v51, %v8020_v41  ;;  %v5471_v61 = vrot.slane %v6860_v39, %v8020_v41 }
 0xe07   :  { %v5929_v47 = vsel %vm4358_vm8, %v8931_v2, 0.0  ;;  %v5540_v50 = vcombine.low %v5515_v62, %v5523_v59  ;;  %v5556_v55 = vcombine.low %v5531_v52, %v5539_v53  ;;  %v5541_v56 = vcombine.high %v5515_v62, %v5523_v59  ;;  %v3008_v62 = vld [vmem:[%s9170_s19] sm:$0xff]  ;;  %v3009_v59 = vld [vmem:[%s9170_s19 + $0x8] sm:$0xff] }
 0xe08   :  { %5930 = vadd.xlane.f32.xlu0 %v5929_v47  ;;  %v5472_v35 = vcombine.low %v5447_v44, %v5455_v20  ;;  %v5488_v57 = vcombine.low %v5463_v54, %v5471_v61  ;;  %v5473_v58 = vcombine.high %v5447_v44, %v5455_v20  ;;  %v5489_v1 = vcombine.high %v5463_v54, %v5471_v61  ;;  %v3013_v44 = vld [vmem:[%s9170_s19 + $0x28] sm:$0xff]  ;;  %v3014_v54 = vld [vmem:[%s9170_s19 + $0x30] sm:$0xff]  ;;  %v3015_v61 = vld [vmem:[%s9170_s19 + $0x38] sm:$0xff] }
 0xe09   :  { %v5548_v4 = vrot.slane %v5540_v50, %v8022_v48  ;;  %v5564_v6 = vrot.slane %v5556_v55, %v8022_v48  ;;  %v5555_v31 = vrot.slane %v5541_v56, %v8022_v48  ;;  %v5557_v7 = vcombine.high %v5531_v52, %v5539_v53  ;;  %v3011_v52 = vld [vmem:[%s9170_s19 + $0x18] sm:$0xff]  ;;  %v3012_v53 = vld [vmem:[%s9170_s19 + $0x20] sm:$0xff]  ;;  %v3017_v55 = vld [vmem:[%s9170_s19 + $0x48] sm:$0xff] }
 0xe0a   :  { %v5480_v8 = vrot.slane %v5472_v35, %v8022_v48  ;;  %v5496_v9 = vrot.slane %v5488_v57, %v8022_v48  ;;  %v5487_v10 = vrot.slane %v5473_v58, %v8022_v48  ;;  %v5503_v13 = vrot.slane %v5489_v1, %v8022_v48  ;;  %v3016_v50 = vld [vmem:[%s9170_s19 + $0x40] sm:$0xff]  ;;  %v3018_v35 = vld [vmem:[%s9170_s19 + $0x50] sm:$0xff]  ;;  %v3019_v57 = vld [vmem:[%s9170_s19 + $0x58] sm:$0xff] }
 0xe0b   :  { %v5572_v21 = vcombine.low %v5548_v4, %v5564_v6  ;;  %v5573_v23 = vcombine.high %v5548_v4, %v5564_v6  ;;  %v5571_v16 = vrot.slane %v5557_v7, %v8022_v48  ;;  %v7592_v20 = vpack.c.bf16 %v3013_v44, %v3012_v53 }
 0xe0c   :  { %v5504_v25 = vcombine.low %v5480_v8, %v5496_v9  ;;  %v5505_v0 = vcombine.high %v5480_v8, %v5496_v9  ;;  %v5506_v27 = vcombine.low %v5487_v10, %v5503_v13  ;;  %v5507_v12 = vcombine.high %v5487_v10, %v5503_v13 }
 0xe0d   :  { %v5574_v15 = vcombine.low %v5555_v31, %v5571_v16  ;;  %v5575_v26 = vcombine.high %v5555_v31, %v5571_v16  ;;  %v7596_v47 = vpack.c.bf16 %v3015_v61, %v3014_v54  ;;  %v7600_v56 = vpack.c.bf16 %v3017_v55, %v3016_v50 }
 0xe0e   :  { %v7573_v29 = vpack.c.bf16 %v5572_v21, %v5504_v25  ;;  %v7576_v46 = vpack.c.bf16 %v5573_v23, %v5505_v0  ;;  %v7604_v58 = vpack.c.bf16 %v3019_v57, %v3018_v35 }
 0xe0f   :  { %v7579_v43 = vpack.c.bf16 %v5574_v15, %v5506_v27  ;;  %v7582_v32 = vpack.c.bf16 %v5575_v26, %v5507_v12 }
 0xe10   :  { %7574 = vmatpush3.bf16.msra.mxu0 %v7573_v29  ;;  %7577 = vmatpush3.bf16.msra.mxu1 %v7576_v46 }
 0xe11   :  { %7578 = vmatprep.subr.bf16.mxu0 %v7806_v45  ;;  %7581 = vmatprep.subr.bf16.mxu1 %v7806_v45 }
 0xe84   :  { %v5922_v60 = vpop.xlane.xlu0 %5921 }
 0xe85   :  { %7757 = vrcp.f32 %v5922_v60  ;;  %v5925_v33 = vpop.xlane.xlu1 %5924 }
 0xe86   :  { %7759 = vrcp.f32 %v5925_v33 }
 0xe8c   :  { %v5928_v34 = vpop.xlane.xlu1 %5927 }
 0xe8d   :  { %7761 = vrcp.f32 %v5928_v34 }
 0xe8f   :  { %v7758_v17 = vpop.eup %7757 }
 0xe90   :  { %v5936_v18 = vmul.f32 %v7758_v17, %v8899_v37  ;;  %v7760_v22 = vpop.eup %7759 }
 0xe91   :  { %v5937_v36 = vmul.f32 %v7760_v22, %v8901_v38 }
 0xe92   :  { %7344 = vmatmul.mubr.msk.f32.vlgmr.msra.gmra.mrb[32].mxu0 %vm4358_vm8, %v5936_v18 }
 0xe93   :  { %7580 = vmatpush3.bf16.msra.mxu0 %v7579_v43  ;;  %7357 = vmatprep.mubr.msk.f32.mxu0 %vm7803_vm1, %v7802_v30 }
 0xe94   :  { %7351 = vmatmul.mubr.msk.f32.vlgmr.msra.gmra.mrb[42].mxu1 %vm4358_vm8, %v5937_v36  ;;  %v3020_v36 = vld [vmem:[%s9170_s19 + $0x60] sm:$0xff] }
 0xe95   :  { %v5931_v45 = vpop.xlane.xlu0 %5930  ;;  %7583 = vmatpush3.bf16.msra.mxu1 %v7582_v32  ;;  %7364 = vmatprep.mubr.msk.f32.mxu1 %vm7803_vm1, %v7802_v30  ;;  %v3010_v30 = vld [vmem:[%s9170_s19 + $0x10] sm:$0xff] }
 0xe96   :  { %7763 = vrcp.f32 %v5931_v45  ;;  %v3021_v45 = vld [vmem:[%s9170_s19 + $0x68] sm:$0xff] }
 0xe97   :  { %v7762_v51 = vpop.eup %7761 }
 0xe98   :  { %v5938_v37 = vmul.f32 %v7762_v51, %v8913_v28  ;;  %v7584_v28 = vpack.c.bf16 %v3009_v59, %v3008_v62  ;;  %v7608_v62 = vpack.c.bf16 %v3021_v45, %v3020_v36  ;;  %v3022_v59 = vld [vmem:[%s9170_s19 + $0x70] sm:$0xff] }
 0xe9a   :  { %7358 = vmatmul.mubr.msk.f32.vlgmr.msra.gmra.mrb[34].mxu0 %vm4358_vm8, %v5938_v37  ;;  %7585 = vmatprep.subr.bf16.mxu0 %v7584_v28 }
 0xe9b   :  { %7587 = vmatpush3.bf16.msra.mxu0 %v7584_v28 }
 0xea0   :  { %v7764_v38 = vpop.eup %7763 }
 0xea1   :  { %v5939_v39 = vmul.f32 %v7764_v38, %v8931_v2  ;;  %v7588_v2 = vpack.c.bf16 %v3011_v52, %v3010_v30  ;;  %v3023_v30 = vld [vmem:[%s9170_s19 + $0x78] sm:$0xff] }
 0xea2   :  { %v7612_v44 = vpack.c.bf16 %v3023_v30, %v3022_v59 }
 0xea3   :  { %7365 = vmatmul.mubr.msk.f32.vlgmr.msra.gmra.mrb[44].mxu1 %vm4358_vm8, %v5939_v39  ;;  %7589 = vmatprep.subr.bf16.mxu0 %v7588_v2 }
 0xea4   :  { %7591 = vmatpush3.bf16.msra.mxu0 %v7588_v2 }
 0xea5   :  { %7593 = vmatprep.subr.bf16.mxu0 %v7592_v20 }
 0xea8   :  { %7595 = vmatpush3.bf16.msra.mxu0 %v7592_v20 }
 0xea9   :  { %7597 = vmatprep.subr.bf16.mxu0 %v7596_v47 }
 0xeac   :  { %7599 = vmatpush3.bf16.msra.mxu0 %v7596_v47 }
 0xead   :  { %7601 = vmatprep.subr.bf16.mxu0 %v7600_v56 }
 0xeb0   :  { %7603 = vmatpush3.bf16.msra.mxu0 %v7600_v56 }
 0xeb1   :  { %7605 = vmatprep.subr.bf16.mxu0 %v7604_v58 }
 0xeb4   :  { %7607 = vmatpush3.bf16.msra.mxu0 %v7604_v58 }
 0xeb5   :  { %7609 = vmatprep.subr.bf16.mxu0 %v7608_v62 }
 0xeb8   :  { %7611 = vmatpush3.bf16.msra.mxu0 %v7608_v62 }
 0xeb9   :  { %7613 = vmatprep.subr.bf16.mxu0 %v7612_v44 }
 0xebc   :  { %7615 = vmatpush3.bf16.msra.mxu0 %v7612_v44 }
 0xf65   :  { %v6009_v1 = vpop.f32.mrb[32].mxu0 }
 0xf66   :  { %v7345_v4 = vpop.f32.mrb[33].mxu0 }
 0xf67   :  { %v6082_v6 = vpop.f32.mrb[42].mxu1 }
 0xf68   :  { %v7352_v31 = vpop.f32.mrb[43].mxu1 }
 0xf6d   :  { %v6155_v7 = vpop.f32.mrb[34].mxu0 }
 0xf6e   :  { %v6232_v8 = vcombine.low %v6009_v1, %v6155_v7  ;;  %v6233_v9 = vcombine.high %v6009_v1, %v6155_v7  ;;  %v7359_v10 = vpop.f32.mrb[35].mxu0 }
 0xf70   :  { %v6240_v21 = vrot.slane %v6232_v8, %v8020_v41  ;;  %v6247_v23 = vrot.slane %v6233_v9, %v8020_v41 }
 0xf76   :  { %v6228_v13 = vpop.f32.mrb[44].mxu1 }
 0xf77   :  { %v6248_v16 = vcombine.low %v6082_v6, %v6228_v13  ;;  %v6249_v25 = vcombine.high %v6082_v6, %v6228_v13  ;;  %v7366_v0 = vpop.f32.mrb[45].mxu1 }
 0xf79   :  { %v6256_v27 = vrot.slane %v6248_v16, %v8020_v41  ;;  %v6263_v12 = vrot.slane %v6249_v25, %v8020_v41 }
 0xf7b   :  { %v6264_v15 = vcombine.low %v6240_v21, %v6256_v27  ;;  %v6265_v26 = vcombine.high %v6240_v21, %v6256_v27  ;;  %v6280_v29 = vcombine.low %v6247_v23, %v6263_v12  ;;  %v6281_v46 = vcombine.high %v6247_v23, %v6263_v12  ;;  %v6881_v21 = vld [vmem:[%s9171_s20] ss:$0 sm:$0xff] }
 0xf7d   :  { %v6272_v43 = vrot.slane %v6264_v15, %v8022_v48  ;;  %v6279_v32 = vrot.slane %v6265_v26, %v8022_v48  ;;  %v6288_v60 = vrot.slane %v6280_v29, %v8022_v48  ;;  %v6295_v33 = vrot.slane %v6281_v46, %v8022_v48  ;;  %v6516_v46 = vld [vmem:[%s9174_s23 + $0x10] sm:$0xff] }
 0xf7f   :  { %v6300_v34 = vcombine.low %v6272_v43, %v6279_v32  ;;  %v6879_v17 = vcombine.high %v6272_v43, %v6279_v32  ;;  %v6316_v18 = vcombine.low %v6288_v60, %v6295_v33  ;;  %v6880_v22 = vcombine.high %v6288_v60, %v6295_v33  ;;  %v6517_v32 = vld [vmem:[%s9174_s23 + $0x18] sm:$0xff]  ;;  %v6518_v33 = vld [vmem:[%s9175_s24] sm:$0xff] }
 0xf80   :  { %v7620_v60 = vpack.c.bf16 %v6517_v32, %v6516_v46 }
 0xf81   :  { %v6307_v51 = vrot.slane %v6300_v34, %v8020_v41  ;;  %v6315_v37 = vrot.slane %v6879_v17, %v8020_v41  ;;  %v6323_v38 = vrot.slane %v6316_v18, %v8020_v41  ;;  %v6331_v39 = vrot.slane %v6880_v22, %v8020_v41  ;;  %v6519_v34 = vld [vmem:[%s9175_s24 + $0x8] sm:$0xff] }
 0xf82   :  { %v7624_v17 = vpack.c.bf16 %v6519_v34, %v6518_v33 }
 0xf83   :  { %v6333_v28 = vcombine.high %v6307_v51, %v6315_v37  ;;  %v6349_v52 = vcombine.high %v6323_v38, %v6331_v39  ;;  %v6332_v2 = vcombine.low %v6307_v51, %v6315_v37  ;;  %v6348_v53 = vcombine.low %v6323_v38, %v6331_v39 }
 0xf85   :  { %v6347_v20 = vrot.slane %v6333_v28, %v8022_v48  ;;  %v6363_v54 = vrot.slane %v6349_v52, %v8022_v48  ;;  %v6340_v41 = vrot.slane %v6332_v2, %v8022_v48  ;;  %v6356_v61 = vrot.slane %v6348_v53, %v8022_v48 }
 0xf87   :  { %v6366_v47 = vcombine.low %v6347_v20, %v6363_v54  ;;  %v6365_v50 = vcombine.high %v6340_v41, %v6356_v61  ;;  %v6364_v55 = vcombine.low %v6340_v41, %v6356_v61  ;;  %v6367_v56 = vcombine.high %v6347_v20, %v6363_v54  ;;  %v6882_v41 = vld [vmem:[%s9172_s21] ss:$0 sm:$0xff]  ;;  %s7807_s21 = smov [#allocation2]  }
 0xf89   :  { %v7687_v35 = vpack.i.bf16 %v6366_v47, %v4829_v40  ;;  %v7682_v57 = vpack.i.bf16 %v6365_v50, %v4828_v11  ;;  %v7692_v58 = vpack.i.bf16 %v6367_v56, %v4830_v24  ;;  %v6883_v47 = vld [vmem:[%s9173_s22] ss:$0 sm:$0xff]  ;;  %s6749_s22 = sshll.u32 %s7807_s21, 4  ;;  %s6750_s22 = int_to_ptr.vmem [resolvable:$true] %s6749_s22 }
 0xf8a   :  { %s7775_s0 = scalar_lea.vmem %s6750_s22, 256  ;;  %p7780_p1 = scmp.lt.s32.totalorder %s6750_s22, %s6750_s22 }
 0xf8b   :  { %7688 = vrot.lane.b32.xlu1 %v7687_v35, %s7801_s11  ;;  %7683 = vrot.lane.b32.xlu0 %v7682_v57, %s7799_s29  ;;  %p7776_p0 = scmp.ne.s32.totalorder %s6750_s22, %s7775_s0  ;;  %p7781_p2 = scmp.lt.s32.totalorder %s7775_s0, %s7775_s0 }
 0xf8d   :  { %p7782_p3 = por %p7781_p2, %p7780_p1 }
 0xf8f   :  { %7693 = vrot.lane.b32.xlu1 %v7692_v58, %s7800_s6  ;;  %v6520_v58 = vld [vmem:[%s9175_s24 + $0x10] sm:$0xff]  ;;  %p7783_p4 = pnand %p7782_p3, %p7776_p0 }
 0xffd   :  { %v7689_v48 = vpop.permute.xlu1 %7688  ;;  %v7684_v1 = vpop.permute.xlu0 %7683 }
 0xffe   :  { %v7686_v4 = vunpack.i.h.bf16 %v7684_v1  ;;  %v7685_v6 = vunpack.i.l.bf16 %v7684_v1  ;;  %v7691_v40 = vunpack.i.h.bf16 %v7689_v48  ;;  %v7690_v31 = vunpack.i.l.bf16 %v7689_v48  ;;  %v6521_v48 = vld [vmem:[%s9175_s24 + $0x18] sm:$0xff] }
0x1000   :  { %v6380_v7 = vsel %vm135_vm0, %v6364_v55, %v7686_v4  ;;  %v4843_v5 = vsel %vm135_vm0, %v4827_v3, %v7685_v6  ;;  %v7628_v6 = vpack.c.bf16 %v6521_v48, %v6520_v58 }
0x1001   :  { %v7694_v14 = vpop.permute.xlu1 %7693  ;;  %v4844_v8 = vsel %vm1618_vm5, %v4843_v5, %v7690_v31  ;;  %v6381_v9 = vsel %vm1618_vm5, %v6380_v7, %v7691_v40  ;;  %v6522_v40 = vld [vmem:[%s9175_s24 + $0x20] sm:$0xff]  ;;  %v6523_v31 = vld [vmem:[%s9175_s24 + $0x28] sm:$0xff]  ;;  %v6524_v5 = vld [vmem:[%s9175_s24 + $0x30] sm:$0xff] }
0x1002   :  { %v7696_v24 = vunpack.i.h.bf16 %v7694_v14  ;;  %v7695_v11 = vunpack.i.l.bf16 %v7694_v14  ;;  %v7632_v7 = vpack.c.bf16 %v6523_v31, %v6522_v40  ;;  %v6525_v14 = vld [vmem:[%s9175_s24 + $0x38] sm:$0xff] }
0x1004   :  { %v4845_v10 = vsel %vm1620_vm6, %v4844_v8, %v7695_v11  ;;  %v6382_v13 = vsel %vm1620_vm6, %v6381_v9, %v7696_v24  ;;  %v7636_v24 = vpack.c.bf16 %v6525_v14, %v6524_v5  ;;  %v6526_v11 = vld [vmem:[%s9175_s24 + $0x40] sm:$0xff]  ;;  %v6527_v8 = vld [vmem:[%s9175_s24 + $0x48] sm:$0xff] }
0x1005   :  { %7399 = vmatprep.mubr.f32.mxu0 %v4845_v10  ;;  %v7640_v9 = vpack.c.bf16 %v6527_v8, %v6526_v11  ;;  %v6528_v10 = vld [vmem:[%s9175_s24 + $0x50] sm:$0xff] }
0x1006   :  { %7400 = vmatmul.mubr.f32.vlgmr.msra.gmra.mrb[36].mxu0 %v6382_v13  ;;  %v6529_v13 = vld [vmem:[%s9175_s24 + $0x58] sm:$0xff] }
0x10d9   :  { %v7401_v19 = vpop.f32.mrb[36].mxu0 }
0x10da   :  { %v6461_v63 = vadd.f32 %v7401_v19, %v6881_v21  ;;  %v6455_v3 = vpop.f32.mrb[37].mxu0  ;;  %v6530_v19 = vld [vmem:[%s9175_s24 + $0x60] sm:$0xff] }
0x10db   :  { %v6456_v23 = vadd.f32 %v6881_v21, %v6455_v3  ;;  %v7644_v21 = vpack.c.bf16 %v6529_v13, %v6528_v10 }
0x10dc   :  { %v6465_v16 = vadd.f32 %v6461_v63, %v8471_v49  ;;  %v6514_v49 = vld [vmem:[%s9174_s23] sm:$0xff]  ;;  %v6531_v63 = vld [vmem:[%s9175_s24 + $0x68] sm:$0xff] }
0x10dd   :  { %v6464_v25 = vadd.f32 %v6456_v23, %v8469_v42  ;;  %v6515_v42 = vld [vmem:[%s9174_s23 + $0x8] sm:$0xff]  ;;  %v7648_v3 = vpack.c.bf16 %v6531_v63, %v6530_v19  ;;  %v6532_v23 = vld [vmem:[%s9175_s24 + $0x70] sm:$0xff] }
0x10de   :  { %v6469_v0 = vsel %vm135_vm0, %v6465_v16, 0.0  ;;  %v6473_v26 = vmul.f32 %v6465_v16, %v6465_v16  ;;  %v7616_v43 = vpack.c.bf16 %v6515_v42, %v6514_v49 }
0x10df   :  { %6470 = vadd.xlane.f32.xlu1 %v6469_v0  ;;  %v6466_v27 = vsel %vm135_vm0, %v6464_v25, 0.0  ;;  %v6472_v12 = vmul.f32 %v6464_v25, %v6464_v25 }
0x10e0   :  { %6467 = vadd.xlane.f32.xlu0 %v6466_v27  ;;  %v6477_v29 = vsel %vm135_vm0, %v6473_v26, 0.0  ;;  %7617 = vmatprep.subr.bf16.mxu1 %v7616_v43 }
0x10e1   :  { %v6474_v15 = vsel %vm135_vm0, %v6472_v12, 0.0  ;;  %7619 = vmatpush3.bf16.msra.mxu1 %v7616_v43 }
0x10e2   :  { %7621 = vmatprep.subr.bf16.mxu1 %v7620_v60 }
0x10e4   :  { %6475 = vadd.xlane.f32.xlu0 %v6474_v15 }
0x10e5   :  { %7623 = vmatpush3.bf16.msra.mxu1 %v7620_v60 }
0x10e6   :  { %7625 = vmatprep.subr.bf16.mxu1 %v7624_v17 }
0x10e8   :  { %6478 = vadd.xlane.f32.xlu0 %v6477_v29 }
0x116c   :  { %v6471_v36 = vpop.xlane.xlu1 %6470 }
0x116d   :  { %v6468_v18 = vpop.xlane.xlu0 %6467  ;;  %v6481_v51 = vmul.f32 0.03125, %v6471_v36 }
0x116e   :  { %v6480_v22 = vmul.f32 0.03125, %v6468_v18 }
0x116f   :  { %v6485_v59 = vmul.f32 %v6481_v51, %v6481_v51  ;;  %v6491_v50 = vsub.f32 %v6465_v16, %v6481_v51  ;;  %v6533_v16 = vld [vmem:[%s9175_s24 + $0x78] sm:$0xff] }
0x1170   :  { %v6484_v37 = vmul.f32 %v6480_v22, %v6480_v22  ;;  %v6490_v20 = vsub.f32 %v6464_v25, %v6480_v22  ;;  %v7652_v25 = vpack.c.bf16 %v6533_v16, %v6532_v23 }
0x1171   :  { %v6476_v45 = vpop.xlane.xlu0 %6475 }
0x1172   :  { %v6482_v38 = vmul.f32 0.03125, %v6476_v45 }
0x1174   :  { %v6486_v39 = vsub.f32 %v6482_v38, %v6484_v37 }
0x1175   :  { %v6479_v62 = vpop.xlane.xlu0 %6478 }
0x1176   :  { %v6488_v30 = vmax.f32 %v6486_v39, 0.0  ;;  %v6483_v28 = vmul.f32 0.03125, %v6479_v62 }
0x1178   :  { %v6492_v52 = vadd.f32 1e-05, %v6488_v30  ;;  %v6487_v2 = vsub.f32 %v6483_v28, %v6485_v59 }
0x117a   :  { %7765 = vrsqrt.f32 %v6492_v52  ;;  %v6489_v53 = vmax.f32 %v6487_v2, 0.0 }
0x117c   :  { %v6493_v44 = vadd.f32 1e-05, %v6489_v53 }
0x117e   :  { %7767 = vrsqrt.f32 %v6493_v44 }
0x1184   :  { %v7766_v54 = vpop.eup %7765 }
0x1185   :  { %v6496_v61 = vmul.f32 %v7766_v54, %v6490_v20 }
0x1187   :  { %v6504_v55 = vmul.f32 %v6882_v41, %v6496_v61 }
0x1188   :  { %v7768_v56 = vpop.eup %7767 }
0x1189   :  { %v6497_v35 = vmul.f32 %v7768_v56, %v6491_v50  ;;  %v6512_v57 = vadd.f32 %v6883_v47, %v6504_v55  ;;  %v6887_v55 = vld [vmem:[%s9177_s26] ss:$0 sm:$0xff] }
0x118b   :  { %v6505_v1 = vmul.f32 %v6882_v41, %v6497_v35  ;;  %7410 = vmatprep.mubr.msk.f32.mxu1 %vm135_vm0, %v6512_v57  ;;  %v6886_v41 = vld [vmem:[%s9176_s25] ss:$0 sm:$0xff] }
0x118d   :  { %v6513_v4 = vadd.f32 %v6883_v47, %v6505_v1 }
0x118f   :  { %7411 = vmatmul.mubr.msk.f32.vlgmr.msra.gmra.mrb[46].mxu1 %vm135_vm0, %v6513_v4 }
0x1190   :  { %7627 = vmatpush3.bf16.msra.mxu1 %v7624_v17 }
0x1191   :  { %7629 = vmatprep.subr.bf16.mxu1 %v7628_v6 }
0x1194   :  { %7631 = vmatpush3.bf16.msra.mxu1 %v7628_v6 }
0x1195   :  { %7633 = vmatprep.subr.bf16.mxu1 %v7632_v7 }
0x1198   :  { %7635 = vmatpush3.bf16.msra.mxu1 %v7632_v7 }
0x1199   :  { %7637 = vmatprep.subr.bf16.mxu1 %v7636_v24 }
0x119c   :  { %7639 = vmatpush3.bf16.msra.mxu1 %v7636_v24 }
0x119d   :  { %7641 = vmatprep.subr.bf16.mxu1 %v7640_v9 }
0x11a0   :  { %7643 = vmatpush3.bf16.msra.mxu1 %v7640_v9 }
0x11a1   :  { %7645 = vmatprep.subr.bf16.mxu1 %v7644_v21 }
0x11a4   :  { %7647 = vmatpush3.bf16.msra.mxu1 %v7644_v21 }
0x11a5   :  { %7649 = vmatprep.subr.bf16.mxu1 %v7648_v3 }
0x11a8   :  { %7651 = vmatpush3.bf16.msra.mxu1 %v7648_v3 }
0x11a9   :  { %7653 = vmatprep.subr.bf16.mxu1 %v7652_v25 }
0x11ac   :  { %7655 = vmatpush3.bf16.msra.mxu1 %v7652_v25 }
0x1262   :  { %v7412_v0 = vpop.f32.mrb[46].mxu1 }
0x1263   :  { %v6606_v27 = vpop.f32.mrb[47].mxu1  ;;  %v6616_v15 = vmax.f32 %v7412_v0, 0.0 }
0x1264   :  { %v6615_v12 = vmax.f32 %v6606_v27, 0.0 }
0x1266   :  { %7445 = vmatprep.mubr.f32.mxu1 %v6615_v12 }
0x1267   :  { %7446 = vmatmul.mubr.f32.vlgmr.msra.gmra.mrb[48].mxu1 %v6616_v15 }
0x133a   :  { %v7447_v26 = vpop.f32.mrb[48].mxu1 }
0x133b   :  { %v6689_v29 = vadd.f32 %v7447_v26, %v6513_v4  ;;  %v6683_v49 = vpop.f32.mrb[49].mxu1 }
0x133c   :  { %v6684_v42 = vadd.f32 %v6683_v49, %v6512_v57 }
0x133d   :  { %v6697_v46 = vsel %vm135_vm0, %v6689_v29, 0.0  ;;  %v6701_v43 = vmul.f32 %v6689_v29, %v6689_v29 }
0x133e   :  { %6698 = vadd.xlane.f32.xlu0 %v6697_v46  ;;  %v6694_v32 = vsel %vm135_vm0, %v6684_v42, 0.0  ;;  %v6700_v60 = vmul.f32 %v6684_v42, %v6684_v42 }
0x133f   :  { %6695 = vadd.xlane.f32.xlu1 %v6694_v32  ;;  %v6705_v33 = vsel %vm135_vm0, %v6701_v43, 0.0 }
0x1340   :  { %v6702_v34 = vsel %vm135_vm0, %v6700_v60, 0.0 }
0x1342   :  { %6706 = vadd.xlane.f32.xlu0 %v6705_v33 }
0x1343   :  { %6703 = vadd.xlane.f32.xlu1 %v6702_v34 }
0x13cb   :  { %v6699_v17 = vpop.xlane.xlu0 %6698 }
0x13cc   :  { %v6709_v18 = vmul.f32 0.03125, %v6699_v17  ;;  %v6696_v22 = vpop.xlane.xlu1 %6695 }
0x13cd   :  { %v6708_v36 = vmul.f32 0.03125, %v6696_v22 }
0x13ce   :  { %v6713_v51 = vmul.f32 %v6709_v18, %v6709_v18  ;;  %v6719_v44 = vsub.f32 %v6689_v29, %v6709_v18 }
0x13cf   :  { %v6707_v45 = vpop.xlane.xlu0 %6706  ;;  %v6712_v39 = vmul.f32 %v6708_v36, %v6708_v36  ;;  %v6718_v54 = vsub.f32 %v6684_v42, %v6708_v36 }
0x13d0   :  { %v6711_v37 = vmul.f32 0.03125, %v6707_v45  ;;  %v6704_v38 = vpop.xlane.xlu1 %6703 }
0x13d1   :  { %v6710_v62 = vmul.f32 0.03125, %v6704_v38 }
0x13d2   :  { %v6715_v59 = vsub.f32 %v6711_v37, %v6713_v51 }
0x13d3   :  { %v6714_v30 = vsub.f32 %v6710_v62, %v6712_v39 }
0x13d4   :  { %v6717_v28 = vmax.f32 %v6715_v59, 0.0 }
0x13d5   :  { %v6716_v52 = vmax.f32 %v6714_v30, 0.0 }
0x13d6   :  { %v6721_v2 = vadd.f32 1e-05, %v6717_v28 }
0x13d7   :  { %v6720_v53 = vadd.f32 1e-05, %v6716_v52 }
0x13d8   :  { %7769 = vrsqrt.f32 %v6721_v2 }
0x13d9   :  { %7771 = vrsqrt.f32 %v6720_v53 }
0x13e2   :  { %v7770_v20 = vpop.eup %7769 }
0x13e3   :  { %v7772_v61 = vpop.eup %7771  ;;  %v6725_v47 = vmul.f32 %v7770_v20, %v6719_v44 }
0x13e4   :  { %v6724_v50 = vmul.f32 %v7772_v61, %v6718_v54 }
0x13e5   :  { %v6733_v56 = vmul.f32 %v6886_v41, %v6725_v47 }
0x13e6   :  { %v6732_v35 = vmul.f32 %v6886_v41, %v6724_v50 }
0x13e7   :  { %v6741_v57 = vadd.f32 %v6887_v55, %v6733_v56 }
0x13e8   :  { %v6740_v58 = vadd.f32 %v6887_v55, %v6732_v35 }
0x13e9   :  { %6743 = vst.msk [vmem:[#allocation2 + $0x8] sm:$0xff] %vm135_vm0, %v6741_v57 }
0x13ea   :  { %6742 = vst.msk [vmem:[#allocation2] sm:$0xff] %vm135_vm0, %v6740_v58 }
0x13eb   :  { %7786 = shalt.err (!%p7783_p4)
}
0x13ec   :  { %s7787_s1 = scalar_lea.hbm %s9178_s27, 256 }
0x13ed   :  { %p7788_p5 = scmp.ne.s32.totalorder %s9178_s27, %s7787_s1  ;;  %p7791_p6 = scmp.lt.u32.totalorder %s7787_s1, %s9178_s27 }
0x13ef   :  { %p7793_p7 = pnand %p7791_p6, %p7788_p5 }
0x13f1   :  { %7796 = shalt.err (!%p7793_p7)
}
0x13f2   :  { %s7808_s6 = smov 128   ;;  %s7809_s11 = smov 8  }
0x13f3   :  { %6755 = dma.vmem_to_hbm [thread:$0]  %s6750_s22, 256, %s9178_s27, [#allocation3], %s7808_s6, %s7808_s6, %s7809_s11  }
0x13f4   :  { %7797 = dma.done.wait [#allocation3], 256  }
0x13f5   :  { %7798 = vsyncadd [#allocation3], 4294967040 }
0x13f6   :  { %6759 = vsyncpa [#allocation3], 1 }

</bundles_post_ra>
